<compile_context>
chip_gen: v5e
topology: v5e:2x2
jax: 0.10.0
libtpu: 0.0.40
codegen_flags: <defaults>
</compile_context>

<pallas_src>
import functools

import jax
import jax.numpy as jnp
from jax.experimental import pallas as pl
from jax.experimental.pallas import tpu as pltpu

NEG_SLOPE = 0.01  # torch.nn.functional.leaky_relu default

OBS_SHAPE = (4, 8, 8)        # (C, H, W)
NUM_ACTIONS = 6
NUM_CONV_LAYERS = 3          # conv0 5x5 'same', conv1 3x3 'same', conv2 3x3 'valid'
NUM_FILTERS = 8
NUM_HIDDEN_LAYERS = 1
SIZE_HIDDEN_LAYERS = 32
CELL_SIZE = 32
HEAD_WIDTH = 128             # policy logits + value, zero-padded to a full lane width


def _leaky_relu(x):
    return jnp.where(x > 0, x, NEG_SLOPE * x)


def _bf16(x):
    return x.astype(jnp.bfloat16)


# --------------------------------------------------------------------------
# Fused forward kernel: conv stack -> dense -> LSTM -> policy/value head.
# --------------------------------------------------------------------------
def _fused_forward_kernel(*refs, num_dense, batch, seq_len):
    (x0_ref, m0_ref, b0_ref, m1_ref, b1_ref, m2_ref, b2_ref) = refs[:7]
    idx = 7
    dense_refs = refs[idx:idx + 2 * num_dense]
    idx += 2 * num_dense
    (wih_ref, blstm_ref, whh_ref, h0_ref, c0_ref, wh_ref, bh_ref,
     head_ref, hn_ref, cn_ref) = refs[idx:]

    cs = CELL_SIZE

    # ---- Conv stack as lane-dense GEMMs on [T*B, features] (bias + leaky_relu fused).
    # Activations kept in f32, cast to bf16 right before each MXU dot.
    a = x0_ref[...]                                    # bf16 [T*B, C*H*W]
    a = _leaky_relu(jnp.dot(a, m0_ref[...], preferred_element_type=jnp.float32)
                    + b0_ref[...])
    a = _leaky_relu(jnp.dot(_bf16(a), m1_ref[...], preferred_element_type=jnp.float32)
                    + b1_ref[...])
    a = _leaky_relu(jnp.dot(_bf16(a), m2_ref[...], preferred_element_type=jnp.float32)
                    + b2_ref[...])

    # ---- Hidden dense layers
    for d in range(num_dense):
        w = dense_refs[2 * d][...]
        b = dense_refs[2 * d + 1][...]
        a = _leaky_relu(jnp.dot(_bf16(a), w, preferred_element_type=jnp.float32) + b)

    # ---- Hoisted input-gate GEMM: all T*B rows at once, one lane-dense N=128 matmul.
    #      Columns are ordered i|f|g|o (PyTorch gate order).  Kept in vregs (no scratch).
    gx = (jnp.dot(_bf16(a), wih_ref[...], preferred_element_type=jnp.float32)
          + blstm_ref[...])                            # f32 [T*B, 4*cell]

    # ---- LSTM recurrence, fully unrolled over T; ONE merged matmul per step.
    whh = whh_ref[...]                                 # bf16 [cell, 4*cell]
    h = h0_ref[...]                                    # f32 [B, cell]
    c = c0_ref[...]                                    # f32 [B, cell]
    h_steps = []
    for t in range(seq_len):
        r0 = t * batch
        z = gx[r0:r0 + batch, :] + jnp.dot(_bf16(h), whh,
                                           preferred_element_type=jnp.float32)
        i_g = jax.nn.sigmoid(z[:, 0 * cs:1 * cs])
        f_g = jax.nn.sigmoid(z[:, 1 * cs:2 * cs])
        g_g = jnp.tanh(z[:, 2 * cs:3 * cs])
        o_g = jax.nn.sigmoid(z[:, 3 * cs:4 * cs])
        c = f_g * c + i_g * g_g
        h = o_g * jnp.tanh(c)
        h_steps.append(h)

    hn_ref[...] = h
    cn_ref[...] = c

    # ---- Hoisted, fused policy+value head: one GEMM + one lane-dense store.
    h_all = jnp.concatenate(h_steps, axis=0)           # f32 [T*B, cell], time-major
    head_ref[...] = (jnp.dot(_bf16(h_all), wh_ref[...],
                             preferred_element_type=jnp.float32) + bh_ref[...])


# --------------------------------------------------------------------------
# Weight-side preprocessing (one-time, outside the hot path)
# --------------------------------------------------------------------------
def _conv_matrix(w, in_hw, out_hw, pad):
    """Dense (Toeplitz) matrix M so that flat_out = flat_in @ M equals the conv.

    flat_in rows:  frame flattened as (ci, yi, xi)  -> length Cin*Hi*Wi
    flat_out cols: frame flattened as (co, yo, xo)  -> length Cout*Ho*Wo
    Matches torch Conv2d with stride 1 and zero padding `pad`.
    """
    cout, cin, kh, kw = w.shape
    hi, wi_ = in_hw
    ho, wo_ = out_hw
    ky = jnp.arange(kh)[:, None, None]
    yi = jnp.arange(hi)[None, :, None]
    yo = jnp.arange(ho)[None, None, :]
    my = (yi == yo + ky - pad)                       # [KH, Hi, Ho]
    kx = jnp.arange(kw)[:, None, None]
    xi = jnp.arange(wi_)[None, :, None]
    xo = jnp.arange(wo_)[None, None, :]
    mx = (xi == xo + kx - pad)                       # [KW, Wi, Wo]
    taps = (my[:, None, :, None, :, None]
            & mx[None, :, None, :, None, :]).astype(w.dtype)   # [KH,KW,Hi,Wi,Ho,Wo]
    m = jnp.einsum('ocij,ijyxpq->cyxopq', w, taps)   # [Cin, Hi, Wi, Cout, Ho, Wo]
    return m.reshape(cin * hi * wi_, cout * ho * wo_)


def prepare_params(p):
    """Build kernel-ready weights once: Toeplitz conv matrices (bf16), merged per-gate
    LSTM matrices (bf16), fused lane-padded policy/value head (bf16)."""
    _, H, W = OBS_SHAPE
    Hv, Wv = H - 2, W - 2                            # conv2 'valid' output size
    cs = CELL_SIZE

    # TODO(synk): if weight DMA still dominates after bf16, switch to a per-tap
    # (shifted-activation) conv formulation to drop conv weights from ~1 MB to ~8 KB.
    m0 = _bf16(_conv_matrix(p['conv0_w'], (H, W), (H, W), pad=2))    # [C*H*W, F*H*W]
    m1 = _bf16(_conv_matrix(p['conv1_w'], (H, W), (H, W), pad=1))    # [F*H*W, F*H*W]
    m2 = _bf16(_conv_matrix(p['conv2_w'], (H, W), (Hv, Wv), pad=0))  # [F*H*W, F*Hv*Wv]
    b0 = jnp.repeat(p['conv0_b'], H * W)[None, :]
    b1 = jnp.repeat(p['conv1_b'], H * W)[None, :]
    b2 = jnp.repeat(p['conv2_b'], Hv * Wv)[None, :]

    dense = []
    for i in range(NUM_HIDDEN_LAYERS):
        dense.append((_bf16(p[f'dense{i}_w'].T), p[f'dense{i}_b'][None, :]))

    # Merged (lane-dense) LSTM weights: columns ordered i|f|g|o (PyTorch order).
    wih = _bf16(p['lstm_w_ih'].T)                      # [D, 4*cell]
    whh = _bf16(p['lstm_w_hh'].T)                      # [cell, 4*cell]
    blstm = (p['lstm_b_ih'] + p['lstm_b_hh'])[None, :]  # f32 [1, 4*cell]

    # Fused policy + value head, zero-padded to HEAD_WIDTH=128 lanes.
    pad_rows = HEAD_WIDTH - (NUM_ACTIONS + 1)
    wh = _bf16(jnp.concatenate(
        [p['policy_w'], p['value_w'], jnp.zeros((pad_rows, cs), jnp.float32)], axis=0).T)
    bh = jnp.concatenate(
        [p['policy_b'], p['value_b'], jnp.zeros((pad_rows,), jnp.float32)])[None, :]

    return dict(m0=m0, b0=b0, m1=m1, b1=b1, m2=m2, b2=b2, dense=dense,
                wih=wih, blstm=blstm, whh=whh, wh=wh, bh=bh)


# --------------------------------------------------------------------------
# Model
# --------------------------------------------------------------------------
def init_params(key):
    """Deterministic parameter init (synthetic, mirrors the module's shapes/layout)."""
    ks = iter(jax.random.split(key, 32))
    p = {}
    C = OBS_SHAPE[0]
    p['conv0_w'] = 0.1 * jax.random.normal(next(ks), (NUM_FILTERS, C, 5, 5), jnp.float32)
    p['conv0_b'] = 0.1 * jax.random.normal(next(ks), (NUM_FILTERS,), jnp.float32)
    for i in (1, 2):
        p[f'conv{i}_w'] = 0.1 * jax.random.normal(
            next(ks), (NUM_FILTERS, NUM_FILTERS, 3, 3), jnp.float32)
        p[f'conv{i}_b'] = 0.1 * jax.random.normal(next(ks), (NUM_FILTERS,), jnp.float32)
    conv_out_size = NUM_FILTERS * (OBS_SHAPE[1] - 2) * (OBS_SHAPE[2] - 2)
    prev = conv_out_size
    for i in range(NUM_HIDDEN_LAYERS):
        p[f'dense{i}_w'] = 0.05 * jax.random.normal(
            next(ks), (SIZE_HIDDEN_LAYERS, prev), jnp.float32)
        p[f'dense{i}_b'] = 0.05 * jax.random.normal(
            next(ks), (SIZE_HIDDEN_LAYERS,), jnp.float32)
        prev = SIZE_HIDDEN_LAYERS
    p['lstm_w_ih'] = 0.1 * jax.random.normal(next(ks), (4 * CELL_SIZE, prev), jnp.float32)
    p['lstm_w_hh'] = 0.1 * jax.random.normal(next(ks), (4 * CELL_SIZE, CELL_SIZE), jnp.float32)
    p['lstm_b_ih'] = 0.1 * jax.random.normal(next(ks), (4 * CELL_SIZE,), jnp.float32)
    p['lstm_b_hh'] = 0.1 * jax.random.normal(next(ks), (4 * CELL_SIZE,), jnp.float32)
    p['policy_w'] = 0.1 * jax.random.normal(next(ks), (NUM_ACTIONS, CELL_SIZE), jnp.float32)
    p['policy_b'] = 0.1 * jax.random.normal(next(ks), (NUM_ACTIONS,), jnp.float32)
    p['value_w'] = 0.1 * jax.random.normal(next(ks), (1, CELL_SIZE), jnp.float32)
    p['value_b'] = 0.1 * jax.random.normal(next(ks), (1,), jnp.float32)
    return p


def forward(prep, obs, states):
    """obs: [B, T, C, H, W]; states: (h0 [1, B, cell], c0 [1, B, cell])."""
    B, T = obs.shape[:2]
    C, H, W = obs.shape[2:]
    # Time-major flatten (rows = t*B + b) so each LSTM step reads a contiguous block.
    x0 = _bf16(jnp.transpose(obs, (1, 0, 2, 3, 4)).reshape(T * B, C * H * W))
    h0, c0 = states[0][0], states[1][0]

    dense = prep['dense']
    inputs = [x0, prep['m0'], prep['b0'], prep['m1'], prep['b1'], prep['m2'], prep['b2']]
    for w, b in dense:
        inputs += [w, b]
    inputs += [prep['wih'], prep['blstm'], prep['whh'], h0, c0, prep['wh'], prep['bh']]

    kernel = functools.partial(_fused_forward_kernel, num_dense=len(dense),
                               batch=B, seq_len=T)
    head, hn, cn = pl.pallas_call(
        kernel,
        out_shape=[
            jax.ShapeDtypeStruct((T * B, HEAD_WIDTH), jnp.float32),
            jax.ShapeDtypeStruct((B, CELL_SIZE), jnp.float32),
            jax.ShapeDtypeStruct((B, CELL_SIZE), jnp.float32),
        ],
        in_specs=[pl.BlockSpec(memory_space=pltpu.MemorySpace.VMEM)] * len(inputs),
        out_specs=[pl.BlockSpec(memory_space=pltpu.MemorySpace.VMEM)] * 3,
    )(*inputs)

    head = head.reshape(T, B, HEAD_WIDTH).transpose(1, 0, 2)      # [B, T, HEAD_WIDTH]
    action_logits = head[:, :, :NUM_ACTIONS]
    values = head[:, :, NUM_ACTIONS:NUM_ACTIONS + 1]
    new_states = (hn[None, ...], cn[None, ...])                   # [1, B, cell] like nn.LSTM
    # TODO(synk): seq_lens / pack_padded_sequence masking not implemented (seq_lens=None path only).
    return action_logits, values, new_states


# --------------------------------------------------------------------------
# Pure-JAX f32 reference (for a numerical sanity check of the fused kernel)
# --------------------------------------------------------------------------
def reference_forward(p, obs, states):
    B, T = obs.shape[:2]
    x = obs.reshape(B * T, *obs.shape[2:])
    for name, pad in (('conv0', 2), ('conv1', 1), ('conv2', 0)):
        x = jax.lax.conv_general_dilated(
            x, p[f'{name}_w'], (1, 1), [(pad, pad), (pad, pad)],
            dimension_numbers=('NCHW', 'OIHW', 'NCHW'))
        x = _leaky_relu(x + p[f'{name}_b'][None, :, None, None])
    x = x.reshape(B * T, -1)
    for i in range(NUM_HIDDEN_LAYERS):
        x = _leaky_relu(x @ p[f'dense{i}_w'].T + p[f'dense{i}_b'])
    x = x.reshape(B, T, -1)
    h, c = states[0][0], states[1][0]
    bias = p['lstm_b_ih'] + p['lstm_b_hh']
    cs = CELL_SIZE
    outs = []
    for t in range(T):
        z = x[:, t, :] @ p['lstm_w_ih'].T + h @ p['lstm_w_hh'].T + bias
        i_g = jax.nn.sigmoid(z[:, 0 * cs:1 * cs])
        f_g = jax.nn.sigmoid(z[:, 1 * cs:2 * cs])
        g_g = jnp.tanh(z[:, 2 * cs:3 * cs])
        o_g = jax.nn.sigmoid(z[:, 3 * cs:4 * cs])
        c = f_g * c + i_g * g_g
        h = o_g * jnp.tanh(c)
        outs.append(h)
    hseq = jnp.stack(outs, axis=1)                                # [B, T, cell]
    logits = hseq @ p['policy_w'].T + p['policy_b']
    values = hseq @ p['value_w'].T + p['value_b']
    return logits, values, (h[None], c[None])


if __name__ == "__main__":
    key = jax.random.PRNGKey(0)
    pkey, okey = jax.random.split(key)
    params = init_params(pkey)
    prep = prepare_params(params)     # one-time weight preprocessing (outside hot path)

    B, T = 2, 4
    C, H, W = OBS_SHAPE
    obs = jax.random.normal(okey, (B, T, C, H, W), jnp.float32)
    states = (jnp.zeros((1, B, CELL_SIZE), jnp.float32),
              jnp.zeros((1, B, CELL_SIZE), jnp.float32))

    fwd = jax.jit(forward)
    logits, values, new_states = fwd(prep, obs, states)
    jax.block_until_ready((logits, values, new_states))

    assert logits.shape == (B, T, NUM_ACTIONS)
    assert values.shape == (B, T, 1)
    assert new_states[0].shape == (1, B, CELL_SIZE)
    assert new_states[1].shape == (1, B, CELL_SIZE)

    # Numerical sanity check vs. pure-JAX f32 reference (loose tol: bf16 weights).
    rlogits, rvalues, (rh, rc) = reference_forward(params, obs, states)
    max_err = max(float(jnp.max(jnp.abs(logits - rlogits))),
                  float(jnp.max(jnp.abs(values - rvalues))),
                  float(jnp.max(jnp.abs(new_states[0] - rh))),
                  float(jnp.max(jnp.abs(new_states[1] - rc))))
    assert max_err < 0.2, f"kernel/reference mismatch: max abs err {max_err}"

    print("KERNEL_OK")
</pallas_src>

<mosaic_0001>
module attributes {stable_mosaic.version = 11 : i64} {
  func.func @_fused_forward_kernel(%arg0: memref<8x256xbf16, #tpu.memory_space<vmem>>, %arg1: memref<256x512xbf16, #tpu.memory_space<vmem>>, %arg2: memref<1x512xf32, #tpu.memory_space<vmem>>, %arg3: memref<512x512xbf16, #tpu.memory_space<vmem>>, %arg4: memref<1x512xf32, #tpu.memory_space<vmem>>, %arg5: memref<512x288xbf16, #tpu.memory_space<vmem>>, %arg6: memref<1x288xf32, #tpu.memory_space<vmem>>, %arg7: memref<288x32xbf16, #tpu.memory_space<vmem>>, %arg8: memref<1x32xf32, #tpu.memory_space<vmem>>, %arg9: memref<32x128xbf16, #tpu.memory_space<vmem>>, %arg10: memref<1x128xf32, #tpu.memory_space<vmem>>, %arg11: memref<32x128xbf16, #tpu.memory_space<vmem>>, %arg12: memref<2x32xf32, #tpu.memory_space<vmem>>, %arg13: memref<2x32xf32, #tpu.memory_space<vmem>>, %arg14: memref<32x128xbf16, #tpu.memory_space<vmem>>, %arg15: memref<1x128xf32, #tpu.memory_space<vmem>>, %arg16: memref<8x128xf32, #tpu.memory_space<vmem>>, %arg17: memref<2x32xf32, #tpu.memory_space<vmem>>, %arg18: memref<2x32xf32, #tpu.memory_space<vmem>>) attributes {dimension_semantics = [], scalar_prefetch = 0 : i64, scratch_operands = 0 : i64, tpu.core_type = #tpu.core_type<tc>} {
    %c0 = arith.constant 0 : index
    %c0_0 = arith.constant 0 : index
    %0 = vector.load %arg0[%c0, %c0_0] : memref<8x256xbf16, #tpu.memory_space<vmem>>, vector<8x256xbf16>
    %c0_1 = arith.constant 0 : index
    %c0_2 = arith.constant 0 : index
    %1 = vector.load %arg1[%c0_1, %c0_2] : memref<256x512xbf16, #tpu.memory_space<vmem>>, vector<256x512xbf16>
    %cst = arith.constant dense<0.000000e+00> : vector<8x512xf32>
    %2 = tpu.matmul %0, %1, %cst {dimension_numbers = #tpu.dot_dimension_numbers<[1], [0], [0], [1], [0, 0, 1, 1], [], []>} : vector<8x256xbf16>, vector<256x512xbf16>, vector<8x512xf32> -> vector<8x512xf32>
    %c0_3 = arith.constant 0 : index
    %c0_4 = arith.constant 0 : index
    %3 = vector.load %arg2[%c0_3, %c0_4] : memref<1x512xf32, #tpu.memory_space<vmem>>, vector<1x512xf32>
    %4 = vector.broadcast %3 : vector<1x512xf32> to vector<8x512xf32>
    %5 = arith.addf %2, %4 : vector<8x512xf32>
    %cst_5 = arith.constant 0.000000e+00 : f32
    %6 = vector.broadcast %cst_5 : f32 to vector<8x512xf32>
    %7 = arith.cmpf ogt, %5, %6 : vector<8x512xf32>
    %cst_6 = arith.constant 0.00999999977 : f32
    %8 = vector.broadcast %cst_6 : f32 to vector<8x512xf32>
    %9 = arith.mulf %8, %5 : vector<8x512xf32>
    %10 = arith.select %7, %5, %9 : vector<8x512xi1>, vector<8x512xf32>
    %11 = arith.truncf %10 : vector<8x512xf32> to vector<8x512xbf16>
    %c0_7 = arith.constant 0 : index
    %c0_8 = arith.constant 0 : index
    %12 = vector.load %arg3[%c0_7, %c0_8] : memref<512x512xbf16, #tpu.memory_space<vmem>>, vector<512x512xbf16>
    %cst_9 = arith.constant dense<0.000000e+00> : vector<8x512xf32>
    %13 = tpu.matmul %11, %12, %cst_9 {dimension_numbers = #tpu.dot_dimension_numbers<[1], [0], [0], [1], [0, 0, 1, 1], [], []>} : vector<8x512xbf16>, vector<512x512xbf16>, vector<8x512xf32> -> vector<8x512xf32>
    %c0_10 = arith.constant 0 : index
    %c0_11 = arith.constant 0 : index
    %14 = vector.load %arg4[%c0_10, %c0_11] : memref<1x512xf32, #tpu.memory_space<vmem>>, vector<1x512xf32>
    %15 = vector.broadcast %14 : vector<1x512xf32> to vector<8x512xf32>
    %16 = arith.addf %13, %15 : vector<8x512xf32>
    %cst_12 = arith.constant 0.000000e+00 : f32
    %17 = vector.broadcast %cst_12 : f32 to vector<8x512xf32>
    %18 = arith.cmpf ogt, %16, %17 : vector<8x512xf32>
    %cst_13 = arith.constant 0.00999999977 : f32
    %19 = vector.broadcast %cst_13 : f32 to vector<8x512xf32>
    %20 = arith.mulf %19, %16 : vector<8x512xf32>
    %21 = arith.select %18, %16, %20 : vector<8x512xi1>, vector<8x512xf32>
    %22 = arith.truncf %21 : vector<8x512xf32> to vector<8x512xbf16>
    %c0_14 = arith.constant 0 : index
    %c0_15 = arith.constant 0 : index
    %23 = vector.load %arg5[%c0_14, %c0_15] : memref<512x288xbf16, #tpu.memory_space<vmem>>, vector<512x288xbf16>
    %cst_16 = arith.constant dense<0.000000e+00> : vector<8x288xf32>
    %24 = tpu.matmul %22, %23, %cst_16 {dimension_numbers = #tpu.dot_dimension_numbers<[1], [0], [0], [1], [0, 0, 1, 1], [], []>} : vector<8x512xbf16>, vector<512x288xbf16>, vector<8x288xf32> -> vector<8x288xf32>
    %c0_17 = arith.constant 0 : index
    %c0_18 = arith.constant 0 : index
    %25 = vector.load %arg6[%c0_17, %c0_18] : memref<1x288xf32, #tpu.memory_space<vmem>>, vector<1x288xf32>
    %26 = vector.broadcast %25 : vector<1x288xf32> to vector<8x288xf32>
    %27 = arith.addf %24, %26 : vector<8x288xf32>
    %cst_19 = arith.constant 0.000000e+00 : f32
    %28 = vector.broadcast %cst_19 : f32 to vector<8x288xf32>
    %29 = arith.cmpf ogt, %27, %28 : vector<8x288xf32>
    %cst_20 = arith.constant 0.00999999977 : f32
    %30 = vector.broadcast %cst_20 : f32 to vector<8x288xf32>
    %31 = arith.mulf %30, %27 : vector<8x288xf32>
    %32 = arith.select %29, %27, %31 : vector<8x288xi1>, vector<8x288xf32>
    %c0_21 = arith.constant 0 : index
    %c0_22 = arith.constant 0 : index
    %33 = vector.load %arg7[%c0_21, %c0_22] : memref<288x32xbf16, #tpu.memory_space<vmem>>, vector<288x32xbf16>
    %c0_23 = arith.constant 0 : index
    %c0_24 = arith.constant 0 : index
    %34 = vector.load %arg8[%c0_23, %c0_24] : memref<1x32xf32, #tpu.memory_space<vmem>>, vector<1x32xf32>
    %35 = arith.truncf %32 : vector<8x288xf32> to vector<8x288xbf16>
    %cst_25 = arith.constant dense<0.000000e+00> : vector<8x32xf32>
    %36 = tpu.matmul %35, %33, %cst_25 {dimension_numbers = #tpu.dot_dimension_numbers<[1], [0], [0], [1], [0, 0, 1, 1], [], []>} : vector<8x288xbf16>, vector<288x32xbf16>, vector<8x32xf32> -> vector<8x32xf32>
    %37 = vector.broadcast %34 : vector<1x32xf32> to vector<8x32xf32>
    %38 = arith.addf %36, %37 : vector<8x32xf32>
    %cst_26 = arith.constant 0.000000e+00 : f32
    %39 = vector.broadcast %cst_26 : f32 to vector<8x32xf32>
    %40 = arith.cmpf ogt, %38, %39 : vector<8x32xf32>
    %cst_27 = arith.constant 0.00999999977 : f32
    %41 = vector.broadcast %cst_27 : f32 to vector<8x32xf32>
    %42 = arith.mulf %41, %38 : vector<8x32xf32>
    %43 = arith.select %40, %38, %42 : vector<8x32xi1>, vector<8x32xf32>
    %44 = arith.truncf %43 : vector<8x32xf32> to vector<8x32xbf16>
    %c0_28 = arith.constant 0 : index
    %c0_29 = arith.constant 0 : index
    %45 = vector.load %arg9[%c0_28, %c0_29] : memref<32x128xbf16, #tpu.memory_space<vmem>>, vector<32x128xbf16>
    %cst_30 = arith.constant dense<0.000000e+00> : vector<8x128xf32>
    %46 = tpu.matmul %44, %45, %cst_30 {dimension_numbers = #tpu.dot_dimension_numbers<[1], [0], [0], [1], [0, 0, 1, 1], [], []>} : vector<8x32xbf16>, vector<32x128xbf16>, vector<8x128xf32> -> vector<8x128xf32>
    %c0_31 = arith.constant 0 : index
    %c0_32 = arith.constant 0 : index
    %47 = vector.load %arg10[%c0_31, %c0_32] : memref<1x128xf32, #tpu.memory_space<vmem>>, vector<1x128xf32>
    %48 = vector.broadcast %47 : vector<1x128xf32> to vector<8x128xf32>
    %49 = arith.addf %46, %48 : vector<8x128xf32>
    %c0_33 = arith.constant 0 : index
    %c0_34 = arith.constant 0 : index
    %50 = vector.load %arg11[%c0_33, %c0_34] : memref<32x128xbf16, #tpu.memory_space<vmem>>, vector<32x128xbf16>
    %c0_35 = arith.constant 0 : index
    %c0_36 = arith.constant 0 : index
    %51 = vector.load %arg12[%c0_35, %c0_36] : memref<2x32xf32, #tpu.memory_space<vmem>>, vector<2x32xf32>
    %c0_37 = arith.constant 0 : index
    %c0_38 = arith.constant 0 : index
    %52 = vector.load %arg13[%c0_37, %c0_38] : memref<2x32xf32, #tpu.memory_space<vmem>>, vector<2x32xf32>
    %53 = vector.extract_strided_slice %49 {offsets = [0, 0], sizes = [2, 128], strides = [1, 1]} : vector<8x128xf32> to vector<2x128xf32>
    %54 = arith.truncf %51 : vector<2x32xf32> to vector<2x32xbf16>
    %cst_39 = arith.constant dense<0.000000e+00> : vector<2x128xf32>
    %55 = tpu.matmul %54, %50, %cst_39 {dimension_numbers = #tpu.dot_dimension_numbers<[1], [0], [0], [1], [0, 0, 1, 1], [], []>} : vector<2x32xbf16>, vector<32x128xbf16>, vector<2x128xf32> -> vector<2x128xf32>
    %56 = arith.addf %53, %55 : vector<2x128xf32>
    %57 = vector.extract_strided_slice %56 {offsets = [0, 0], sizes = [2, 32], strides = [1, 1]} : vector<2x128xf32> to vector<2x32xf32>
    %58 = arith.negf %57 : vector<2x32xf32>
    %59 = math.exp %58 : vector<2x32xf32>
    %cst_40 = arith.constant 1.000000e+00 : f32
    %60 = vector.broadcast %cst_40 : f32 to vector<2x32xf32>
    %61 = arith.addf %60, %59 : vector<2x32xf32>
    %62 = arith.divf %60, %61 : vector<2x32xf32>
    %63 = vector.extract_strided_slice %56 {offsets = [0, 32], sizes = [2, 32], strides = [1, 1]} : vector<2x128xf32> to vector<2x32xf32>
    %64 = arith.negf %63 : vector<2x32xf32>
    %65 = math.exp %64 : vector<2x32xf32>
    %cst_41 = arith.constant 1.000000e+00 : f32
    %66 = vector.broadcast %cst_41 : f32 to vector<2x32xf32>
    %67 = arith.addf %66, %65 : vector<2x32xf32>
    %68 = arith.divf %66, %67 : vector<2x32xf32>
    %69 = vector.extract_strided_slice %56 {offsets = [0, 64], sizes = [2, 32], strides = [1, 1]} : vector<2x128xf32> to vector<2x32xf32>
    %70 = math.tanh %69 : vector<2x32xf32>
    %71 = vector.extract_strided_slice %56 {offsets = [0, 96], sizes = [2, 32], strides = [1, 1]} : vector<2x128xf32> to vector<2x32xf32>
    %72 = arith.negf %71 : vector<2x32xf32>
    %73 = math.exp %72 : vector<2x32xf32>
    %cst_42 = arith.constant 1.000000e+00 : f32
    %74 = vector.broadcast %cst_42 : f32 to vector<2x32xf32>
    %75 = arith.addf %74, %73 : vector<2x32xf32>
    %76 = arith.divf %74, %75 : vector<2x32xf32>
    %77 = arith.mulf %68, %52 : vector<2x32xf32>
    %78 = arith.mulf %62, %70 : vector<2x32xf32>
    %79 = arith.addf %77, %78 : vector<2x32xf32>
    %80 = math.tanh %79 : vector<2x32xf32>
    %81 = arith.mulf %76, %80 : vector<2x32xf32>
    %82 = vector.extract_strided_slice %49 {offsets = [2, 0], sizes = [2, 128], strides = [1, 1]} : vector<8x128xf32> to vector<2x128xf32>
    %83 = arith.truncf %81 : vector<2x32xf32> to vector<2x32xbf16>
    %cst_43 = arith.constant dense<0.000000e+00> : vector<2x128xf32>
    %84 = tpu.matmul %83, %50, %cst_43 {dimension_numbers = #tpu.dot_dimension_numbers<[1], [0], [0], [1], [0, 0, 1, 1], [], []>} : vector<2x32xbf16>, vector<32x128xbf16>, vector<2x128xf32> -> vector<2x128xf32>
    %85 = arith.addf %82, %84 : vector<2x128xf32>
    %86 = vector.extract_strided_slice %85 {offsets = [0, 0], sizes = [2, 32], strides = [1, 1]} : vector<2x128xf32> to vector<2x32xf32>
    %87 = arith.negf %86 : vector<2x32xf32>
    %88 = math.exp %87 : vector<2x32xf32>
    %cst_44 = arith.constant 1.000000e+00 : f32
    %89 = vector.broadcast %cst_44 : f32 to vector<2x32xf32>
    %90 = arith.addf %89, %88 : vector<2x32xf32>
    %91 = arith.divf %89, %90 : vector<2x32xf32>
    %92 = vector.extract_strided_slice %85 {offsets = [0, 32], sizes = [2, 32], strides = [1, 1]} : vector<2x128xf32> to vector<2x32xf32>
    %93 = arith.negf %92 : vector<2x32xf32>
    %94 = math.exp %93 : vector<2x32xf32>
    %cst_45 = arith.constant 1.000000e+00 : f32
    %95 = vector.broadcast %cst_45 : f32 to vector<2x32xf32>
    %96 = arith.addf %95, %94 : vector<2x32xf32>
    %97 = arith.divf %95, %96 : vector<2x32xf32>
    %98 = vector.extract_strided_slice %85 {offsets = [0, 64], sizes = [2, 32], strides = [1, 1]} : vector<2x128xf32> to vector<2x32xf32>
    %99 = math.tanh %98 : vector<2x32xf32>
    %100 = vector.extract_strided_slice %85 {offsets = [0, 96], sizes = [2, 32], strides = [1, 1]} : vector<2x128xf32> to vector<2x32xf32>
    %101 = arith.negf %100 : vector<2x32xf32>
    %102 = math.exp %101 : vector<2x32xf32>
    %cst_46 = arith.constant 1.000000e+00 : f32
    %103 = vector.broadcast %cst_46 : f32 to vector<2x32xf32>
    %104 = arith.addf %103, %102 : vector<2x32xf32>
    %105 = arith.divf %103, %104 : vector<2x32xf32>
    %106 = arith.mulf %97, %79 : vector<2x32xf32>
    %107 = arith.mulf %91, %99 : vector<2x32xf32>
    %108 = arith.addf %106, %107 : vector<2x32xf32>
    %109 = math.tanh %108 : vector<2x32xf32>
    %110 = arith.mulf %105, %109 : vector<2x32xf32>
    %111 = vector.extract_strided_slice %49 {offsets = [4, 0], sizes = [2, 128], strides = [1, 1]} : vector<8x128xf32> to vector<2x128xf32>
    %112 = arith.truncf %110 : vector<2x32xf32> to vector<2x32xbf16>
    %cst_47 = arith.constant dense<0.000000e+00> : vector<2x128xf32>
    %113 = tpu.matmul %112, %50, %cst_47 {dimension_numbers = #tpu.dot_dimension_numbers<[1], [0], [0], [1], [0, 0, 1, 1], [], []>} : vector<2x32xbf16>, vector<32x128xbf16>, vector<2x128xf32> -> vector<2x128xf32>
    %114 = arith.addf %111, %113 : vector<2x128xf32>
    %115 = vector.extract_strided_slice %114 {offsets = [0, 0], sizes = [2, 32], strides = [1, 1]} : vector<2x128xf32> to vector<2x32xf32>
    %116 = arith.negf %115 : vector<2x32xf32>
    %117 = math.exp %116 : vector<2x32xf32>
    %cst_48 = arith.constant 1.000000e+00 : f32
    %118 = vector.broadcast %cst_48 : f32 to vector<2x32xf32>
    %119 = arith.addf %118, %117 : vector<2x32xf32>
    %120 = arith.divf %118, %119 : vector<2x32xf32>
    %121 = vector.extract_strided_slice %114 {offsets = [0, 32], sizes = [2, 32], strides = [1, 1]} : vector<2x128xf32> to vector<2x32xf32>
    %122 = arith.negf %121 : vector<2x32xf32>
    %123 = math.exp %122 : vector<2x32xf32>
    %cst_49 = arith.constant 1.000000e+00 : f32
    %124 = vector.broadcast %cst_49 : f32 to vector<2x32xf32>
    %125 = arith.addf %124, %123 : vector<2x32xf32>
    %126 = arith.divf %124, %125 : vector<2x32xf32>
    %127 = vector.extract_strided_slice %114 {offsets = [0, 64], sizes = [2, 32], strides = [1, 1]} : vector<2x128xf32> to vector<2x32xf32>
    %128 = math.tanh %127 : vector<2x32xf32>
    %129 = vector.extract_strided_slice %114 {offsets = [0, 96], sizes = [2, 32], strides = [1, 1]} : vector<2x128xf32> to vector<2x32xf32>
    %130 = arith.negf %129 : vector<2x32xf32>
    %131 = math.exp %130 : vector<2x32xf32>
    %cst_50 = arith.constant 1.000000e+00 : f32
    %132 = vector.broadcast %cst_50 : f32 to vector<2x32xf32>
    %133 = arith.addf %132, %131 : vector<2x32xf32>
    %134 = arith.divf %132, %133 : vector<2x32xf32>
    %135 = arith.mulf %126, %108 : vector<2x32xf32>
    %136 = arith.mulf %120, %128 : vector<2x32xf32>
    %137 = arith.addf %135, %136 : vector<2x32xf32>
    %138 = math.tanh %137 : vector<2x32xf32>
    %139 = arith.mulf %134, %138 : vector<2x32xf32>
    %140 = vector.extract_strided_slice %49 {offsets = [6, 0], sizes = [2, 128], strides = [1, 1]} : vector<8x128xf32> to vector<2x128xf32>
    %141 = arith.truncf %139 : vector<2x32xf32> to vector<2x32xbf16>
    %cst_51 = arith.constant dense<0.000000e+00> : vector<2x128xf32>
    %142 = tpu.matmul %141, %50, %cst_51 {dimension_numbers = #tpu.dot_dimension_numbers<[1], [0], [0], [1], [0, 0, 1, 1], [], []>} : vector<2x32xbf16>, vector<32x128xbf16>, vector<2x128xf32> -> vector<2x128xf32>
    %143 = arith.addf %140, %142 : vector<2x128xf32>
    %144 = vector.extract_strided_slice %143 {offsets = [0, 0], sizes = [2, 32], strides = [1, 1]} : vector<2x128xf32> to vector<2x32xf32>
    %145 = arith.negf %144 : vector<2x32xf32>
    %146 = math.exp %145 : vector<2x32xf32>
    %cst_52 = arith.constant 1.000000e+00 : f32
    %147 = vector.broadcast %cst_52 : f32 to vector<2x32xf32>
    %148 = arith.addf %147, %146 : vector<2x32xf32>
    %149 = arith.divf %147, %148 : vector<2x32xf32>
    %150 = vector.extract_strided_slice %143 {offsets = [0, 32], sizes = [2, 32], strides = [1, 1]} : vector<2x128xf32> to vector<2x32xf32>
    %151 = arith.negf %150 : vector<2x32xf32>
    %152 = math.exp %151 : vector<2x32xf32>
    %cst_53 = arith.constant 1.000000e+00 : f32
    %153 = vector.broadcast %cst_53 : f32 to vector<2x32xf32>
    %154 = arith.addf %153, %152 : vector<2x32xf32>
    %155 = arith.divf %153, %154 : vector<2x32xf32>
    %156 = vector.extract_strided_slice %143 {offsets = [0, 64], sizes = [2, 32], strides = [1, 1]} : vector<2x128xf32> to vector<2x32xf32>
    %157 = math.tanh %156 : vector<2x32xf32>
    %158 = vector.extract_strided_slice %143 {offsets = [0, 96], sizes = [2, 32], strides = [1, 1]} : vector<2x128xf32> to vector<2x32xf32>
    %159 = arith.negf %158 : vector<2x32xf32>
    %160 = math.exp %159 : vector<2x32xf32>
    %cst_54 = arith.constant 1.000000e+00 : f32
    %161 = vector.broadcast %cst_54 : f32 to vector<2x32xf32>
    %162 = arith.addf %161, %160 : vector<2x32xf32>
    %163 = arith.divf %161, %162 : vector<2x32xf32>
    %164 = arith.mulf %155, %137 : vector<2x32xf32>
    %165 = arith.mulf %149, %157 : vector<2x32xf32>
    %166 = arith.addf %164, %165 : vector<2x32xf32>
    %167 = math.tanh %166 : vector<2x32xf32>
    %168 = arith.mulf %163, %167 : vector<2x32xf32>
    %c0_55 = arith.constant 0 : index
    %c0_56 = arith.constant 0 : index
    %169 = vector.load %arg17[%c0_55, %c0_56] : memref<2x32xf32, #tpu.memory_space<vmem>>, vector<2x32xf32>
    tpu.vector_store %arg17[%c0_55, %c0_56], %168 {strides = array<i32>} : memref<2x32xf32, #tpu.memory_space<vmem>>, vector<2x32xf32>,
    %c0_57 = arith.constant 0 : index
    %c0_58 = arith.constant 0 : index
    %170 = vector.load %arg18[%c0_57, %c0_58] : memref<2x32xf32, #tpu.memory_space<vmem>>, vector<2x32xf32>
    tpu.vector_store %arg18[%c0_57, %c0_58], %166 {strides = array<i32>} : memref<2x32xf32, #tpu.memory_space<vmem>>, vector<2x32xf32>,
    %171 = tpu.concatenate %81, %110, %139, %168 in 0 : vector<2x32xf32>, vector<2x32xf32>, vector<2x32xf32>, vector<2x32xf32> -> vector<8x32xf32>
    %172 = arith.truncf %171 : vector<8x32xf32> to vector<8x32xbf16>
    %c0_59 = arith.constant 0 : index
    %c0_60 = arith.constant 0 : index
    %173 = vector.load %arg14[%c0_59, %c0_60] : memref<32x128xbf16, #tpu.memory_space<vmem>>, vector<32x128xbf16>
    %cst_61 = arith.constant dense<0.000000e+00> : vector<8x128xf32>
    %174 = tpu.matmul %172, %173, %cst_61 {dimension_numbers = #tpu.dot_dimension_numbers<[1], [0], [0], [1], [0, 0, 1, 1], [], []>} : vector<8x32xbf16>, vector<32x128xbf16>, vector<8x128xf32> -> vector<8x128xf32>
    %c0_62 = arith.constant 0 : index
    %c0_63 = arith.constant 0 : index
    %175 = vector.load %arg15[%c0_62, %c0_63] : memref<1x128xf32, #tpu.memory_space<vmem>>, vector<1x128xf32>
    %176 = vector.broadcast %175 : vector<1x128xf32> to vector<8x128xf32>
    %177 = arith.addf %174, %176 : vector<8x128xf32>
    %c0_64 = arith.constant 0 : index
    %c0_65 = arith.constant 0 : index
    %178 = vector.load %arg16[%c0_64, %c0_65] : memref<8x128xf32, #tpu.memory_space<vmem>>, vector<8x128xf32>
    tpu.vector_store %arg16[%c0_64, %c0_65], %177 {strides = array<i32>} : memref<8x128xf32, #tpu.memory_space<vmem>>, vector<8x128xf32>,
    return
  }
}

</mosaic_0001>

<bundles_post_ra>
// kernel: forward.1
= control target key start
LH: loop header
LB: loop body
LE: loop exit
PB: predicated region body
PF: predicated region fallthrough
CT: control target
= control target key end

     0   :  { %s6717_s0 = inlined_call_operand.vmem [shape: bf16[8,256], index: 0, kind: input, shape index: {}]   ;;  %s6718_s1 = inlined_call_operand.vmem [shape: bf16[256,512], index: 1, kind: input, shape index: {}]   ;;  %s6719_s2 = inlined_call_operand.vmem [shape: f32[1,512], index: 2, kind: input, shape index: {}]   ;;  %s6720_s3 = inlined_call_operand.vmem [shape: bf16[512,512], index: 3, kind: input, shape index: {}]   ;;  %s6721_s4 = inlined_call_operand.vmem [shape: f32[1,512], index: 4, kind: input, shape index: {}]   ;;  %s6722_s5 = inlined_call_operand.vmem [shape: bf16[512,288], index: 5, kind: input, shape index: {}]   ;;  %s6723_s6 = inlined_call_operand.vmem [shape: f32[1,288], index: 6, kind: input, shape index: {}]   ;;  %s6724_s7 = inlined_call_operand.vmem [shape: bf16[288,32], index: 7, kind: input, shape index: {}]   ;;  %s6725_s8 = inlined_call_operand.vmem [shape: f32[1,32], index: 8, kind: input, shape index: {}]   ;;  %s6726_s9 = inlined_call_operand.vmem [shape: bf16[32,128], index: 9, kind: input, shape index: {}]   ;;  %s6727_s10 = inlined_call_operand.vmem [shape: f32[1,128], index: 10, kind: input, shape index: {}]   ;;  %s6728_s11 = inlined_call_operand.vmem [shape: bf16[32,128], index: 11, kind: input, shape index: {}]   ;;  %s6729_s12 = inlined_call_operand.vmem [shape: f32[2,32], index: 12, kind: input, shape index: {}]   ;;  %s6730_s13 = inlined_call_operand.vmem [shape: f32[2,32], index: 13, kind: input, shape index: {}]   ;;  %s6731_s14 = inlined_call_operand.vmem [shape: bf16[32,128], index: 14, kind: input, shape index: {}]   ;;  %s6732_s15 = inlined_call_operand.vmem [shape: f32[1,128], index: 15, kind: input, shape index: {}]   ;;  %s6733_s16 = inlined_call_operand.vmem [shape: f32[8,128], index: 16, kind: output, shape index: {0}]   ;;  %s6734_s17 = inlined_call_operand.hbm [shape: f32[2,32], index: 17, kind: output, shape index: {1}]   ;;  %s6735_s18 = inlined_call_operand.hbm [shape: f32[2,32], index: 18, kind: output, shape index: {2}]  }
   0x1   :  { %6737 = sst [smem:[#allocation8_spill]] %s6717_s0 }
   0x2   :  { %6738 = sst [smem:[#allocation9_spill]] %s6718_s1 }
   0x3   :  { %6739 = sst [smem:[#allocation10_spill]] %s6719_s2 }
   0x4   :  { %24 = vsyncpa [#allocation3], 0  ;;  %s6740_s29 = sld [smem:[#allocation9_spill]] }
   0x5   :  { %s6741_s25 = sld [smem:[#allocation8_spill]] }
   0xa   :  { %v3109_v0 = vld [vmem:[%s6740_s29 + $0xe0] sm:$0xf]  ;;  %v4284_v1 = vld [vmem:[%s6740_s29 + $0xec] sm:$0xf0]  ;;  %v4282_v5 = vld [vmem:[%s6740_s29 + $0xe4] sm:$0xf] }
   0xb   :  { %v3237_v2 = vld [vmem:[%s6740_s29 + $0x1e0] sm:$0xf]  ;;  %v3110_v3 = vor.u32 %v4284_v1, %v3109_v0  ;;  %v4316_v4 = vld [vmem:[%s6740_s29 + $0x1ec] sm:$0xf0]  ;;  %v3111_v6 = vld [vmem:[%s6740_s29 + $0xf0] sm:$0xf0] }
   0xc   :  { %v3238_v7 = vor.u32 %v4316_v4, %v3237_v2  ;;  %v3114_v8 = vor.u32 %v4282_v5, %v3111_v6  ;;  %v4314_v9 = vld [vmem:[%s6740_s29 + $0x1e4] sm:$0xf]  ;;  %v3239_v10 = vld [vmem:[%s6740_s29 + $0x1f0] sm:$0xf0]  ;;  %v3093_v11 = vld [vmem:[%s6740_s29 + $0xc0] sm:$0xf] }
   0xd   :  { %461 = vmatpush.bf16.msra.mxu0 %v3110_v3  ;;  %v3242_v12 = vor.u32 %v4314_v9, %v3239_v10  ;;  %v4280_v13 = vld [vmem:[%s6740_s29 + $0xcc] sm:$0xf0]  ;;  %v3221_v14 = vld [vmem:[%s6740_s29 + $0x1c0] sm:$0xf]  ;;  %v4278_v18 = vld [vmem:[%s6740_s29 + $0xc4] sm:$0xf] }
   0xe   :  { %v4312_v15 = vld [vmem:[%s6740_s29 + $0x1cc] sm:$0xf0]  ;;  %474 = vmatpush.bf16.msra.mxu1 %v3238_v7  ;;  %487 = vmatpush.bf16.msra.mxu2 %v3114_v8  ;;  %v3094_v16 = vor.u32 %v4280_v13, %v3093_v11  ;;  %v3095_v19 = vld [vmem:[%s6740_s29 + $0xd0] sm:$0xf0]  ;;  %v4310_v20 = vld [vmem:[%s6740_s29 + $0x1c4] sm:$0xf] }
   0xf   :  { %v3222_v17 = vor.u32 %v4312_v15, %v3221_v14  ;;  %500 = vmatpush.bf16.msra.mxu3 %v3242_v12  ;;  %v3098_v21 = vor.u32 %v4278_v18, %v3095_v19  ;;  %v3223_v22 = vld [vmem:[%s6740_s29 + $0x1d0] sm:$0xf0]  ;;  %v3077_v23 = vld [vmem:[%s6740_s29 + $0xa0] sm:$0xf]  ;;  %v4276_v24 = vld [vmem:[%s6740_s29 + $0xac] sm:$0xf0] }
  0x10   :  { %v3226_v25 = vor.u32 %v4310_v20, %v3223_v22  ;;  %v3205_v26 = vld [vmem:[%s6740_s29 + $0x1a0] sm:$0xf]  ;;  %v4308_v27 = vld [vmem:[%s6740_s29 + $0x1ac] sm:$0xf0]  ;;  %v4274_v28 = vld [vmem:[%s6740_s29 + $0xa4] sm:$0xf]  ;;  %v3078_v29 = vor.u32 %v4276_v24, %v3077_v23 }
  0x11   :  { %462 = vmatpush.bf16.msra.mxu0 %v3094_v16  ;;  %v3079_v30 = vld [vmem:[%s6740_s29 + $0xb0] sm:$0xf0]  ;;  %v4306_v31 = vld [vmem:[%s6740_s29 + $0x1a4] sm:$0xf]  ;;  %v3206_v33 = vor.u32 %v4308_v27, %v3205_v26  ;;  %v3061_v35 = vld [vmem:[%s6740_s29 + $0x80] sm:$0xf] }
  0x12   :  { %v3207_v32 = vld [vmem:[%s6740_s29 + $0x1b0] sm:$0xf0]  ;;  %475 = vmatpush.bf16.msra.mxu1 %v3222_v17  ;;  %488 = vmatpush.bf16.msra.mxu2 %v3098_v21  ;;  %v3082_v34 = vor.u32 %v4274_v28, %v3079_v30  ;;  %v4272_v36 = vld [vmem:[%s6740_s29 + $0x8c] sm:$0xf0]  ;;  %v3189_v37 = vld [vmem:[%s6740_s29 + $0x180] sm:$0xf] }
  0x13   :  { %501 = vmatpush.bf16.msra.mxu3 %v3226_v25  ;;  %v3210_v38 = vor.u32 %v4306_v31, %v3207_v32  ;;  %v4304_v39 = vld [vmem:[%s6740_s29 + $0x18c] sm:$0xf0]  ;;  %v4270_v40 = vld [vmem:[%s6740_s29 + $0x84] sm:$0xf]  ;;  %v3063_v41 = vld [vmem:[%s6740_s29 + $0x90] sm:$0xf0]  ;;  %v3062_v44 = vor.u32 %v4272_v36, %v3061_v35 }
  0x14   :  { %v4302_v42 = vld [vmem:[%s6740_s29 + $0x184] sm:$0xf]  ;;  %v3191_v43 = vld [vmem:[%s6740_s29 + $0x190] sm:$0xf0]  ;;  %v3190_v45 = vor.u32 %v4304_v39, %v3189_v37  ;;  %v3066_v46 = vor.u32 %v4270_v40, %v3063_v41  ;;  %v3045_v47 = vld [vmem:[%s6740_s29 + $0x60] sm:$0xf] }
  0x15   :  { %463 = vmatpush.bf16.msra.mxu0 %v3078_v29  ;;  %v4268_v48 = vld [vmem:[%s6740_s29 + $0x6c] sm:$0xf0]  ;;  %v3173_v49 = vld [vmem:[%s6740_s29 + $0x160] sm:$0xf]  ;;  %v3194_v50 = vor.u32 %v4302_v42, %v3191_v43  ;;  %v4266_v52 = vld [vmem:[%s6740_s29 + $0x64] sm:$0xf] }
  0x16   :  { %476 = vmatpush.bf16.msra.mxu1 %v3206_v33  ;;  %489 = vmatpush.bf16.msra.mxu2 %v3082_v34  ;;  %v4300_v51 = vld [vmem:[%s6740_s29 + $0x16c] sm:$0xf0]  ;;  %v3047_v53 = vld [vmem:[%s6740_s29 + $0x70] sm:$0xf0]  ;;  %v4298_v54 = vld [vmem:[%s6740_s29 + $0x164] sm:$0xf]  ;;  %v3046_v56 = vor.u32 %v4268_v48, %v3045_v47 }
  0x17   :  { %502 = vmatpush.bf16.msra.mxu3 %v3210_v38  ;;  %v3175_v55 = vld [vmem:[%s6740_s29 + $0x170] sm:$0xf0]  ;;  %v3174_v57 = vor.u32 %v4300_v51, %v3173_v49  ;;  %v3050_v58 = vor.u32 %v4266_v52, %v3047_v53  ;;  %v3029_v59 = vld [vmem:[%s6740_s29 + $0x40] sm:$0xf]  ;;  %v4264_v60 = vld [vmem:[%s6740_s29 + $0x4c] sm:$0xf0] }
  0x18   :  { %v3157_v61 = vld [vmem:[%s6740_s29 + $0x140] sm:$0xf]  ;;  %v3178_v62 = vor.u32 %v4298_v54, %v3175_v55  ;;  %v4296_v63 = vld [vmem:[%s6740_s29 + $0x14c] sm:$0xf0]  ;;  %v4262_v0 = vld [vmem:[%s6740_s29 + $0x44] sm:$0xf]  ;;  %v3030_v4 = vor.u32 %v4264_v60, %v3029_v59 }
  0x19   :  { %464 = vmatpush.bf16.msra.mxu0 %v3062_v44  ;;  %v3031_v1 = vld [vmem:[%s6740_s29 + $0x50] sm:$0xf0]  ;;  %v4294_v2 = vld [vmem:[%s6740_s29 + $0x144] sm:$0xf]  ;;  %v3158_v5 = vor.u32 %v4296_v63, %v3157_v61  ;;  %v3013_v7 = vld [vmem:[%s6740_s29 + $0x20] sm:$0xf] }
  0x1a   :  { %477 = vmatpush.bf16.msra.mxu1 %v3190_v45  ;;  %490 = vmatpush.bf16.msra.mxu2 %v3066_v46  ;;  %v3159_v3 = vld [vmem:[%s6740_s29 + $0x150] sm:$0xf0]  ;;  %v3034_v6 = vor.u32 %v4262_v0, %v3031_v1  ;;  %v4260_v8 = vld [vmem:[%s6740_s29 + $0x2c] sm:$0xf0]  ;;  %v3141_v9 = vld [vmem:[%s6740_s29 + $0x120] sm:$0xf] }
  0x1b   :  { %503 = vmatpush.bf16.msra.mxu3 %v3194_v50  ;;  %v3162_v10 = vor.u32 %v4294_v2, %v3159_v3  ;;  %v4292_v11 = vld [vmem:[%s6740_s29 + $0x12c] sm:$0xf0]  ;;  %v4258_v12 = vld [vmem:[%s6740_s29 + $0x24] sm:$0xf]  ;;  %v3015_v13 = vld [vmem:[%s6740_s29 + $0x30] sm:$0xf0]  ;;  %v3014_v16 = vor.u32 %v4260_v8, %v3013_v7 }
  0x1c   :  { %v4290_v14 = vld [vmem:[%s6740_s29 + $0x124] sm:$0xf]  ;;  %v3143_v15 = vld [vmem:[%s6740_s29 + $0x130] sm:$0xf0]  ;;  %v2997_v17 = vld [vmem:[%s6740_s29] sm:$0xf]  ;;  %v3142_v20 = vor.u32 %v4292_v11, %v3141_v9  ;;  %v3018_v21 = vor.u32 %v4258_v12, %v3015_v13 }
  0x1d   :  { %465 = vmatpush.bf16.msra.mxu0 %v3046_v56  ;;  %v4256_v18 = vld [vmem:[%s6740_s29 + $0xc] sm:$0xf0]  ;;  %v3125_v19 = vld [vmem:[%s6740_s29 + $0x100] sm:$0xf]  ;;  %v4254_v23 = vld [vmem:[%s6740_s29 + $0x4] sm:$0xf]  ;;  %v3146_v25 = vor.u32 %v4290_v14, %v3143_v15 }
  0x1e   :  { %478 = vmatpush.bf16.msra.mxu1 %v3174_v57  ;;  %491 = vmatpush.bf16.msra.mxu2 %v3050_v58  ;;  %v4288_v22 = vld [vmem:[%s6740_s29 + $0x10c] sm:$0xf0]  ;;  %v59_v24 = vld [vmem:[%s6741_s25] sm:$0xff]  ;;  %v2999_v26 = vld [vmem:[%s6740_s29 + $0x10] sm:$0xf0]  ;;  %v2998_v32 = vor.u32 %v4256_v18, %v2997_v17 }
  0x1f   :  { %504 = vmatpush.bf16.msra.mxu3 %v3178_v62  ;;  %v4286_v27 = vld [vmem:[%s6740_s29 + $0x104] sm:$0xf]  ;;  %v3127_v28 = vld [vmem:[%s6740_s29 + $0x110] sm:$0xf0]  ;;  %v3117_v29 = vld [vmem:[%s6740_s29 + $0xe8] sm:$0xf]  ;;  %v135_v36 = vunpack.c.l.b16 %v59_v24  ;;  %v3126_v37 = vor.u32 %v4288_v22, %v3125_v19  ;;  %v3002_v38 = vor.u32 %v4254_v23, %v2999_v26  ;;  %v136_v41 = vunpack.c.h.b16 %v59_v24 }
  0x20   :  { %v4285_v30 = vld [vmem:[%s6740_s29 + $0xf4] sm:$0xf0]  ;;  %v3245_v31 = vld [vmem:[%s6740_s29 + $0x1e8] sm:$0xf]  ;;  %v4283_v34 = vld [vmem:[%s6740_s29 + $0xec] sm:$0xf]  ;;  %v3130_v42 = vor.u32 %v4286_v27, %v3127_v28 }
  0x21   :  { %466 = vmatpush.bf16.msra.mxu0 %v3030_v4  ;;  %v4317_v33 = vld [vmem:[%s6740_s29 + $0x1f4] sm:$0xf0]  ;;  %v3119_v35 = vld [vmem:[%s6740_s29 + $0xf8] sm:$0xf0]  ;;  %v4315_v39 = vld [vmem:[%s6740_s29 + $0x1ec] sm:$0xf]  ;;  %v3118_v43 = vor.u32 %v4285_v30, %v3117_v29  ;;  %v4986_v50 = vpack.c.b16 %v135_v36, %v135_v36  ;;  %v4997_v54 = vpack.c.b16 %v136_v41, %v136_v41 }
  0x22   :  { %479 = vmatpush.bf16.msra.mxu1 %v3158_v5  ;;  %492 = vmatpush.bf16.msra.mxu2 %v3034_v6  ;;  %v3247_v40 = vld [vmem:[%s6740_s29 + $0x1f8] sm:$0xf0]  ;;  %v3246_v44 = vor.u32 %v4317_v33, %v3245_v31  ;;  %v3122_v45 = vor.u32 %v4283_v34, %v3119_v35  ;;  %v3101_v46 = vld [vmem:[%s6740_s29 + $0xc8] sm:$0xf]  ;;  %v4281_v47 = vld [vmem:[%s6740_s29 + $0xd4] sm:$0xf0] }
  0x23   :  { %505 = vmatpush.bf16.msra.mxu3 %v3162_v10  ;;  %v3229_v48 = vld [vmem:[%s6740_s29 + $0x1c8] sm:$0xf]  ;;  %v3250_v49 = vor.u32 %v4315_v39, %v3247_v40  ;;  %v4313_v51 = vld [vmem:[%s6740_s29 + $0x1d4] sm:$0xf0]  ;;  %v4279_v52 = vld [vmem:[%s6740_s29 + $0xcc] sm:$0xf]  ;;  %v3102_v57 = vor.u32 %v4281_v47, %v3101_v46 }
  0x24   :  { %v3103_v53 = vld [vmem:[%s6740_s29 + $0xd8] sm:$0xf0]  ;;  %v4311_v55 = vld [vmem:[%s6740_s29 + $0x1cc] sm:$0xf]  ;;  %v3230_v58 = vor.u32 %v4313_v51, %v3229_v48  ;;  %v3085_v60 = vld [vmem:[%s6740_s29 + $0xa8] sm:$0xf] }
  0x25   :  { %467 = vmatpush.bf16.msra.mxu0 %v3014_v16  ;;  %v3231_v56 = vld [vmem:[%s6740_s29 + $0x1d8] sm:$0xf0]  ;;  %v3106_v59 = vor.u32 %v4279_v52, %v3103_v53  ;;  %v4277_v61 = vld [vmem:[%s6740_s29 + $0xb4] sm:$0xf0]  ;;  %v3213_v62 = vld [vmem:[%s6740_s29 + $0x1a8] sm:$0xf] }
  0x26   :  { %480 = vmatpush.bf16.msra.mxu1 %v3142_v20  ;;  %493 = vmatpush.bf16.msra.mxu2 %v3018_v21  ;;  %v3234_v63 = vor.u32 %v4311_v55, %v3231_v56  ;;  %v4309_v0 = vld [vmem:[%s6740_s29 + $0x1b4] sm:$0xf0]  ;;  %v4275_v1 = vld [vmem:[%s6740_s29 + $0xac] sm:$0xf]  ;;  %v3087_v2 = vld [vmem:[%s6740_s29 + $0xb8] sm:$0xf0]  ;;  %v3086_v5 = vor.u32 %v4277_v61, %v3085_v60 }
  0x27   :  { %506 = vmatpush.bf16.msra.mxu3 %v3146_v25  ;;  %v4307_v3 = vld [vmem:[%s6740_s29 + $0x1ac] sm:$0xf]  ;;  %v3215_v4 = vld [vmem:[%s6740_s29 + $0x1b8] sm:$0xf0]  ;;  %v3214_v6 = vor.u32 %v4309_v0, %v3213_v62  ;;  %v3090_v7 = vor.u32 %v4275_v1, %v3087_v2  ;;  %v3069_v8 = vld [vmem:[%s6740_s29 + $0x88] sm:$0xf] }
  0x28   :  { %v4273_v9 = vld [vmem:[%s6740_s29 + $0x94] sm:$0xf0]  ;;  %v3197_v10 = vld [vmem:[%s6740_s29 + $0x188] sm:$0xf]  ;;  %v3218_v11 = vor.u32 %v4307_v3, %v3215_v4  ;;  %v4271_v13 = vld [vmem:[%s6740_s29 + $0x8c] sm:$0xf] }
  0x29   :  { %468 = vmatpush.bf16.msra.mxu0 %v2998_v32  ;;  %v4305_v12 = vld [vmem:[%s6740_s29 + $0x194] sm:$0xf0]  ;;  %v3071_v14 = vld [vmem:[%s6740_s29 + $0x98] sm:$0xf0]  ;;  %v4303_v15 = vld [vmem:[%s6740_s29 + $0x18c] sm:$0xf]  ;;  %v3070_v17 = vor.u32 %v4273_v9, %v3069_v8 }
  0x2a   :  { %481 = vmatpush.bf16.msra.mxu1 %v3126_v37  ;;  %494 = vmatpush.bf16.msra.mxu2 %v3002_v38  ;;  %v3199_v16 = vld [vmem:[%s6740_s29 + $0x198] sm:$0xf0]  ;;  %v3198_v18 = vor.u32 %v4305_v12, %v3197_v10  ;;  %v3074_v19 = vor.u32 %v4271_v13, %v3071_v14  ;;  %v3053_v20 = vld [vmem:[%s6740_s29 + $0x68] sm:$0xf]  ;;  %v4269_v21 = vld [vmem:[%s6740_s29 + $0x74] sm:$0xf0] }
  0x2b   :  { %507 = vmatpush.bf16.msra.mxu3 %v3130_v42  ;;  %v3181_v22 = vld [vmem:[%s6740_s29 + $0x168] sm:$0xf]  ;;  %v3202_v23 = vor.u32 %v4303_v15, %v3199_v16  ;;  %v4301_v24 = vld [vmem:[%s6740_s29 + $0x174] sm:$0xf0]  ;;  %v4267_v25 = vld [vmem:[%s6740_s29 + $0x6c] sm:$0xf]  ;;  %v3054_v29 = vor.u32 %v4269_v21, %v3053_v20 }
  0x2c   :  { %469 = vmatmul.bf16.vlgmr.msra.gmra.mxu0 %v4986_v50  ;;  %v3055_v26 = vld [vmem:[%s6740_s29 + $0x78] sm:$0xf0]  ;;  %v4299_v27 = vld [vmem:[%s6740_s29 + $0x16c] sm:$0xf]  ;;  %v3182_v30 = vor.u32 %v4301_v24, %v3181_v22  ;;  %v3037_v32 = vld [vmem:[%s6740_s29 + $0x48] sm:$0xf] }
  0x2d   :  { %513 = vmatpush.bf16.msrb.mxu0 %v3118_v43  ;;  %495 = vmatmul.bf16.vlgmr.msra.gmra.mxu2 %v4986_v50  ;;  %v3183_v28 = vld [vmem:[%s6740_s29 + $0x178] sm:$0xf0]  ;;  %v3058_v31 = vor.u32 %v4267_v25, %v3055_v26  ;;  %v4265_v33 = vld [vmem:[%s6740_s29 + $0x54] sm:$0xf0]  ;;  %v3165_v34 = vld [vmem:[%s6740_s29 + $0x148] sm:$0xf] }
  0x2e   :  { %526 = vmatpush.bf16.msrb.mxu1 %v3246_v44  ;;  %539 = vmatpush.bf16.msrb.mxu2 %v3122_v45  ;;  %v3186_v35 = vor.u32 %v4299_v27, %v3183_v28  ;;  %v4297_v36 = vld [vmem:[%s6740_s29 + $0x154] sm:$0xf0]  ;;  %v4263_v37 = vld [vmem:[%s6740_s29 + $0x4c] sm:$0xf]  ;;  %v3039_v38 = vld [vmem:[%s6740_s29 + $0x58] sm:$0xf0]  ;;  %v3038_v42 = vor.u32 %v4265_v33, %v3037_v32 }
  0x2f   :  { %552 = vmatpush.bf16.msrb.mxu3 %v3250_v49  ;;  %482 = vmatmul.bf16.vlgmr.msra.gmra.mxu1 %v4997_v54  ;;  %v4295_v39 = vld [vmem:[%s6740_s29 + $0x14c] sm:$0xf]  ;;  %v3167_v40 = vld [vmem:[%s6740_s29 + $0x158] sm:$0xf0]  ;;  %v3021_v41 = vld [vmem:[%s6740_s29 + $0x28] sm:$0xf]  ;;  %v3166_v45 = vor.u32 %v4297_v36, %v3165_v34  ;;  %v3042_v46 = vor.u32 %v4263_v37, %v3039_v38 }
  0x30   :  { %508 = vmatmul.bf16.vlgmr.msra.gmra.mxu3 %v4997_v54  ;;  %v4261_v43 = vld [vmem:[%s6740_s29 + $0x34] sm:$0xf0]  ;;  %v3149_v44 = vld [vmem:[%s6740_s29 + $0x128] sm:$0xf] }
  0x31   :  { %514 = vmatpush.bf16.msrb.mxu0 %v3102_v57 }
  0x32   :  { %527 = vmatpush.bf16.msrb.mxu1 %v3230_v58  ;;  %540 = vmatpush.bf16.msrb.mxu2 %v3106_v59 }
  0x33   :  { %553 = vmatpush.bf16.msrb.mxu3 %v3234_v63 }
  0x35   :  { %515 = vmatpush.bf16.msrb.mxu0 %v3086_v5 }
  0x36   :  { %528 = vmatpush.bf16.msrb.mxu1 %v3214_v6  ;;  %541 = vmatpush.bf16.msrb.mxu2 %v3090_v7 }
  0x37   :  { %554 = vmatpush.bf16.msrb.mxu3 %v3218_v11 }
  0x39   :  { %516 = vmatpush.bf16.msrb.mxu0 %v3070_v17 }
  0x3a   :  { %529 = vmatpush.bf16.msrb.mxu1 %v3198_v18  ;;  %542 = vmatpush.bf16.msrb.mxu2 %v3074_v19 }
  0x3b   :  { %555 = vmatpush.bf16.msrb.mxu3 %v3202_v23 }
  0x3d   :  { %517 = vmatpush.bf16.msrb.mxu0 %v3054_v29 }
  0x3e   :  { %530 = vmatpush.bf16.msrb.mxu1 %v3182_v30  ;;  %543 = vmatpush.bf16.msrb.mxu2 %v3058_v31 }
  0x3f   :  { %25 = vsyncpa [#allocation5], 0  ;;  %556 = vmatpush.bf16.msrb.mxu3 %v3186_v35  ;;  %v3170_v47 = vor.u32 %v4295_v39, %v3167_v40  ;;  %v4293_v48 = vld [vmem:[%s6740_s29 + $0x134] sm:$0xf0]  ;;  %v4259_v49 = vld [vmem:[%s6740_s29 + $0x2c] sm:$0xf]  ;;  %v3022_v55 = vor.u32 %v4261_v43, %v3021_v41 }
  0x40   :  { %v3023_v51 = vld [vmem:[%s6740_s29 + $0x38] sm:$0xf0]  ;;  %v4291_v52 = vld [vmem:[%s6740_s29 + $0x12c] sm:$0xf]  ;;  %v3005_v56 = vld [vmem:[%s6740_s29 + $0x8] sm:$0xf]  ;;  %v3150_v57 = vor.u32 %v4293_v48, %v3149_v44 }
  0x41   :  { %v3151_v53 = vld [vmem:[%s6740_s29 + $0x138] sm:$0xf0]  ;;  %518 = vmatpush.bf16.msrb.mxu0 %v3038_v42  ;;  %v3026_v58 = vor.u32 %v4259_v49, %v3023_v51  ;;  %v4257_v59 = vld [vmem:[%s6740_s29 + $0x14] sm:$0xf0]  ;;  %v3133_v60 = vld [vmem:[%s6740_s29 + $0x108] sm:$0xf] }
  0x42   :  { %531 = vmatpush.bf16.msrb.mxu1 %v3166_v45  ;;  %544 = vmatpush.bf16.msrb.mxu2 %v3042_v46  ;;  %v4289_v61 = vld [vmem:[%s6740_s29 + $0x114] sm:$0xf0]  ;;  %v3154_v62 = vor.u32 %v4291_v52, %v3151_v53  ;;  %v4255_v63 = vld [vmem:[%s6740_s29 + $0xc] sm:$0xf]  ;;  %v3007_v0 = vld [vmem:[%s6740_s29 + $0x18] sm:$0xf0]  ;;  %v3006_v5 = vor.u32 %v4257_v59, %v3005_v56 }
  0x43   :  { %557 = vmatpush.bf16.msrb.mxu3 %v3170_v47  ;;  %v4287_v1 = vld [vmem:[%s6740_s29 + $0x10c] sm:$0xf]  ;;  %v3135_v2 = vld [vmem:[%s6740_s29 + $0x118] sm:$0xf0]  ;;  %v3365_v3 = vld [vmem:[%s6720_s3 + $0xe0] sm:$0xf]  ;;  %v3134_v8 = vor.u32 %v4289_v61, %v3133_v60  ;;  %v3010_v9 = vor.u32 %v4255_v63, %v3007_v0 }
  0x44   :  { %v4348_v4 = vld [vmem:[%s6720_s3 + $0xec] sm:$0xf0]  ;;  %v3493_v6 = vld [vmem:[%s6720_s3 + $0x1e0] sm:$0xf]  ;;  %v3138_v10 = vor.u32 %v4287_v1, %v3135_v2  ;;  %s6742_s22 = sld [smem:[#allocation10_spill]]  ;;  %vm2547_vm11 = vcmask 261120  }
  0x45   :  { %519 = vmatpush.bf16.msrb.mxu0 %v3022_v55  ;;  %v4380_v7 = vld [vmem:[%s6720_s3 + $0x1ec] sm:$0xf0]  ;;  %v3366_v11 = vor.u32 %v4348_v4, %v3365_v3  ;;  %v3621_v12 = vld [vmem:[%s6720_s3 + $0x2e0] sm:$0xf]  ;;  %s4659_s26 = smov 32   ;;  %s4661_s28 = smov [#allocation2]  }
  0x46   :  { %532 = vmatpush.bf16.msrb.mxu1 %v3150_v57  ;;  %545 = vmatpush.bf16.msrb.mxu2 %v3026_v58  ;;  %v4412_v13 = vld [vmem:[%s6720_s3 + $0x2ec] sm:$0xf0]  ;;  %v3349_v14 = vld [vmem:[%s6720_s3 + $0xc0] sm:$0xf]  ;;  %v3494_v16 = vor.u32 %v4380_v7, %v3493_v6  ;;  %s2966_s30 = sshll.u32 %s4661_s28, 4  ;;  %s4662_s19 = smov [#allocation4]   ;;  %s2967_s30 = int_to_ptr.vmem [resolvable:$true] %s2966_s30 }
  0x47   :  { %558 = vmatpush.bf16.msrb.mxu3 %v3154_v62  ;;  %v4344_v15 = vld [vmem:[%s6720_s3 + $0xcc] sm:$0xf0]  ;;  %v3477_v17 = vld [vmem:[%s6720_s3 + $0x1c0] sm:$0xf]  ;;  %v3622_v19 = vor.u32 %v4412_v13, %v3621_v12  ;;  %v4346_v13 = vld [vmem:[%s6720_s3 + $0xe4] sm:$0xf] }
  0x48   :  { %v4376_v18 = vld [vmem:[%s6720_s3 + $0x1cc] sm:$0xf0]  ;;  %v3350_v20 = vor.u32 %v4344_v15, %v3349_v14  ;;  %v3605_v21 = vld [vmem:[%s6720_s3 + $0x2c0] sm:$0xf]  ;;  %v3367_v15 = vld [vmem:[%s6720_s3 + $0xf0] sm:$0xf0] }
  0x49   :  { %520 = vmatpush.bf16.msrb.mxu0 %v3006_v5  ;;  %v4408_v22 = vld [vmem:[%s6720_s3 + $0x2cc] sm:$0xf0]  ;;  %v3333_v23 = vld [vmem:[%s6720_s3 + $0xa0] sm:$0xf]  ;;  %v3478_v25 = vor.u32 %v4376_v18, %v3477_v17  ;;  %v4378_v18 = vld [vmem:[%s6720_s3 + $0x1e4] sm:$0xf] }
  0x4a   :  { %533 = vmatpush.bf16.msrb.mxu1 %v3134_v8  ;;  %546 = vmatpush.bf16.msrb.mxu2 %v3010_v9  ;;  %v4340_v24 = vld [vmem:[%s6720_s3 + $0xac] sm:$0xf0]  ;;  %v3749_v26 = vld [vmem:[%s6720_s3 + $0x3e0] sm:$0xf]  ;;  %v3606_v30 = vor.u32 %v4408_v22, %v3605_v21  ;;  %v3370_v21 = vor.u32 %v4346_v13, %v3367_v15  ;;  %s2977_s1 = sshll.u32 %s4662_s19, 4  ;;  %s2978_s1 = int_to_ptr.vmem [resolvable:$true] %s2977_s1 }
  0x4b   :  { %559 = vmatpush.bf16.msrb.mxu3 %v3138_v10  ;;  %v3461_v27 = vld [vmem:[%s6720_s3 + $0x1a0] sm:$0xf]  ;;  %v4372_v28 = vld [vmem:[%s6720_s3 + $0x1ac] sm:$0xf0]  ;;  %v3334_v32 = vor.u32 %v4340_v24, %v3333_v23  ;;  %v4342_v23 = vld [vmem:[%s6720_s3 + $0xc4] sm:$0xf] }
  0x4c   :  { %521 = vmatmul.bf16.vlgmr.msrb.gmra.mxu0 %v4986_v50  ;;  %v4444_v29 = vld [vmem:[%s6720_s3 + $0x3ec] sm:$0xf0]  ;;  %v3589_v33 = vld [vmem:[%s6720_s3 + $0x2a0] sm:$0xf]  ;;  %v3462_v35 = vor.u32 %v4372_v28, %v3461_v27  ;;  %v3351_v24 = vld [vmem:[%s6720_s3 + $0xd0] sm:$0xf0] }
  0x4d   :  { %1359 = vmatpush.bf16.msra.mxu0 %v3366_v11  ;;  %534 = vmatmul.bf16.vlgmr.msrb.gmra.mxu1 %v4997_v54  ;;  %v3750_v31 = vor.u32 %v4444_v29, %v3749_v26  ;;  %v4404_v34 = vld [vmem:[%s6720_s3 + $0x2ac] sm:$0xf0]  ;;  %v3733_v36 = vld [vmem:[%s6720_s3 + $0x3c0] sm:$0xf]  ;;  %v4374_v26 = vld [vmem:[%s6720_s3 + $0x1c4] sm:$0xf]  ;;  %v3354_v28 = vor.u32 %v4342_v23, %v3351_v24 }
  0x4e   :  { %1372 = vmatpush.bf16.msra.mxu1 %v3494_v16  ;;  %547 = vmatmul.bf16.vlgmr.msrb.gmra.mxu2 %v4986_v50  ;;  %v3317_v50 = vld [vmem:[%s6720_s3 + $0x80] sm:$0xf]  ;;  %v4440_v37 = vld [vmem:[%s6720_s3 + $0x3cc] sm:$0xf0]  ;;  %v3590_v41 = vor.u32 %v4404_v34, %v3589_v33  ;;  %v3479_v27 = vld [vmem:[%s6720_s3 + $0x1d0] sm:$0xf0] }
  0x4f   :  { %560 = vmatmul.bf16.vlgmr.msrb.gmra.mxu3 %v4997_v54  ;;  %1385 = vmatpush.bf16.msra.mxu2 %v3622_v19  ;;  %v4336_v54 = vld [vmem:[%s6720_s3 + $0x8c] sm:$0xf0]  ;;  %v3445_v38 = vld [vmem:[%s6720_s3 + $0x180] sm:$0xf]  ;;  %v3734_v40 = vor.u32 %v4440_v37, %v3733_v36  ;;  %v3495_v19 = vld [vmem:[%s6720_s3 + $0x1f0] sm:$0xf0] }
  0x50   :  { %1398 = vmatpush.bf16.msra.mxu3 %v3750_v31  ;;  %v4368_v39 = vld [vmem:[%s6720_s3 + $0x18c] sm:$0xf0]  ;;  %v3318_v42 = vor.u32 %v4336_v54, %v3317_v50  ;;  %v3301_v43 = vld [vmem:[%s6720_s3 + $0x60] sm:$0xf]  ;;  %v4338_v29 = vld [vmem:[%s6720_s3 + $0xa4] sm:$0xf]  ;;  %v3482_v31 = vor.u32 %v4374_v26, %v3479_v27 }
  0x51   :  { %1360 = vmatpush.bf16.msra.mxu0 %v3350_v20  ;;  %v3573_v44 = vld [vmem:[%s6720_s3 + $0x280] sm:$0xf]  ;;  %v4400_v45 = vld [vmem:[%s6720_s3 + $0x28c] sm:$0xf0]  ;;  %v3446_v47 = vor.u32 %v4368_v39, %v3445_v38  ;;  %v3463_v50 = vld [vmem:[%s6720_s3 + $0x1b0] sm:$0xf0] }
  0x52   :  { %1373 = vmatpush.bf16.msra.mxu1 %v3478_v25  ;;  %v4332_v46 = vld [vmem:[%s6720_s3 + $0x6c] sm:$0xf0]  ;;  %v3717_v48 = vld [vmem:[%s6720_s3 + $0x3a0] sm:$0xf]  ;;  %v3574_v55 = vor.u32 %v4400_v45, %v3573_v44  ;;  %v3498_v25 = vor.u32 %v4378_v18, %v3495_v19  ;;  %v4334_v34 = vld [vmem:[%s6720_s3 + $0x84] sm:$0xf] }
  0x53   :  { %1386 = vmatpush.bf16.msra.mxu2 %v3606_v30  ;;  %v4436_v49 = vld [vmem:[%s6720_s3 + $0x3ac] sm:$0xf0]  ;;  %v3429_v51 = vld [vmem:[%s6720_s3 + $0x160] sm:$0xf]  ;;  %v3302_v56 = vor.u32 %v4332_v46, %v3301_v43  ;;  %v3335_v30 = vld [vmem:[%s6720_s3 + $0xb0] sm:$0xf0] }
  0x54   :  { %1399 = vmatpush.bf16.msra.mxu3 %v3734_v40  ;;  %v4364_v52 = vld [vmem:[%s6720_s3 + $0x16c] sm:$0xf0]  ;;  %v3718_v53 = vor.u32 %v4436_v49, %v3717_v48  ;;  %v3285_v57 = vld [vmem:[%s6720_s3 + $0x40] sm:$0xf]  ;;  %v3338_v33 = vor.u32 %v4338_v29, %v3335_v30  ;;  %v3319_v54 = vld [vmem:[%s6720_s3 + $0x90] sm:$0xf0] }
  0x55   :  { %1361 = vmatpush.bf16.msra.mxu0 %v3334_v32  ;;  %v3557_v58 = vld [vmem:[%s6720_s3 + $0x260] sm:$0xf]  ;;  %v4396_v59 = vld [vmem:[%s6720_s3 + $0x26c] sm:$0xf0]  ;;  %v3430_v61 = vor.u32 %v4364_v52, %v3429_v51  ;;  %v4370_v32 = vld [vmem:[%s6720_s3 + $0x1a4] sm:$0xf]  ;;  %v3322_v38 = vor.u32 %v4334_v34, %v3319_v54 }
  0x56   :  { %1374 = vmatpush.bf16.msra.mxu1 %v3462_v35  ;;  %v4328_v60 = vld [vmem:[%s6720_s3 + $0x4c] sm:$0xf0]  ;;  %v3701_v62 = vld [vmem:[%s6720_s3 + $0x380] sm:$0xf]  ;;  %v3558_v3 = vor.u32 %v4396_v59, %v3557_v58  ;;  %v3466_v35 = vor.u32 %v4370_v32, %v3463_v50  ;;  %v4366_v36 = vld [vmem:[%s6720_s3 + $0x184] sm:$0xf] }
  0x57   :  { %1387 = vmatpush.bf16.msra.mxu2 %v3590_v41  ;;  %v4432_v63 = vld [vmem:[%s6720_s3 + $0x38c] sm:$0xf0]  ;;  %v3413_v0 = vld [vmem:[%s6720_s3 + $0x140] sm:$0xf]  ;;  %v3286_v4 = vor.u32 %v4328_v60, %v3285_v57  ;;  %v3447_v37 = vld [vmem:[%s6720_s3 + $0x190] sm:$0xf0] }
  0x58   :  { %1400 = vmatpush.bf16.msra.mxu3 %v3718_v53  ;;  %v4360_v1 = vld [vmem:[%s6720_s3 + $0x14c] sm:$0xf0]  ;;  %v3702_v2 = vor.u32 %v4432_v63, %v3701_v62  ;;  %v3269_v5 = vld [vmem:[%s6720_s3 + $0x20] sm:$0xf]  ;;  %v4330_v39 = vld [vmem:[%s6720_s3 + $0x64] sm:$0xf]  ;;  %v3450_v41 = vor.u32 %v4366_v36, %v3447_v37 }
  0x59   :  { %1362 = vmatpush.bf16.msra.mxu0 %v3318_v42  ;;  %v4324_v6 = vld [vmem:[%s6720_s3 + $0x2c] sm:$0xf0]  ;;  %v3414_v7 = vor.u32 %v4360_v1, %v3413_v0  ;;  %v3397_v8 = vld [vmem:[%s6720_s3 + $0x120] sm:$0xf]  ;;  %v3303_v40 = vld [vmem:[%s6720_s3 + $0x70] sm:$0xf0] }
  0x5a   :  { %1375 = vmatpush.bf16.msra.mxu1 %v3446_v47  ;;  %v4356_v9 = vld [vmem:[%s6720_s3 + $0x12c] sm:$0xf0]  ;;  %v3270_v10 = vor.u32 %v4324_v6, %v3269_v5  ;;  %v3253_v11 = vld [vmem:[%s6720_s3] sm:$0xf]  ;;  %v3306_v42 = vor.u32 %v4330_v39, %v3303_v40  ;;  %v4326_v45 = vld [vmem:[%s6720_s3 + $0x44] sm:$0xf] }
  0x5b   :  { %1388 = vmatpush.bf16.msra.mxu2 %v3574_v55  ;;  %v4320_v12 = vld [vmem:[%s6720_s3 + $0xc] sm:$0xf0]  ;;  %v3398_v14 = vor.u32 %v4356_v9, %v3397_v8  ;;  %v3381_v16 = vld [vmem:[%s6720_s3 + $0x100] sm:$0xf]  ;;  %v3287_v47 = vld [vmem:[%s6720_s3 + $0x50] sm:$0xf0] }
  0x5c   :  { %1401 = vmatpush.bf16.msra.mxu3 %v3702_v2  ;;  %v4352_v17 = vld [vmem:[%s6720_s3 + $0x10c] sm:$0xf0]  ;;  %v3254_v20 = vor.u32 %v4320_v12, %v3253_v11  ;;  %v3541_v43 = vld [vmem:[%s6720_s3 + $0x240] sm:$0xf]  ;;  %v3290_v48 = vor.u32 %v4326_v45, %v3287_v47  ;;  %v4362_v52 = vld [vmem:[%s6720_s3 + $0x164] sm:$0xf] }
  0x5d   :  { %1363 = vmatpush.bf16.msra.mxu0 %v3302_v56  ;;  %v3382_v22 = vor.u32 %v4352_v17, %v3381_v16  ;;  %v4392_v44 = vld [vmem:[%s6720_s3 + $0x24c] sm:$0xf0]  ;;  %v3685_v49 = vld [vmem:[%s6720_s3 + $0x360] sm:$0xf]  ;;  %v3431_v55 = vld [vmem:[%s6720_s3 + $0x170] sm:$0xf0] }
  0x5e   :  { %1376 = vmatpush.bf16.msra.mxu1 %v3430_v61  ;;  %v3542_v46 = vor.u32 %v4392_v44, %v3541_v43  ;;  %v4428_v51 = vld [vmem:[%s6720_s3 + $0x36c] sm:$0xf0]  ;;  %v3434_v56 = vor.u32 %v4362_v52, %v3431_v55  ;;  %v3525_v57 = vld [vmem:[%s6720_s3 + $0x220] sm:$0xf]  ;;  %v4322_v59 = vld [vmem:[%s6720_s3 + $0x24] sm:$0xf] }
  0x5f   :  { %1389 = vmatpush.bf16.msra.mxu2 %v3558_v3  ;;  %v3686_v53 = vor.u32 %v4428_v51, %v3685_v49  ;;  %v4388_v58 = vld [vmem:[%s6720_s3 + $0x22c] sm:$0xf0]  ;;  %v3271_v61 = vld [vmem:[%s6720_s3 + $0x30] sm:$0xf0]  ;;  %v3669_v63 = vld [vmem:[%s6720_s3 + $0x340] sm:$0xf] }
  0x60   :  { %v3526_v60 = vor.u32 %v4388_v58, %v3525_v57  ;;  %v3274_v62 = vor.u32 %v4322_v59, %v3271_v61  ;;  %v4424_v0 = vld [vmem:[%s6720_s3 + $0x34c] sm:$0xf0]  ;;  %v4358_v1 = vld [vmem:[%s6720_s3 + $0x144] sm:$0xf]  ;;  %v3415_v3 = vld [vmem:[%s6720_s3 + $0x150] sm:$0xf0] }
  0x61   :  { %1364 = vmatpush.bf16.msra.mxu0 %v3286_v4  ;;  %1402 = vmatpush.bf16.msra.mxu3 %v3686_v53  ;;  %v3670_v2 = vor.u32 %v4424_v0, %v3669_v63  ;;  %v3418_v4 = vor.u32 %v4358_v1, %v3415_v3  ;;  %v3509_v5 = vld [vmem:[%s6720_s3 + $0x200] sm:$0xf]  ;;  %v4384_v6 = vld [vmem:[%s6720_s3 + $0x20c] sm:$0xf0]  ;;  %v3255_v9 = vld [vmem:[%s6720_s3 + $0x10] sm:$0xf0] }
  0x62   :  { %1377 = vmatpush.bf16.msra.mxu1 %v3414_v7  ;;  %v4318_v7 = vld [vmem:[%s6720_s3 + $0x4] sm:$0xf]  ;;  %v3510_v8 = vor.u32 %v4384_v6, %v3509_v5  ;;  %v3623_v11 = vld [vmem:[%s6720_s3 + $0x2f0] sm:$0xf0]  ;;  %v4420_v15 = vld [vmem:[%s6720_s3 + $0x32c] sm:$0xf0] }
  0x63   :  { %1390 = vmatpush.bf16.msra.mxu2 %v3542_v46  ;;  %v3258_v12 = vor.u32 %v4318_v7, %v3255_v9  ;;  %v4354_v16 = vld [vmem:[%s6720_s3 + $0x124] sm:$0xf]  ;;  %v3399_v17 = vld [vmem:[%s6720_s3 + $0x130] sm:$0xf0]  ;;  %v3637_v23 = vld [vmem:[%s6720_s3 + $0x300] sm:$0xf] }
  0x64   :  { %v3402_v19 = vor.u32 %v4354_v16, %v3399_v17  ;;  %v4416_v24 = vld [vmem:[%s6720_s3 + $0x30c] sm:$0xf0]  ;;  %v4350_v26 = vld [vmem:[%s6720_s3 + $0x104] sm:$0xf]  ;;  %v3383_v27 = vld [vmem:[%s6720_s3 + $0x110] sm:$0xf0] }
  0x65   :  { %1365 = vmatpush.bf16.msra.mxu0 %v3270_v10  ;;  %1403 = vmatpush.bf16.msra.mxu3 %v3670_v2  ;;  %v4410_v10 = vld [vmem:[%s6720_s3 + $0x2e4] sm:$0xf]  ;;  %v3386_v29 = vor.u32 %v4350_v26, %v3383_v27  ;;  %v3751_v30 = vld [vmem:[%s6720_s3 + $0x3f0] sm:$0xf0]  ;;  %v5496_v44 = vld [vmem:[%s6742_s22] sm:$0xf] }
  0x66   :  { %1378 = vmatpush.bf16.msra.mxu1 %v3398_v14  ;;  %v3626_v13 = vor.u32 %v4410_v10, %v3623_v11  ;;  %v3653_v14 = vld [vmem:[%s6720_s3 + $0x320] sm:$0xf]  ;;  %v4402_v32 = vld [vmem:[%s6720_s3 + $0x2a4] sm:$0xf]  ;;  %v3591_v50 = vld [vmem:[%s6720_s3 + $0x2b0] sm:$0xf0] }
  0x67   :  { %1391 = vmatpush.bf16.msra.mxu2 %v3526_v60  ;;  %v3654_v18 = vor.u32 %v4420_v15, %v3653_v14  ;;  %v4438_v34 = vld [vmem:[%s6720_s3 + $0x3c4] sm:$0xf]  ;;  %v3735_v54 = vld [vmem:[%s6720_s3 + $0x3d0] sm:$0xf0]  ;;  %v126_v49 = vperm.slane %v5496_v44, 0  ;;  %v127_v3 = vperm.slane %v5496_v44, 1 }
  0x68   :  { %v4398_v36 = vld [vmem:[%s6720_s3 + $0x284] sm:$0xf]  ;;  %v3575_v37 = vld [vmem:[%s6720_s3 + $0x290] sm:$0xf0]  ;;  %v4349_v5 = vld [vmem:[%s6720_s3 + $0xf4] sm:$0xf0] }
  0x69   :  { %1366 = vmatpush.bf16.msra.mxu0 %v3254_v20  ;;  %v4406_v20 = vld [vmem:[%s6720_s3 + $0x2c4] sm:$0xf]  ;;  %1404 = vmatpush.bf16.msra.mxu3 %v3654_v18  ;;  %v3719_v40 = vld [vmem:[%s6720_s3 + $0x3b0] sm:$0xf0]  ;;  %v4345_v18 = vld [vmem:[%s6720_s3 + $0xd4] sm:$0xf0] }
  0x6a   :  { %1379 = vmatpush.bf16.msra.mxu1 %v3382_v22  ;;  %v4434_v39 = vld [vmem:[%s6720_s3 + $0x3a4] sm:$0xf]  ;;  %v3559_v43 = vld [vmem:[%s6720_s3 + $0x270] sm:$0xf0]  ;;  %v4381_v26 = vld [vmem:[%s6720_s3 + $0x1f4] sm:$0xf0] }
  0x6b   :  { %1392 = vmatpush.bf16.msra.mxu2 %v3510_v8  ;;  %v4430_v46 = vld [vmem:[%s6720_s3 + $0x384] sm:$0xf]  ;;  %v3703_v47 = vld [vmem:[%s6720_s3 + $0x390] sm:$0xf0] }
  0x6c   :  { %v4390_v51 = vld [vmem:[%s6720_s3 + $0x244] sm:$0xf]  ;;  %v3543_v52 = vld [vmem:[%s6720_s3 + $0x250] sm:$0xf0] }
  0x6d   :  { %1411 = vmatpush.bf16.msrb.mxu0 %v3370_v21  ;;  %v3607_v21 = vld [vmem:[%s6720_s3 + $0x2d0] sm:$0xf0]  ;;  %v3546_v53 = vor.u32 %v4390_v51, %v3543_v52  ;;  %v4426_v55 = vld [vmem:[%s6720_s3 + $0x364] sm:$0xf]  ;;  %v3453_v52 = vld [vmem:[%s6720_s3 + $0x188] sm:$0xf] }
  0x6e   :  { %1424 = vmatpush.bf16.msrb.mxu1 %v3498_v25  ;;  %v3610_v22 = vor.u32 %v4406_v20, %v3607_v21  ;;  %v3638_v25 = vor.u32 %v4416_v24, %v3637_v23  ;;  %v4386_v61 = vld [vmem:[%s6720_s3 + $0x224] sm:$0xf]  ;;  %v3671_v2 = vld [vmem:[%s6720_s3 + $0x350] sm:$0xf0] }
  0x6f   :  { %1437 = vmatpush.bf16.msrb.mxu2 %v3626_v13  ;;  %v4422_v1 = vld [vmem:[%s6720_s3 + $0x344] sm:$0xf]  ;;  %v3511_v9 = vld [vmem:[%s6720_s3 + $0x210] sm:$0xf0]  ;;  %v3357_v13 = vld [vmem:[%s6720_s3 + $0xc8] sm:$0xf] }
  0x70   :  { %1405 = vmatpush.bf16.msra.mxu3 %v3638_v25  ;;  %v3674_v6 = vor.u32 %v4422_v1, %v3671_v2  ;;  %v4382_v8 = vld [vmem:[%s6720_s3 + $0x204] sm:$0xf]  ;;  %v3655_v21 = vld [vmem:[%s6720_s3 + $0x330] sm:$0xf0]  ;;  %v3501_v25 = vld [vmem:[%s6720_s3 + $0x1e8] sm:$0xf]  ;;  %v3358_v27 = vor.u32 %v4345_v18, %v3357_v13 }
  0x71   :  { %1412 = vmatpush.bf16.msrb.mxu0 %v3354_v28  ;;  %v4442_v28 = vld [vmem:[%s6720_s3 + $0x3e4] sm:$0xf]  ;;  %v3514_v14 = vor.u32 %v4382_v8, %v3511_v9  ;;  %v3261_v9 = vld [vmem:[%s6720_s3 + $0x8] sm:$0xf]  ;;  %v3375_v13 = vld [vmem:[%s6720_s3 + $0xf8] sm:$0xf0] }
  0x72   :  { %1425 = vmatpush.bf16.msrb.mxu1 %v3482_v31  ;;  %v3754_v31 = vor.u32 %v4442_v28, %v3751_v30  ;;  %v4418_v20 = vld [vmem:[%s6720_s3 + $0x324] sm:$0xf]  ;;  %v3341_v28 = vld [vmem:[%s6720_s3 + $0xa8] sm:$0xf]  ;;  %v3639_v30 = vld [vmem:[%s6720_s3 + $0x310] sm:$0xf0] }
  0x73   :  { %1438 = vmatpush.bf16.msrb.mxu2 %v3610_v22  ;;  %v3658_v23 = vor.u32 %v4418_v20, %v3655_v21  ;;  %v3405_v18 = vld [vmem:[%s6720_s3 + $0x128] sm:$0xf] }
  0x74   :  { %1450 = vmatpush.bf16.msrb.mxu3 %v3754_v31 }
  0x75   :  { %1413 = vmatpush.bf16.msrb.mxu0 %v3338_v33  ;;  %v3594_v33 = vor.u32 %v4402_v32, %v3591_v50  ;;  %v4341_v32 = vld [vmem:[%s6720_s3 + $0xb4] sm:$0xf0] }
  0x76   :  { %1426 = vmatpush.bf16.msrb.mxu1 %v3466_v35  ;;  %v3738_v35 = vor.u32 %v4438_v34, %v3735_v54  ;;  %v3502_v34 = vor.u32 %v4381_v26, %v3501_v25 }
  0x77   :  { %1439 = vmatpush.bf16.msrb.mxu2 %v3594_v33 }
  0x78   :  { %1451 = vmatpush.bf16.msrb.mxu3 %v3738_v35  ;;  %v3342_v35 = vor.u32 %v4341_v32, %v3341_v28 }
  0x79   :  { %1414 = vmatpush.bf16.msrb.mxu0 %v3322_v38  ;;  %v3578_v38 = vor.u32 %v4398_v36, %v3575_v37  ;;  %v3485_v37 = vld [vmem:[%s6720_s3 + $0x1c8] sm:$0xf] }
  0x7a   :  { %1427 = vmatpush.bf16.msrb.mxu1 %v3450_v41  ;;  %v3722_v41 = vor.u32 %v4434_v39, %v3719_v40  ;;  %v3325_v40 = vld [vmem:[%s6720_s3 + $0x88] sm:$0xf] }
  0x7b   :  { %1440 = vmatpush.bf16.msrb.mxu2 %v3578_v38  ;;  %v4377_v38 = vld [vmem:[%s6720_s3 + $0x1d4] sm:$0xf0] }
  0x7c   :  { %1452 = vmatpush.bf16.msrb.mxu3 %v3722_v41  ;;  %v4337_v41 = vld [vmem:[%s6720_s3 + $0x94] sm:$0xf0] }
  0x7d   :  { %1415 = vmatpush.bf16.msrb.mxu0 %v3306_v42  ;;  %v4394_v42 = vld [vmem:[%s6720_s3 + $0x264] sm:$0xf] }
  0x7e   :  { %1428 = vmatpush.bf16.msrb.mxu1 %v3434_v56  ;;  %v3562_v45 = vor.u32 %v4394_v42, %v3559_v43  ;;  %v3687_v56 = vld [vmem:[%s6720_s3 + $0x370] sm:$0xf0]  ;;  %v3486_v42 = vor.u32 %v4377_v38, %v3485_v37  ;;  %v3326_v43 = vor.u32 %v4337_v41, %v3325_v40  ;;  %v4445_v37 = vld [vmem:[%s6720_s3 + $0x3f4] sm:$0xf0]  ;;  %v4379_v38 = vld [vmem:[%s6720_s3 + $0x1ec] sm:$0xf] }
  0x7f   :  { %v3690_v58 = vor.u32 %v4426_v55, %v3687_v56  ;;  %v3293_v55 = vld [vmem:[%s6720_s3 + $0x48] sm:$0xf]  ;;  %v4329_v56 = vld [vmem:[%s6720_s3 + $0x54] sm:$0xf0] }
  0x80   :  { %1441 = vmatpush.bf16.msrb.mxu2 %v3562_v45  ;;  %v3469_v45 = vld [vmem:[%s6720_s3 + $0x1a8] sm:$0xf] }
  0x81   :  { %1416 = vmatpush.bf16.msrb.mxu0 %v3290_v48  ;;  %v3706_v48 = vor.u32 %v4430_v46, %v3703_v47  ;;  %v4373_v46 = vld [vmem:[%s6720_s3 + $0x1b4] sm:$0xf0]  ;;  %v3309_v47 = vld [vmem:[%s6720_s3 + $0x68] sm:$0xf] }
  0x82   :  { %1429 = vmatpush.bf16.msrb.mxu1 %v3418_v4  ;;  %v3373_v4 = vld [vmem:[%s6720_s3 + $0xe8] sm:$0xf] }
  0x83   :  { %1453 = vmatpush.bf16.msrb.mxu3 %v3706_v48  ;;  %v4333_v48 = vld [vmem:[%s6720_s3 + $0x74] sm:$0xf0] }
  0x84   :  { %1442 = vmatpush.bf16.msrb.mxu2 %v3546_v53  ;;  %v3310_v51 = vor.u32 %v4333_v48, %v3309_v47  ;;  %v4369_v53 = vld [vmem:[%s6720_s3 + $0x194] sm:$0xf0]  ;;  %v3343_v47 = vld [vmem:[%s6720_s3 + $0xb8] sm:$0xf0] }
  0x85   :  { %1417 = vmatpush.bf16.msrb.mxu0 %v3274_v62  ;;  %v3527_v62 = vld [vmem:[%s6720_s3 + $0x230] sm:$0xf0] }
  0x86   :  { %1430 = vmatpush.bf16.msrb.mxu1 %v3402_v19  ;;  %v3530_v63 = vor.u32 %v4386_v61, %v3527_v62  ;;  %v4365_v61 = vld [vmem:[%s6720_s3 + $0x174] sm:$0xf0]  ;;  %v3277_v62 = vld [vmem:[%s6720_s3 + $0x28] sm:$0xf] }
  0x87   :  { %1454 = vmatpush.bf16.msrb.mxu3 %v3690_v58  ;;  %v128_v58 = vperm.slane %v5496_v44, 2 }
  0x88   :  { %1443 = vmatpush.bf16.msrb.mxu2 %v3530_v63  ;;  %v4325_v63 = vld [vmem:[%s6720_s3 + $0x34] sm:$0xf0] }
  0x89   :  { %1418 = vmatpush.bf16.msrb.mxu0 %v3258_v12  ;;  %v3374_v12 = vor.u32 %v4349_v5, %v3373_v4  ;;  %v3278_v4 = vor.u32 %v4325_v63, %v3277_v62  ;;  %v129_v5 = vperm.slane %v5496_v44, 3  ;;  %v3629_v44 = vld [vmem:[%s6720_s3 + $0x2e8] sm:$0xf] }
  0x8a   :  { %1431 = vmatpush.bf16.msrb.mxu1 %v3386_v29  ;;  %v4414_v29 = vld [vmem:[%s6720_s3 + $0x304] sm:$0xf]  ;;  %v3581_v62 = vld [vmem:[%s6720_s3 + $0x288] sm:$0xf] }
  0x8b   :  { %1455 = vmatpush.bf16.msrb.mxu3 %v3674_v6  ;;  %v3642_v50 = vor.u32 %v4414_v29, %v3639_v30  ;;  %v3421_v6 = vld [vmem:[%s6720_s3 + $0x148] sm:$0xf]  ;;  %v4409_v29 = vld [vmem:[%s6720_s3 + $0x2d4] sm:$0xf0]  ;;  %v4343_v30 = vld [vmem:[%s6720_s3 + $0xcc] sm:$0xf] }
  0x8c   :  { %1444 = vmatpush.bf16.msrb.mxu2 %v3514_v14 }
  0x8f   :  { %1456 = vmatpush.bf16.msrb.mxu3 %v3658_v23 }
  0x93   :  { %1457 = vmatpush.bf16.msrb.mxu3 %v3642_v50 }
  0xa9   :  { %v470_v57 = vpop.f32.mrf.mxu0 }
  0xaa   :  { %v471_v59 = vadd.f32 %v470_v57, %v126_v49  ;;  %v3470_v49 = vor.u32 %v4373_v46, %v3469_v45  ;;  %v3454_v57 = vor.u32 %v4369_v53, %v3453_v52  ;;  %v4339_v45 = vld [vmem:[%s6720_s3 + $0xac] sm:$0xf]  ;;  %v3741_v53 = vld [vmem:[%s6720_s3 + $0x3c8] sm:$0xf] }
  0xac   :  { %v483_v60 = vpop.f32.mrf.mxu1 }
  0xad   :  { %v484_v0 = vadd.f32 %v483_v60, %v471_v59  ;;  %v3294_v59 = vor.u32 %v4329_v56, %v3293_v55  ;;  %v3437_v60 = vld [vmem:[%s6720_s3 + $0x168] sm:$0xf]  ;;  %v4441_v55 = vld [vmem:[%s6720_s3 + $0x3d4] sm:$0xf0] }
  0xaf   :  { %vm565_vm0 = vcmp.gt.f32.partialorder %v484_v0, 0.0  ;;  %v569_v7 = vmul.f32 0.01, %v484_v0 }
  0xb0   :  { %v496_v11 = vpop.f32.mrf.mxu2 }
  0xb1   :  { %v573_v10 = vsel %vm565_vm0, %v484_v0, %v569_v7  ;;  %v497_v16 = vadd.f32 %v496_v11, %v127_v3  ;;  %v472_v19 = vpop.f32.mrf.mxu0  ;;  %v3438_v3 = vor.u32 %v4365_v61, %v3437_v60  ;;  %v4361_v7 = vld [vmem:[%s6720_s3 + $0x154] sm:$0xf0]  ;;  %v4375_v60 = vld [vmem:[%s6720_s3 + $0x1cc] sm:$0xf]  ;;  %v3487_v61 = vld [vmem:[%s6720_s3 + $0x1d8] sm:$0xf0] }
  0xb2   :  { %v5545_v15 = vpack.c.bf16 %v573_v10, %v573_v10  ;;  %v4321_v10 = vld [vmem:[%s6720_s3 + $0x14] sm:$0xf0] }
  0xb3   :  { %v509_v17 = vpop.f32.mrf.mxu3  ;;  %v4413_v11 = vld [vmem:[%s6720_s3 + $0x2f4] sm:$0xf0] }
  0xb4   :  { %v485_v22 = vpop.f32.mrf.mxu1  ;;  %v510_v24 = vadd.f32 %v509_v17, %v497_v16  ;;  %1367 = vmatmul.bf16.vlgmr.msra.gmra.mxu0 %v5545_v15  ;;  %v3422_v16 = vor.u32 %v4361_v7, %v3421_v6  ;;  %v3262_v17 = vor.u32 %v4321_v10, %v3261_v9  ;;  %v4357_v19 = vld [vmem:[%s6720_s3 + $0x134] sm:$0xf0]  ;;  %v4371_v9 = vld [vmem:[%s6720_s3 + $0x1ac] sm:$0xf]  ;;  %v3471_v10 = vld [vmem:[%s6720_s3 + $0x1b8] sm:$0xf0] }
  0xb5   :  { %1463 = vmatpush.bf16.msra.mxu0 %v3374_v12  ;;  %v4347_v12 = vld [vmem:[%s6720_s3 + $0xec] sm:$0xf]  ;;  %v3630_v22 = vor.u32 %v4413_v11, %v3629_v44  ;;  %v3406_v50 = vor.u32 %v4357_v19, %v3405_v18  ;;  %v3311_v11 = vld [vmem:[%s6720_s3 + $0x78] sm:$0xf0]  ;;  %v4433_v19 = vld [vmem:[%s6720_s3 + $0x394] sm:$0xf0] }
  0xb6   :  { %vm566_vm1 = vcmp.gt.f32.partialorder %v510_v24, 0.0  ;;  %v570_v31 = vmul.f32 0.01, %v510_v24  ;;  %v3378_v23 = vor.u32 %v4347_v12, %v3375_v13  ;;  %v4331_v44 = vld [vmem:[%s6720_s3 + $0x6c] sm:$0xf] }
  0xb7   :  { %v3565_v12 = vld [vmem:[%s6720_s3 + $0x268] sm:$0xf]  ;;  %v4397_v13 = vld [vmem:[%s6720_s3 + $0x274] sm:$0xf0]  ;;  %v3314_v18 = vor.u32 %v4331_v44, %v3311_v11  ;;  %v3759_v44 = vld [vmem:[%s6720_s3 + $0x3f8] sm:$0xf0] }
  0xb8   :  { %v574_v33 = vsel %vm566_vm1, %v510_v24, %v570_v31  ;;  %v498_v36 = vpop.f32.mrf.mxu2  ;;  %v3613_v24 = vld [vmem:[%s6720_s3 + $0x2c8] sm:$0xf]  ;;  %v3359_v31 = vld [vmem:[%s6720_s3 + $0xd8] sm:$0xf0] }
  0xb9   :  { %v5575_v54 = vpack.c.bf16 %v574_v33, %v574_v33  ;;  %1464 = vmatpush.bf16.msra.mxu0 %v3358_v27  ;;  %v3389_v33 = vld [vmem:[%s6720_s3 + $0x108] sm:$0xf]  ;;  %v3614_v40 = vor.u32 %v4409_v29, %v3613_v24  ;;  %v3362_v41 = vor.u32 %v4343_v30, %v3359_v31  ;;  %v3295_v24 = vld [vmem:[%s6720_s3 + $0x58] sm:$0xf0] }
  0xba   :  { %v3693_v30 = vld [vmem:[%s6720_s3 + $0x368] sm:$0xf] }
  0xbb   :  { %v511_v39 = vpop.f32.mrf.mxu3  ;;  %1380 = vmatmul.bf16.vlgmr.msra.gmra.mxu1 %v5575_v54 }
  0xbc   :  { %1476 = vmatpush.bf16.msra.mxu1 %v3502_v34  ;;  %v4353_v34 = vld [vmem:[%s6720_s3 + $0x114] sm:$0xf0]  ;;  %v3503_v39 = vld [vmem:[%s6720_s3 + $0x1f8] sm:$0xf0] }
  0xbd   :  { %1465 = vmatpush.bf16.msra.mxu0 %v3342_v35  ;;  %v3757_v35 = vld [vmem:[%s6720_s3 + $0x3e8] sm:$0xf]  ;;  %v3390_v48 = vor.u32 %v4353_v34, %v3389_v33  ;;  %v3506_v52 = vor.u32 %v4379_v38, %v3503_v39  ;;  %v3439_v33 = vld [vmem:[%s6720_s3 + $0x178] sm:$0xf0]  ;;  %v4389_v38 = vld [vmem:[%s6720_s3 + $0x234] sm:$0xf0] }
  0xc0   :  { %1477 = vmatpush.bf16.msra.mxu1 %v3486_v42  ;;  %v3597_v42 = vld [vmem:[%s6720_s3 + $0x2a8] sm:$0xf] }
  0xc1   :  { %1466 = vmatpush.bf16.msra.mxu0 %v3326_v43  ;;  %v4405_v43 = vld [vmem:[%s6720_s3 + $0x2b4] sm:$0xf0] }
  0xc4   :  { %1478 = vmatpush.bf16.msra.mxu1 %v3470_v49  ;;  %1419 = vmatmul.bf16.vlgmr.msrb.gmra.mxu0 %v5545_v15 }
  0xc5   :  { %1467 = vmatpush.bf16.msra.mxu0 %v3310_v51  ;;  %v3758_v51 = vor.u32 %v4445_v37, %v3757_v35  ;;  %v4323_v35 = vld [vmem:[%s6720_s3 + $0x2c] sm:$0xf]  ;;  %v3533_v37 = vld [vmem:[%s6720_s3 + $0x228] sm:$0xf] }
  0xc8   :  { %1479 = vmatpush.bf16.msra.mxu1 %v3454_v57 }
  0xc9   :  { %v522_v0 = vpop.f32.mrf.mxu0  ;;  %1468 = vmatpush.bf16.msra.mxu0 %v3294_v59  ;;  %v3346_v59 = vor.u32 %v4339_v45, %v3343_v47  ;;  %v4359_v45 = vld [vmem:[%s6720_s3 + $0x14c] sm:$0xf]  ;;  %v3534_v47 = vor.u32 %v4389_v38, %v3533_v37  ;;  %v3551_v38 = vld [vmem:[%s6720_s3 + $0x258] sm:$0xf0] }
  0xca   :  { %v523_v1 = vadd.f32 %v522_v0, %v128_v58  ;;  %v535_v2 = vpop.f32.mrf.mxu1  ;;  %v3598_v58 = vor.u32 %v4405_v43, %v3597_v42  ;;  %v4401_v0 = vld [vmem:[%s6720_s3 + $0x294] sm:$0xf0]  ;;  %v4391_v37 = vld [vmem:[%s6720_s3 + $0x24c] sm:$0xf] }
  0xcb   :  { %1432 = vmatmul.bf16.vlgmr.msrb.gmra.mxu1 %v5575_v54  ;;  %v3582_v6 = vor.u32 %v4401_v0, %v3581_v62  ;;  %v4425_v43 = vld [vmem:[%s6720_s3 + $0x354] sm:$0xf0]  ;;  %v4355_v62 = vld [vmem:[%s6720_s3 + $0x12c] sm:$0xf] }
  0xcc   :  { %v536_v8 = vadd.f32 %v535_v2, %v523_v1  ;;  %1480 = vmatpush.bf16.msra.mxu1 %v3438_v3  ;;  %v4335_v1 = vld [vmem:[%s6720_s3 + $0x8c] sm:$0xf]  ;;  %v3327_v2 = vld [vmem:[%s6720_s3 + $0x98] sm:$0xf0]  ;;  %v3742_v3 = vor.u32 %v4441_v55, %v3741_v53 }
  0xcd   :  { %1469 = vmatpush.bf16.msra.mxu0 %v3278_v4  ;;  %v3490_v4 = vor.u32 %v4375_v60, %v3487_v61  ;;  %v3330_v7 = vor.u32 %v4335_v1, %v3327_v2  ;;  %v4421_v61 = vld [vmem:[%s6720_s3 + $0x334] sm:$0xf0] }
  0xce   :  { %vm567_vm2 = vcmp.gt.f32.partialorder %v536_v8, 0.0  ;;  %v571_v14 = vmul.f32 0.01, %v536_v8 }
  0xd0   :  { %v575_v20 = vsel %vm567_vm2, %v536_v8, %v571_v14  ;;  %1481 = vmatpush.bf16.msra.mxu1 %v3422_v16  ;;  %v4437_v8 = vld [vmem:[%s6720_s3 + $0x3b4] sm:$0xf0]  ;;  %v3474_v16 = vor.u32 %v4371_v9, %v3471_v10  ;;  %v3391_v9 = vld [vmem:[%s6720_s3 + $0x118] sm:$0xf0]  ;;  %v4443_v10 = vld [vmem:[%s6720_s3 + $0x3ec] sm:$0xf] }
  0xd1   :  { %v548_v21 = vpop.f32.mrf.mxu2  ;;  %v5663_v25 = vpack.c.bf16 %v575_v20, %v575_v20  ;;  %v524_v28 = vpop.f32.mrf.mxu0  ;;  %1470 = vmatpush.bf16.msra.mxu0 %v3262_v17  ;;  %v3709_v17 = vld [vmem:[%s6720_s3 + $0x388] sm:$0xf]  ;;  %v4367_v20 = vld [vmem:[%s6720_s3 + $0x18c] sm:$0xf] }
  0xd2   :  { %v549_v26 = vadd.f32 %v548_v21, %v129_v5  ;;  %v561_v27 = vpop.f32.mrf.mxu3  ;;  %v537_v32 = vpop.f32.mrf.mxu1  ;;  %v3725_v5 = vld [vmem:[%s6720_s3 + $0x3a8] sm:$0xf]  ;;  %v3455_v21 = vld [vmem:[%s6720_s3 + $0x198] sm:$0xf0]  ;;  %v3710_v28 = vor.u32 %v4433_v19, %v3709_v17  ;;  %v3762_v17 = vor.u32 %v4443_v10, %v3759_v44  ;;  %v3933_v44 = vld [vmem:[%s6722_s5 + $0x150] sm:$0xf] }
  0xd3   :  { %1393 = vmatmul.bf16.vlgmr.msra.gmra.mxu2 %v5663_v25  ;;  %v3726_v14 = vor.u32 %v4437_v8, %v3725_v5  ;;  %v3458_v29 = vor.u32 %v4367_v20, %v3455_v21  ;;  %v4429_v32 = vld [vmem:[%s6720_s3 + $0x374] sm:$0xf0]  ;;  %v3615_v5 = vld [vmem:[%s6720_s3 + $0x2d8] sm:$0xf0]  ;;  %v4351_v8 = vld [vmem:[%s6720_s3 + $0x10c] sm:$0xf] }
  0xd4   :  { %v562_v36 = vadd.f32 %v561_v27, %v549_v26  ;;  %1489 = vmatpush.bf16.msra.mxu2 %v3630_v22  ;;  %1482 = vmatpush.bf16.msra.mxu1 %v3406_v50  ;;  %v3566_v22 = vor.u32 %v4397_v13, %v3565_v12  ;;  %v3549_v26 = vld [vmem:[%s6720_s3 + $0x248] sm:$0xf]  ;;  %v4393_v27 = vld [vmem:[%s6720_s3 + $0x254] sm:$0xf0]  ;;  %v4363_v50 = vld [vmem:[%s6720_s3 + $0x16c] sm:$0xf]  ;;  %v3694_v39 = vor.u32 %v4429_v32, %v3693_v30 }
  0xd5   :  { %1515 = vmatpush.bf16.msrb.mxu0 %v3378_v23  ;;  %v4327_v23 = vld [vmem:[%s6720_s3 + $0x4c] sm:$0xf]  ;;  %v3550_v34 = vor.u32 %v4393_v27, %v3549_v26  ;;  %v3394_v13 = vor.u32 %v4351_v8, %v3391_v9  ;;  %v3743_v19 = vld [vmem:[%s6720_s3 + $0x3d8] sm:$0xf0]  ;;  %v3837_v27 = vld [vmem:[%s6722_s5 + $0x90] sm:$0xf] }
  0xd6   :  { %vm568_vm3 = vcmp.gt.f32.partialorder %v562_v36, 0.0  ;;  %v572_v46 = vmul.f32 0.01, %v562_v36  ;;  %1471 = vmatmul.bf16.vlgmr.msra.gmra.mxu0 %v5545_v15  ;;  %v3298_v31 = vor.u32 %v4327_v23, %v3295_v24  ;;  %v4399_v21 = vld [vmem:[%s6720_s3 + $0x28c] sm:$0xf] }
  0xd7   :  { %v4468_v23 = vld [vmem:[%s6722_s5 + $0xb0] sm:$0xf0]  ;;  %v3727_v30 = vld [vmem:[%s6720_s3 + $0x3b8] sm:$0xf0]  ;;  %v4395_v32 = vld [vmem:[%s6720_s3 + $0x26c] sm:$0xf] }
  0xd8   :  { %v576_v49 = vsel %vm568_vm3, %v562_v36, %v572_v46  ;;  %1490 = vmatpush.bf16.msra.mxu2 %v3614_v40  ;;  %1483 = vmatpush.bf16.msra.mxu1 %v3390_v48  ;;  %v3279_v36 = vld [vmem:[%s6720_s3 + $0x38] sm:$0xf0]  ;;  %v3442_v40 = vor.u32 %v4363_v50, %v3439_v33  ;;  %v4319_v48 = vld [vmem:[%s6720_s3 + $0xc] sm:$0xf]  ;;  %v4492_v8 = vld [vmem:[%s6722_s5 + $0x170] sm:$0xf0] }
  0xd9   :  { %v5712_v56 = vpack.c.bf16 %v576_v49, %v576_v49  ;;  %v550_v57 = vpop.f32.mrf.mxu2  ;;  %1516 = vmatpush.bf16.msrb.mxu0 %v3362_v41  ;;  %v3677_v41 = vld [vmem:[%s6720_s3 + $0x348] sm:$0xf]  ;;  %v3282_v42 = vor.u32 %v4323_v35, %v3279_v36  ;;  %v3423_v46 = vld [vmem:[%s6720_s3 + $0x158] sm:$0xf0] }
  0xda   :  { %v563_v63 = vpop.f32.mrf.mxu3  ;;  %v3263_v49 = vld [vmem:[%s6720_s3 + $0x18] sm:$0xf0]  ;;  %v3678_v53 = vor.u32 %v4425_v43, %v3677_v41  ;;  %v3426_v55 = vor.u32 %v4359_v45, %v3423_v46  ;;  %v4411_v57 = vld [vmem:[%s6720_s3 + $0x2ec] sm:$0xf] }
  0xdb   :  { %1406 = vmatmul.bf16.vlgmr.msra.gmra.mxu3 %v5712_v56  ;;  %1484 = vmatmul.bf16.vlgmr.msra.gmra.mxu1 %v5575_v54  ;;  %v3266_v60 = vor.u32 %v4319_v48, %v3263_v49  ;;  %v3407_v63 = vld [vmem:[%s6720_s3 + $0x138] sm:$0xf0]  ;;  %v4387_v43 = vld [vmem:[%s6720_s3 + $0x22c] sm:$0xf] }
  0xdc   :  { %1502 = vmatpush.bf16.msra.mxu3 %v3758_v51  ;;  %1528 = vmatpush.bf16.msrb.mxu1 %v3506_v52  ;;  %v3517_v51 = vld [vmem:[%s6720_s3 + $0x208] sm:$0xf]  ;;  %v4385_v52 = vld [vmem:[%s6720_s3 + $0x214] sm:$0xf0]  ;;  %v3567_v50 = vld [vmem:[%s6720_s3 + $0x278] sm:$0xf0] }
  0xdd   :  { %1491 = vmatpush.bf16.msra.mxu2 %v3598_v58  ;;  %1517 = vmatpush.bf16.msrb.mxu0 %v3346_v59  ;;  %v3631_v58 = vld [vmem:[%s6720_s3 + $0x2f8] sm:$0xf0]  ;;  %v3661_v59 = vld [vmem:[%s6720_s3 + $0x328] sm:$0xf]  ;;  %v3518_v0 = vor.u32 %v4385_v52, %v3517_v51  ;;  %v3570_v36 = vor.u32 %v4395_v32, %v3567_v50  ;;  %v4383_v51 = vld [vmem:[%s6720_s3 + $0x20c] sm:$0xf] }
  0xde   :  { %v3634_v1 = vor.u32 %v4411_v57, %v3631_v58  ;;  %v3662_v2 = vor.u32 %v4421_v61, %v3661_v59  ;;  %v3711_v35 = vld [vmem:[%s6720_s3 + $0x398] sm:$0xf0]  ;;  %v4041_v32 = vld [vmem:[%s6722_s5 + $0x228] sm:$0xf] }
  0xdf   :  { %v3695_v41 = vld [vmem:[%s6720_s3 + $0x378] sm:$0xf0] }
  0xe0   :  { %1503 = vmatpush.bf16.msra.mxu3 %v3742_v3  ;;  %1529 = vmatpush.bf16.msrb.mxu1 %v3490_v4  ;;  %v3410_v3 = vor.u32 %v4355_v62, %v3407_v63  ;;  %v4407_v4 = vld [vmem:[%s6720_s3 + $0x2cc] sm:$0xf]  ;;  %v3535_v45 = vld [vmem:[%s6720_s3 + $0x238] sm:$0xf0]  ;;  %v3825_v63 = vld [vmem:[%s6722_s5 + $0x78] sm:$0xf] }
  0xe1   :  { %1492 = vmatpush.bf16.msra.mxu2 %v3582_v6  ;;  %1518 = vmatpush.bf16.msrb.mxu0 %v3330_v7  ;;  %v3645_v6 = vld [vmem:[%s6720_s3 + $0x308] sm:$0xf]  ;;  %v4417_v7 = vld [vmem:[%s6720_s3 + $0x314] sm:$0xf0]  ;;  %v3618_v11 = vor.u32 %v4407_v4, %v3615_v5  ;;  %v3679_v48 = vld [vmem:[%s6720_s3 + $0x358] sm:$0xf0]  ;;  %v3538_v49 = vor.u32 %v4387_v43, %v3535_v45 }
  0xe2   :  { %v3646_v12 = vor.u32 %v4417_v7, %v3645_v6  ;;  %v3519_v52 = vld [vmem:[%s6720_s3 + $0x218] sm:$0xf0]  ;;  %v3801_v4 = vld [vmem:[%s6722_s5 + $0x48] sm:$0xf]  ;;  %v4456_v5 = vld [vmem:[%s6722_s5 + $0x50] sm:$0xf0] }
  0xe3   :  { %1445 = vmatmul.bf16.vlgmr.msrb.gmra.mxu2 %v5663_v25  ;;  %v3663_v57 = vld [vmem:[%s6720_s3 + $0x338] sm:$0xf0]  ;;  %v3522_v58 = vor.u32 %v4383_v51, %v3519_v52  ;;  %v3945_v6 = vld [vmem:[%s6722_s5 + $0x168] sm:$0xf]  ;;  %v3802_v7 = vor.u32 %v4456_v5, %v3801_v4  ;;  %v4017_v52 = vld [vmem:[%s6722_s5 + $0x1f8] sm:$0xf] }
  0xe4   :  { %1504 = vmatpush.bf16.msra.mxu3 %v3726_v14  ;;  %1530 = vmatpush.bf16.msrb.mxu1 %v3474_v16  ;;  %v4403_v14 = vld [vmem:[%s6720_s3 + $0x2ac] sm:$0xf]  ;;  %v3599_v16 = vld [vmem:[%s6720_s3 + $0x2b8] sm:$0xf0]  ;;  %v3946_v10 = vor.u32 %v4492_v8, %v3945_v6  ;;  %v3947_v5 = vld [vmem:[%s6722_s5 + $0x174] sm:$0xf0] }
  0xe5   :  { %1519 = vmatpush.bf16.msrb.mxu0 %v3314_v18  ;;  %1493 = vmatpush.bf16.msra.mxu2 %v3566_v22  ;;  %v4439_v18 = vld [vmem:[%s6720_s3 + $0x3cc] sm:$0xf]  ;;  %v3602_v20 = vor.u32 %v4403_v14, %v3599_v16  ;;  %v3849_v22 = vld [vmem:[%s6722_s5 + $0xa8] sm:$0xf]  ;;  %v3647_v61 = vld [vmem:[%s6720_s3 + $0x318] sm:$0xf0] }
  0xe6   :  { %v3746_v24 = vor.u32 %v4439_v18, %v3743_v19  ;;  %v3850_v26 = vor.u32 %v4468_v23, %v3849_v22  ;;  %v4453_v9 = vld [vmem:[%s6722_s5 + $0x38] sm:$0xf0]  ;;  %v3777_v14 = vld [vmem:[%s6722_s5 + $0x18] sm:$0xf]  ;;  %v4450_v16 = vld [vmem:[%s6722_s5 + $0x20] sm:$0xf0] }
  0xe7   :  { %v3921_v18 = vld [vmem:[%s6722_s5 + $0x138] sm:$0xf]  ;;  %v4486_v19 = vld [vmem:[%s6722_s5 + $0x140] sm:$0xf0]  ;;  %v3909_v22 = vld [vmem:[%s6722_s5 + $0x120] sm:$0xf] }
  0xe8   :  { %1505 = vmatpush.bf16.msra.mxu3 %v3710_v28  ;;  %1531 = vmatpush.bf16.msrb.mxu1 %v3458_v29  ;;  %v4465_v28 = vld [vmem:[%s6722_s5 + $0x98] sm:$0xf0]  ;;  %v4435_v29 = vld [vmem:[%s6720_s3 + $0x3ac] sm:$0xf]  ;;  %v3993_v8 = vld [vmem:[%s6722_s5 + $0x1c8] sm:$0xf] }
  0xe9   :  { %1520 = vmatpush.bf16.msrb.mxu0 %v3298_v31  ;;  %1494 = vmatpush.bf16.msra.mxu2 %v3550_v34  ;;  %v3838_v33 = vor.u32 %v4465_v28, %v3837_v27  ;;  %v3730_v34 = vor.u32 %v4435_v29, %v3727_v30  ;;  %v3851_v27 = vld [vmem:[%s6722_s5 + $0xb4] sm:$0xf0]  ;;  %v3897_v30 = vld [vmem:[%s6722_s5 + $0x108] sm:$0xf]  ;;  %v4491_v4 = vld [vmem:[%s6722_s5 + $0x16c] sm:$0xf] }
  0xea   :  { %v3950_v6 = vor.u32 %v4491_v4, %v3947_v5  ;;  %v4509_v4 = vld [vmem:[%s6722_s5 + $0x1fc] sm:$0xf] }
  0xeb   :  { %1458 = vmatmul.bf16.vlgmr.msrb.gmra.mxu3 %v5712_v56 }
  0xec   :  { %1506 = vmatpush.bf16.msra.mxu3 %v3694_v39  ;;  %1532 = vmatpush.bf16.msrb.mxu1 %v3442_v40  ;;  %v4427_v40 = vld [vmem:[%s6720_s3 + $0x36c] sm:$0xf] }
  0xed   :  { %1521 = vmatpush.bf16.msrb.mxu0 %v3282_v42  ;;  %1495 = vmatpush.bf16.msra.mxu2 %v3534_v47  ;;  %v3554_v42 = vor.u32 %v4391_v37, %v3551_v38  ;;  %v3698_v46 = vor.u32 %v4427_v40, %v3695_v41  ;;  %v4423_v47 = vld [vmem:[%s6720_s3 + $0x34c] sm:$0xf]  ;;  %v3885_v37 = vld [vmem:[%s6722_s5 + $0xf0] sm:$0xf]  ;;  %v4477_v38 = vld [vmem:[%s6722_s5 + $0xf8] sm:$0xf0] }
  0xee   :  { %v4513_v40 = vld [vmem:[%s6722_s5 + $0x218] sm:$0xf0]  ;;  %v3886_v43 = vor.u32 %v4477_v38, %v3885_v37  ;;  %v4137_v37 = vld [vmem:[%s6722_s5 + $0x2e8] sm:$0xf] }
  0xef   :  { %v4461_v41 = vld [vmem:[%s6722_s5 + $0x7c] sm:$0xf] }
  0xf0   :  { %1507 = vmatpush.bf16.msra.mxu3 %v3678_v53  ;;  %1533 = vmatpush.bf16.msrb.mxu1 %v3426_v55  ;;  %v3682_v53 = vor.u32 %v4423_v47, %v3679_v48  ;;  %v4419_v55 = vld [vmem:[%s6720_s3 + $0x32c] sm:$0xf]  ;;  %v3873_v47 = vld [vmem:[%s6722_s5 + $0xd8] sm:$0xf]  ;;  %v4474_v48 = vld [vmem:[%s6722_s5 + $0xe0] sm:$0xf0] }
  0xf1   :  { %1522 = vmatpush.bf16.msrb.mxu0 %v3266_v60  ;;  %1496 = vmatpush.bf16.msra.mxu2 %v3518_v0  ;;  %v3666_v59 = vor.u32 %v4419_v55, %v3663_v57  ;;  %v4415_v60 = vld [vmem:[%s6720_s3 + $0x30c] sm:$0xf]  ;;  %v4462_v0 = vld [vmem:[%s6722_s5 + $0x80] sm:$0xf0]  ;;  %v3874_v51 = vor.u32 %v4474_v48, %v3873_v47 }
  0xf2   :  { %v3650_v62 = vor.u32 %v4415_v60, %v3647_v61  ;;  %v4458_v55 = vld [vmem:[%s6722_s5 + $0x64] sm:$0xf]  ;;  %v3861_v60 = vld [vmem:[%s6722_s5 + $0xc0] sm:$0xf]  ;;  %v4471_v61 = vld [vmem:[%s6722_s5 + $0xc8] sm:$0xf0] }
  0xf4   :  { %1508 = vmatpush.bf16.msra.mxu3 %v3662_v2  ;;  %1534 = vmatpush.bf16.msrb.mxu1 %v3410_v3  ;;  %v3813_v2 = vld [vmem:[%s6722_s5 + $0x60] sm:$0xf]  ;;  %v4459_v3 = vld [vmem:[%s6722_s5 + $0x68] sm:$0xf0] }
  0xf5   :  { %1541 = vmatpush.bf16.msrb.mxu2 %v3634_v1  ;;  %1523 = vmatmul.bf16.vlgmr.msrb.gmra.mxu0 %v5545_v15  ;;  %v3583_v15 = vld [vmem:[%s6720_s3 + $0x298] sm:$0xf0]  ;;  %v3826_v1 = vor.u32 %v4462_v0, %v3825_v63  ;;  %v3862_v63 = vor.u32 %v4471_v61, %v3861_v60  ;;  %v4507_v0 = vld [vmem:[%s6722_s5 + $0x1e8] sm:$0xf0]  ;;  %v4031_v61 = vld [vmem:[%s6722_s5 + $0x21c] sm:$0xf0] }
  0xf6   :  { %1497 = vmatmul.bf16.vlgmr.msra.gmra.mxu2 %v5663_v25  ;;  %v3586_v31 = vor.u32 %v4399_v21, %v3583_v15  ;;  %2231 = vmatpush.bf16.msra.mxu0 %v3850_v26  ;;  %v3765_v21 = vld [vmem:[%s6722_s5] sm:$0xf]  ;;  %v4447_v15 = vld [vmem:[%s6722_s5 + $0x8] sm:$0xf0] }
  0xf7   :  { %v3766_v23 = vor.u32 %v4447_v15, %v3765_v21  ;;  %v4467_v26 = vld [vmem:[%s6722_s5 + $0xac] sm:$0xf]  ;;  %v3779_v21 = vld [vmem:[%s6722_s5 + $0x24] sm:$0xf0]  ;;  %v4485_v15 = vld [vmem:[%s6722_s5 + $0x13c] sm:$0xf] }
  0xf8   :  { %1509 = vmatpush.bf16.msra.mxu3 %v3646_v12  ;;  %1535 = vmatpush.bf16.msrb.mxu1 %v3394_v13  ;;  %v3854_v29 = vor.u32 %v4467_v26, %v3851_v27  ;;  %v3969_v27 = vld [vmem:[%s6722_s5 + $0x198] sm:$0xf] }
  0xf9   :  { %1542 = vmatpush.bf16.msrb.mxu2 %v3618_v11  ;;  %v4489_v11 = vld [vmem:[%s6722_s5 + $0x158] sm:$0xf0] }
  0xfa   :  { %2232 = vmatpush.bf16.msra.mxu0 %v3838_v33  ;;  %v3934_v13 = vor.u32 %v4489_v11, %v3933_v44  ;;  %v4516_v33 = vld [vmem:[%s6722_s5 + $0x230] sm:$0xf0]  ;;  %v3791_v11 = vld [vmem:[%s6722_s5 + $0x3c] sm:$0xf0] }
  0xfb   :  { %1536 = vmatmul.bf16.vlgmr.msrb.gmra.mxu1 %v5575_v54  ;;  %1510 = vmatmul.bf16.vlgmr.msra.gmra.mxu3 %v5712_v56  ;;  %v4431_v54 = vld [vmem:[%s6720_s3 + $0x38c] sm:$0xf]  ;;  %v4452_v44 = vld [vmem:[%s6722_s5 + $0x34] sm:$0xf] }
  0xfc   :  { %1554 = vmatpush.bf16.msrb.mxu3 %v3762_v17  ;;  %v3714_v39 = vor.u32 %v4431_v54, %v3711_v35  ;;  %2244 = vmatpush.bf16.msra.mxu1 %v3946_v10  ;;  %v3778_v17 = vor.u32 %v4450_v16, %v3777_v14  ;;  %v3839_v54 = vld [vmem:[%s6722_s5 + $0x9c] sm:$0xf0]  ;;  %v4042_v35 = vor.u32 %v4516_v33, %v4041_v32  ;;  %v3767_v32 = vld [vmem:[%s6722_s5 + $0xc] sm:$0xf0] }
  0xfd   :  { %1543 = vmatpush.bf16.msrb.mxu2 %v3602_v20  ;;  %v3922_v20 = vor.u32 %v4486_v19, %v3921_v18  ;;  %v3935_v14 = vld [vmem:[%s6722_s5 + $0x15c] sm:$0xf0]  ;;  %v4501_v18 = vld [vmem:[%s6722_s5 + $0x1b8] sm:$0xf0] }
  0xfe   :  { %2233 = vmatpush.bf16.msra.mxu0 %v3826_v1  ;;  %v4455_v1 = vld [vmem:[%s6722_s5 + $0x4c] sm:$0xf] }
 0x100   :  { %1555 = vmatpush.bf16.msrb.mxu3 %v3746_v24  ;;  %2245 = vmatpush.bf16.msra.mxu1 %v3934_v13  ;;  %v4483_v24 = vld [vmem:[%s6722_s5 + $0x128] sm:$0xf0]  ;;  %v3794_v13 = vor.u32 %v4452_v44, %v3791_v11 }
 0x101   :  { %1544 = vmatpush.bf16.msrb.mxu2 %v3586_v31  ;;  %v3910_v28 = vor.u32 %v4483_v24, %v3909_v22  ;;  %v4480_v31 = vld [vmem:[%s6722_s5 + $0x110] sm:$0xf0]  ;;  %v4531_v44 = vld [vmem:[%s6722_s5 + $0x2a8] sm:$0xf0] }
 0x102   :  { %v3898_v50 = vor.u32 %v4480_v31, %v3897_v30  ;;  %v4446_v31 = vld [vmem:[%s6722_s5 + $0x4] sm:$0xf] }
 0x103   :  { %v3770_v33 = vor.u32 %v4446_v31, %v3767_v32  ;;  %v4525_v31 = vld [vmem:[%s6722_s5 + $0x278] sm:$0xf0] }
 0x104   :  { %1556 = vmatpush.bf16.msrb.mxu3 %v3730_v34  ;;  %2246 = vmatpush.bf16.msra.mxu1 %v3922_v20  ;;  %v4464_v34 = vld [vmem:[%s6722_s5 + $0x94] sm:$0xf]  ;;  %v4449_v20 = vld [vmem:[%s6722_s5 + $0x1c] sm:$0xf] }
 0x105   :  { %1545 = vmatpush.bf16.msrb.mxu2 %v3570_v36  ;;  %v3842_v36 = vor.u32 %v4464_v34, %v3839_v54  ;;  %v3782_v22 = vor.u32 %v4449_v20, %v3779_v21  ;;  %v3911_v34 = vld [vmem:[%s6722_s5 + $0x12c] sm:$0xf0] }
 0x108   :  { %1557 = vmatpush.bf16.msrb.mxu3 %v3714_v39  ;;  %2247 = vmatpush.bf16.msra.mxu1 %v3910_v28  ;;  %v4029_v39 = vld [vmem:[%s6722_s5 + $0x210] sm:$0xf]  ;;  %v4498_v28 = vld [vmem:[%s6722_s5 + $0x1a0] sm:$0xf0] }
 0x109   :  { %1546 = vmatpush.bf16.msrb.mxu2 %v3554_v42  ;;  %v3827_v42 = vld [vmem:[%s6722_s5 + $0x84] sm:$0xf0]  ;;  %v4030_v45 = vor.u32 %v4513_v40, %v4029_v39  ;;  %v3970_v30 = vor.u32 %v4498_v28, %v3969_v27  ;;  %v4540_v39 = vld [vmem:[%s6722_s5 + $0x2f0] sm:$0xf0]  ;;  %v4479_v40 = vld [vmem:[%s6722_s5 + $0x10c] sm:$0xf] }
 0x10c   :  { %1558 = vmatpush.bf16.msrb.mxu3 %v3698_v46  ;;  %2248 = vmatpush.bf16.msra.mxu1 %v3898_v50  ;;  %v3830_v46 = vor.u32 %v4461_v41, %v3827_v42  ;;  %v4482_v50 = vld [vmem:[%s6722_s5 + $0x124] sm:$0xf]  ;;  %v3899_v41 = vld [vmem:[%s6722_s5 + $0x114] sm:$0xf0]  ;;  %v4138_v42 = vor.u32 %v4540_v39, %v4137_v37 }
 0x10d   :  { %1547 = vmatpush.bf16.msrb.mxu2 %v3538_v49  ;;  %v3914_v54 = vor.u32 %v4482_v50, %v3911_v34  ;;  %v4065_v39 = vld [vmem:[%s6722_s5 + $0x258] sm:$0xf] }
 0x110   :  { %1559 = vmatpush.bf16.msrb.mxu3 %v3682_v53  ;;  %2249 = vmatpush.bf16.msra.mxu1 %v3886_v43  ;;  %v4510_v53 = vld [vmem:[%s6722_s5 + $0x200] sm:$0xf0]  ;;  %v3902_v43 = vor.u32 %v4479_v40, %v3899_v41  ;;  %v4469_v41 = vld [vmem:[%s6722_s5 + $0xb8] sm:$0xf0] }
 0x111   :  { %1548 = vmatpush.bf16.msrb.mxu2 %v3522_v58  ;;  %v4018_v57 = vor.u32 %v4510_v53, %v4017_v52  ;;  %v3815_v58 = vld [vmem:[%s6722_s5 + $0x6c] sm:$0xf0]  ;;  %v4537_v52 = vld [vmem:[%s6722_s5 + $0x2d8] sm:$0xf0]  ;;  %v4522_v40 = vld [vmem:[%s6722_s5 + $0x260] sm:$0xf0] }
 0x114   :  { %1560 = vmatpush.bf16.msrb.mxu3 %v3666_v59  ;;  %1549 = vmatmul.bf16.vlgmr.msrb.gmra.mxu2 %v5663_v25  ;;  %v3814_v25 = vor.u32 %v4459_v3, %v3813_v2  ;;  %v3818_v59 = vor.u32 %v4458_v55, %v3815_v58  ;;  %v3803_v2 = vld [vmem:[%s6722_s5 + $0x54] sm:$0xf0]  ;;  %v3887_v58 = vld [vmem:[%s6722_s5 + $0xfc] sm:$0xf0] }
 0x115   :  { %2257 = vmatpush.bf16.msra.mxu2 %v4042_v35  ;;  %2250 = vmatpush.bf16.msra.mxu1 %v3874_v51  ;;  %v3957_v35 = vld [vmem:[%s6722_s5 + $0x180] sm:$0xf]  ;;  %v4125_v51 = vld [vmem:[%s6722_s5 + $0x2d0] sm:$0xf] }
 0x116   :  { %2234 = vmatpush.bf16.msra.mxu0 %v3814_v25  ;;  %v3806_v25 = vor.u32 %v4455_v1, %v3803_v2  ;;  %v4126_v55 = vor.u32 %v4537_v52, %v4125_v51  ;;  %v4534_v1 = vld [vmem:[%s6722_s5 + $0x2c0] sm:$0xf0]  ;;  %v3845_v51 = vld [vmem:[%s6722_s5 + $0x98] sm:$0xf] }
 0x118   :  { %1561 = vmatpush.bf16.msrb.mxu3 %v3650_v62  ;;  %v4005_v62 = vld [vmem:[%s6722_s5 + $0x1e0] sm:$0xf] }
 0x119   :  { %2258 = vmatpush.bf16.msra.mxu2 %v4030_v45  ;;  %v4006_v3 = vor.u32 %v4507_v0, %v4005_v62  ;;  %2251 = vmatpush.bf16.msra.mxu1 %v3862_v63  ;;  %v4515_v45 = vld [vmem:[%s6722_s5 + $0x22c] sm:$0xf]  ;;  %v6221_v63 = vld [vmem:[%s6721_s4] sm:$0xf]  ;;  %v4113_v0 = vld [vmem:[%s6722_s5 + $0x2b8] sm:$0xf] }
 0x11a   :  { %2235 = vmatpush.bf16.msra.mxu0 %v3802_v7  ;;  %v4114_v2 = vor.u32 %v4534_v1, %v4113_v0  ;;  %v3959_v0 = vld [vmem:[%s6722_s5 + $0x18c] sm:$0xf0]  ;;  %v4539_v1 = vld [vmem:[%s6722_s5 + $0x2ec] sm:$0xf] }
 0x11b   :  { %1562 = vmatmul.bf16.vlgmr.msrb.gmra.mxu3 %v5712_v56  ;;  %v3789_v56 = vld [vmem:[%s6722_s5 + $0x30] sm:$0xf] }
 0x11c   :  { %v3790_v12 = vor.u32 %v4453_v9, %v3789_v56  ;;  %v4504_v56 = vld [vmem:[%s6722_s5 + $0x1d0] sm:$0xf0]  ;;  %2270 = vmatpush.bf16.msra.mxu3 %v4138_v42  ;;  %v4066_v42 = vor.u32 %v4522_v40, %v4065_v39  ;;  %v4490_v39 = vld [vmem:[%s6722_s5 + $0x160] sm:$0xf0]  ;;  %v4527_v40 = vld [vmem:[%s6722_s5 + $0x28c] sm:$0xf] }
 0x11d   :  { %2259 = vmatpush.bf16.msra.mxu2 %v4018_v57  ;;  %2296 = vmatpush.bf16.msrb.mxu1 %v3950_v6  ;;  %v3994_v10 = vor.u32 %v4504_v56, %v3993_v8  ;;  %v4476_v57 = vld [vmem:[%s6722_s5 + $0xf4] sm:$0xf]  ;;  %v4019_v6 = vld [vmem:[%s6722_s5 + $0x204] sm:$0xf0]  ;;  %v711_v56 = vperm.slane %v6221_v63, 0 }
 0x11e   :  { %2236 = vmatpush.bf16.msra.mxu0 %v3790_v12  ;;  %v4488_v12 = vld [vmem:[%s6722_s5 + $0x154] sm:$0xf]  ;;  %v3890_v60 = vor.u32 %v4476_v57, %v3887_v58  ;;  %v4022_v8 = vor.u32 %v4509_v4, %v4019_v6  ;;  %v4466_v57 = vld [vmem:[%s6722_s5 + $0xa0] sm:$0xf0]  ;;  %v4053_v58 = vld [vmem:[%s6722_s5 + $0x240] sm:$0xf] }
 0x11f   :  { %v3938_v16 = vor.u32 %v4488_v12, %v3935_v14  ;;  %v3863_v14 = vld [vmem:[%s6722_s5 + $0xcc] sm:$0xf0]  ;;  %v3846_v6 = vor.u32 %v4466_v57, %v3845_v51  ;;  %v3785_v51 = vld [vmem:[%s6722_s5 + $0x20] sm:$0xf] }
 0x120   :  { %2271 = vmatpush.bf16.msra.mxu3 %v4126_v55 }
 0x121   :  { %2260 = vmatpush.bf16.msra.mxu2 %v4006_v3  ;;  %2297 = vmatpush.bf16.msrb.mxu1 %v3938_v16  ;;  %v4473_v3 = vld [vmem:[%s6722_s5 + $0xdc] sm:$0xf]  ;;  %v4506_v16 = vld [vmem:[%s6722_s5 + $0x1e4] sm:$0xf] }
 0x122   :  { %2237 = vmatpush.bf16.msra.mxu0 %v3778_v17  ;;  %v3981_v17 = vld [vmem:[%s6722_s5 + $0x1b0] sm:$0xf] }
 0x123   :  { %v3982_v19 = vor.u32 %v4501_v18, %v3981_v17  ;;  %v4007_v18 = vld [vmem:[%s6722_s5 + $0x1ec] sm:$0xf0] }
 0x124   :  { %2272 = vmatpush.bf16.msra.mxu3 %v4114_v2  ;;  %v712_v2 = vperm.slane %v6221_v63, 1 }
 0x125   :  { %2261 = vmatpush.bf16.msra.mxu2 %v3994_v10  ;;  %v4101_v10 = vld [vmem:[%s6722_s5 + $0x2a0] sm:$0xf] }
 0x126   :  { %2238 = vmatpush.bf16.msra.mxu0 %v3766_v23  ;;  %v3923_v23 = vld [vmem:[%s6722_s5 + $0x144] sm:$0xf0]  ;;  %v4102_v12 = vor.u32 %v4531_v44, %v4101_v10  ;;  %v4536_v10 = vld [vmem:[%s6722_s5 + $0x2d4] sm:$0xf]  ;;  %v4127_v44 = vld [vmem:[%s6722_s5 + $0x2dc] sm:$0xf0] }
 0x127   :  { %v3926_v24 = vor.u32 %v4485_v15, %v3923_v23  ;;  %v4089_v15 = vld [vmem:[%s6722_s5 + $0x288] sm:$0xf] }
 0x128   :  { %2273 = vmatpush.bf16.msra.mxu3 %v4102_v12 }
 0x129   :  { %2262 = vmatpush.bf16.msra.mxu2 %v3982_v19  ;;  %2298 = vmatpush.bf16.msrb.mxu1 %v3926_v24  ;;  %v4010_v19 = vor.u32 %v4506_v16, %v4007_v18  ;;  %v4503_v24 = vld [vmem:[%s6722_s5 + $0x1cc] sm:$0xf]  ;;  %v4460_v18 = vld [vmem:[%s6722_s5 + $0x70] sm:$0xf0] }
 0x12a   :  { %2283 = vmatpush.bf16.msrb.mxu0 %v3854_v29 }
 0x12d   :  { %2263 = vmatpush.bf16.msra.mxu2 %v3970_v30  ;;  %2299 = vmatpush.bf16.msrb.mxu1 %v3914_v54  ;;  %v4077_v30 = vld [vmem:[%s6722_s5 + $0x270] sm:$0xf] }
 0x12e   :  { %2284 = vmatpush.bf16.msrb.mxu0 %v3842_v36  ;;  %v4495_v36 = vld [vmem:[%s6722_s5 + $0x188] sm:$0xf0]  ;;  %v4078_v50 = vor.u32 %v4525_v31, %v4077_v30  ;;  %v4530_v30 = vld [vmem:[%s6722_s5 + $0x2a4] sm:$0xf]  ;;  %v4103_v31 = vld [vmem:[%s6722_s5 + $0x2ac] sm:$0xf0] }
 0x12f   :  { %v3958_v38 = vor.u32 %v4495_v36, %v3957_v35 }
 0x131   :  { %v6078_v49 = vpop.f32.mrf.mxu0  ;;  %2264 = vmatpush.bf16.msra.mxu2 %v3958_v38  ;;  %2300 = vmatpush.bf16.msrb.mxu1 %v3902_v43  ;;  %v3857_v38 = vld [vmem:[%s6722_s5 + $0xb0] sm:$0xf]  ;;  %v4497_v43 = vld [vmem:[%s6722_s5 + $0x19c] sm:$0xf] }
 0x132   :  { %2285 = vmatpush.bf16.msrb.mxu0 %v3830_v46  ;;  %v4043_v46 = vld [vmem:[%s6722_s5 + $0x234] sm:$0xf0]  ;;  %v1369_v20 = vadd.f32 %v6078_v49, %v711_v56  ;;  %v3858_v55 = vor.u32 %v4469_v41, %v3857_v38 }
 0x133   :  { %v4046_v47 = vor.u32 %v4515_v45, %v4043_v46  ;;  %v3995_v49 = vld [vmem:[%s6722_s5 + $0x1d4] sm:$0xf0]  ;;  %v3971_v45 = vld [vmem:[%s6722_s5 + $0x1a4] sm:$0xf0] }
 0x134   :  { %v4091_v41 = vld [vmem:[%s6722_s5 + $0x294] sm:$0xf0] }
 0x135   :  { %2309 = vmatpush.bf16.msrb.mxu2 %v4046_v47  ;;  %2301 = vmatpush.bf16.msrb.mxu1 %v3890_v60  ;;  %v3974_v47 = vor.u32 %v4497_v43, %v3971_v45  ;;  %v713_v43 = vperm.slane %v6221_v63, 2 }
 0x136   :  { %2286 = vmatpush.bf16.msrb.mxu0 %v3818_v59  ;;  %v4512_v59 = vld [vmem:[%s6722_s5 + $0x214] sm:$0xf] }
 0x137   :  { %v4034_v62 = vor.u32 %v4512_v59, %v4031_v61  ;;  %v4519_v59 = vld [vmem:[%s6722_s5 + $0x248] sm:$0xf0] }
 0x138   :  { %v6116_v7 = vpop.f32.mrf.mxu1  ;;  %v4054_v61 = vor.u32 %v4519_v59, %v4053_v58  ;;  %v4487_v58 = vld [vmem:[%s6722_s5 + $0x148] sm:$0xf0]  ;;  %v4524_v59 = vld [vmem:[%s6722_s5 + $0x274] sm:$0xf] }
 0x139   :  { %v1370_v9 = vpop.f32.mrf.mxu0  ;;  %2310 = vmatpush.bf16.msrb.mxu2 %v4034_v62  ;;  %v1382_v27 = vadd.f32 %v6116_v7, %v1369_v20  ;;  %v3983_v7 = vld [vmem:[%s6722_s5 + $0x1bc] sm:$0xf0]  ;;  %v4494_v62 = vld [vmem:[%s6722_s5 + $0x184] sm:$0xf] }
 0x13a   :  { %2287 = vmatpush.bf16.msrb.mxu0 %v3806_v25  ;;  %v3875_v25 = vld [vmem:[%s6722_s5 + $0xe4] sm:$0xf0] }
 0x13b   :  { %v3878_v5 = vor.u32 %v4473_v3, %v3875_v25  ;;  %v3962_v3 = vor.u32 %v4494_v62, %v3959_v0  ;;  %v4139_v25 = vld [vmem:[%s6722_s5 + $0x2f4] sm:$0xf0] }
 0x13d   :  { %2302 = vmatpush.bf16.msrb.mxu1 %v3878_v5  ;;  %2311 = vmatpush.bf16.msrb.mxu2 %v4022_v8  ;;  %v4142_v5 = vor.u32 %v4539_v1, %v4139_v25  ;;  %v3833_v8 = vld [vmem:[%s6722_s5 + $0x80] sm:$0xf]  ;;  %v3773_v25 = vld [vmem:[%s6722_s5 + $0x8] sm:$0xf] }
 0x13e   :  { %2288 = vmatpush.bf16.msrb.mxu0 %v3794_v13  ;;  %v4470_v13 = vld [vmem:[%s6722_s5 + $0xc4] sm:$0xf] }
 0x13f   :  { %v3866_v17 = vor.u32 %v4470_v13, %v3863_v14  ;;  %v4130_v13 = vor.u32 %v4536_v10, %v4127_v44 }
 0x140   :  { %v1383_v26 = vpop.f32.mrf.mxu1 }
 0x141   :  { %v6160_v29 = vpop.f32.mrf.mxu0  ;;  %2303 = vmatpush.bf16.msrb.mxu1 %v3866_v17  ;;  %2312 = vmatpush.bf16.msrb.mxu2 %v4010_v19  ;;  %v3998_v26 = vor.u32 %v4503_v24, %v3995_v49  ;;  %v3821_v17 = vld [vmem:[%s6722_s5 + $0x68] sm:$0xf]  ;;  %v4533_v19 = vld [vmem:[%s6722_s5 + $0x2bc] sm:$0xf]  ;;  %v3953_v49 = vld [vmem:[%s6722_s5 + $0x170] sm:$0xf] }
 0x142   :  { %2289 = vmatpush.bf16.msrb.mxu0 %v3782_v22  ;;  %v4528_v22 = vld [vmem:[%s6722_s5 + $0x290] sm:$0xf0]  ;;  %v1421_v12 = vadd.f32 %v6160_v29, %v712_v2  ;;  %v4115_v29 = vld [vmem:[%s6722_s5 + $0x2c4] sm:$0xf0]  ;;  %v4457_v24 = vld [vmem:[%s6722_s5 + $0x58] sm:$0xf0] }
 0x143   :  { %v4090_v23 = vor.u32 %v4528_v22, %v4089_v15  ;;  %v4118_v20 = vor.u32 %v4533_v19, %v4115_v29  ;;  %v3822_v22 = vor.u32 %v4460_v18, %v3821_v17  ;;  %v4481_v18 = vld [vmem:[%s6722_s5 + $0x118] sm:$0xf0]  ;;  %v4518_v19 = vld [vmem:[%s6722_s5 + $0x244] sm:$0xf]  ;;  %v4055_v29 = vld [vmem:[%s6722_s5 + $0x24c] sm:$0xf0] }
 0x145   :  { %2274 = vmatpush.bf16.msra.mxu3 %v4090_v23  ;;  %2313 = vmatpush.bf16.msrb.mxu2 %v3998_v26  ;;  %v3809_v23 = vld [vmem:[%s6722_s5 + $0x50] sm:$0xf] }
 0x146   :  { %2290 = vmatpush.bf16.msrb.mxu0 %v3770_v33  ;;  %v4500_v33 = vld [vmem:[%s6722_s5 + $0x1b4] sm:$0xf] }
 0x147   :  { %v3986_v54 = vor.u32 %v4500_v33, %v3983_v7 }
 0x148   :  { %v6198_v48 = vpop.f32.mrf.mxu1 }
 0x149   :  { %v1422_v53 = vpop.f32.mrf.mxu0  ;;  %2275 = vmatpush.bf16.msra.mxu3 %v4078_v50  ;;  %2314 = vmatpush.bf16.msrb.mxu2 %v3986_v54  ;;  %v1434_v14 = vadd.f32 %v6198_v48, %v1421_v12  ;;  %v4106_v50 = vor.u32 %v4530_v30, %v4103_v31  ;;  %v4037_v30 = vld [vmem:[%s6722_s5 + $0x218] sm:$0xf]  ;;  %v4514_v31 = vld [vmem:[%s6722_s5 + $0x220] sm:$0xf0] }
 0x14d   :  { %2276 = vmatpush.bf16.msra.mxu3 %v4066_v42  ;;  %2315 = vmatpush.bf16.msrb.mxu2 %v3974_v47  ;;  %v4094_v42 = vor.u32 %v4527_v40, %v4091_v41  ;;  %v4472_v40 = vld [vmem:[%s6722_s5 + $0xd0] sm:$0xf0]  ;;  %v4013_v41 = vld [vmem:[%s6722_s5 + $0x1e8] sm:$0xf] }
 0x150   :  { %v1435_v9 = vpop.f32.mrf.mxu1 }
 0x151   :  { %2277 = vmatpush.bf16.msra.mxu3 %v4054_v61  ;;  %v4463_v9 = vld [vmem:[%s6722_s5 + $0x88] sm:$0xf0]  ;;  %2316 = vmatpush.bf16.msrb.mxu2 %v3962_v3  ;;  %v4079_v61 = vld [vmem:[%s6722_s5 + $0x27c] sm:$0xf0] }
 0x152   :  { %v3834_v16 = vor.u32 %v4463_v9, %v3833_v8  ;;  %v4082_v62 = vor.u32 %v4524_v59, %v4079_v61  ;;  %v4521_v8 = vld [vmem:[%s6722_s5 + $0x25c] sm:$0xf] }
 0x153   :  { %v6248_v11 = vpop.f32.mrf.mxu0 }
 0x154   :  { %v1473_v0 = vadd.f32 %v6248_v11, %v713_v43  ;;  %v4484_v11 = vld [vmem:[%s6722_s5 + $0x130] sm:$0xf0] }
 0x155   :  { %2322 = vmatpush.bf16.msrb.mxu3 %v4142_v5  ;;  %v3917_v5 = vld [vmem:[%s6722_s5 + $0x128] sm:$0xf] }
 0x156   :  { %v1394_v21 = vpop.f32.mrf.mxu2 }
 0x157   :  { %v1395_v34 = vadd.f32 %v1394_v21, %v1382_v27  ;;  %v4493_v27 = vld [vmem:[%s6722_s5 + $0x178] sm:$0xf0] }
 0x158   :  { %v6276_v28 = vpop.f32.mrf.mxu1  ;;  %v3954_v54 = vor.u32 %v4493_v27, %v3953_v49  ;;  %v3893_v49 = vld [vmem:[%s6722_s5 + $0xf8] sm:$0xf] }
 0x159   :  { %2323 = vmatpush.bf16.msrb.mxu3 %v4130_v13  ;;  %v3905_v13 = vld [vmem:[%s6722_s5 + $0x110] sm:$0xf] }
 0x15b   :  { %v1474_v32 = vpop.f32.mrf.mxu0 }
 0x15d   :  { %2324 = vmatpush.bf16.msrb.mxu3 %v4118_v20  ;;  %v4517_v20 = vld [vmem:[%s6722_s5 + $0x238] sm:$0xf0] }
 0x15e   :  { %v1407_v35 = vpop.f32.mrf.mxu3  ;;  %v1396_v37 = vpop.f32.mrf.mxu2 }
 0x15f   :  { %v1408_v36 = vadd.f32 %v1407_v35, %v1395_v34  ;;  %v3810_v34 = vor.u32 %v4457_v24, %v3809_v23  ;;  %v3797_v35 = vld [vmem:[%s6722_s5 + $0x38] sm:$0xf] }
 0x160   :  { %v1487_v53 = vpop.f32.mrf.mxu1  ;;  %v3941_v37 = vld [vmem:[%s6722_s5 + $0x158] sm:$0xf] }
 0x161   :  { %vm1567_vm4 = vcmp.gt.f32.partialorder %v1408_v36, 0.0  ;;  %v1571_v46 = vmul.f32 0.01, %v1408_v36  ;;  %2325 = vmatpush.bf16.msrb.mxu3 %v4106_v50  ;;  %v3942_v47 = vor.u32 %v4490_v39, %v3941_v37  ;;  %v3929_v53 = vld [vmem:[%s6722_s5 + $0x140] sm:$0xf] }
 0x162   :  { %v3930_v3 = vor.u32 %v4487_v58, %v3929_v53  ;;  %v3869_v39 = vld [vmem:[%s6722_s5 + $0xc8] sm:$0xf]  ;;  %v4502_v58 = vld [vmem:[%s6722_s5 + $0x1c0] sm:$0xf0] }
 0x163   :  { %v1575_v52 = vsel %vm1567_vm4, %v1408_v36, %v1571_v46  ;;  %v4454_v36 = vld [vmem:[%s6722_s5 + $0x40] sm:$0xf0]  ;;  %v3870_v43 = vor.u32 %v4472_v40, %v3869_v39  ;;  %v4545_v39 = vld [vmem:[%s6724_s7 + $0x18] sm:$0xff] }
 0x164   :  { %v6320_v60 = vpack.c.bf16 %v1575_v52, %v1575_v52  ;;  %v3798_v46 = vor.u32 %v4454_v36, %v3797_v35  ;;  %v4451_v52 = vld [vmem:[%s6722_s5 + $0x28] sm:$0xf0]  ;;  %v4025_v35 = vld [vmem:[%s6722_s5 + $0x200] sm:$0xf]  ;;  %v4557_v40 = vld [vmem:[%s6724_s7 + $0x78] sm:$0xff] }
 0x165   :  { %2326 = vmatpush.bf16.msrb.mxu3 %v4094_v42  ;;  %v3786_v2 = vor.u32 %v4451_v52, %v3785_v51  ;;  %v4508_v42 = vld [vmem:[%s6722_s5 + $0x1f0] sm:$0xf0]  ;;  %v714_v51 = vperm.slane %v6221_v63, 3 }
 0x166   :  { %v1409_v4 = vpop.f32.mrf.mxu3  ;;  %2239 = vmatmul.bf16.vlgmr.msra.gmra.mxu0 %v6320_v60  ;;  %v1446_v56 = vpop.f32.mrf.mxu2 }
 0x167   :  { %2335 = vmatpush.bf16.msra.mxu0 %v3858_v55  ;;  %v1447_v48 = vadd.f32 %v1446_v56, %v1434_v14  ;;  %v4448_v4 = vld [vmem:[%s6722_s5 + $0x10] sm:$0xf0]  ;;  %v4067_v56 = vld [vmem:[%s6722_s5 + $0x264] sm:$0xf0] }
 0x168   :  { %v4070_v9 = vor.u32 %v4521_v8, %v4067_v56  ;;  %v3774_v12 = vor.u32 %v4448_v4, %v3773_v25  ;;  %v4496_v25 = vld [vmem:[%s6722_s5 + $0x190] sm:$0xf0]  ;;  %v4145_v4 = vld [vmem:[%s6722_s5 + $0x2f0] sm:$0xf] }
 0x169   :  { %2327 = vmatpush.bf16.msrb.mxu3 %v4082_v62  ;;  %v3977_v62 = vld [vmem:[%s6722_s5 + $0x1a0] sm:$0xf] }
 0x16b   :  { %2336 = vmatpush.bf16.msra.mxu0 %v3846_v6  ;;  %v1486_v6 = vadd.f32 %v6276_v28, %v1473_v0  ;;  %v3918_v28 = vor.u32 %v4484_v11, %v3917_v5  ;;  %v4499_v0 = vld [vmem:[%s6722_s5 + $0x1a8] sm:$0xf0]  ;;  %v4541_v5 = vld [vmem:[%s6722_s5 + $0x2f8] sm:$0xf0] }
 0x16c   :  { %v4146_v56 = vor.u32 %v4541_v5, %v4145_v4 }
 0x16d   :  { %2328 = vmatpush.bf16.msrb.mxu3 %v4070_v9 }
 0x16e   :  { %v1459_v21 = vpop.f32.mrf.mxu3  ;;  %v1448_v26 = vpop.f32.mrf.mxu2 }
 0x16f   :  { %v1460_v15 = vadd.f32 %v1459_v21, %v1447_v48  ;;  %2337 = vmatpush.bf16.msra.mxu0 %v3834_v16  ;;  %v4049_v48 = vld [vmem:[%s6722_s5 + $0x230] sm:$0xf]  ;;  %v4058_v21 = vor.u32 %v4518_v19, %v4055_v29  ;;  %v4478_v26 = vld [vmem:[%s6722_s5 + $0x100] sm:$0xf0] }
 0x170   :  { %v4050_v24 = vor.u32 %v4517_v20, %v4049_v48  ;;  %v3894_v50 = vor.u32 %v4478_v26, %v3893_v49  ;;  %v4097_v29 = vld [vmem:[%s6722_s5 + $0x290] sm:$0xf]  ;;  %v4529_v48 = vld [vmem:[%s6722_s5 + $0x298] sm:$0xf0]  ;;  %v4061_v26 = vld [vmem:[%s6722_s5 + $0x248] sm:$0xf] }
 0x171   :  { %vm1568_vm5 = vcmp.gt.f32.partialorder %v1460_v15, 0.0  ;;  %v1572_v32 = vmul.f32 0.01, %v1460_v15  ;;  %2329 = vmatpush.bf16.msrb.mxu3 %v4058_v21  ;;  %v4098_v20 = vor.u32 %v4529_v48, %v4097_v29  ;;  %v4085_v21 = vld [vmem:[%s6722_s5 + $0x278] sm:$0xf] }
 0x172   :  { %v6380_v33 = vpop.f32.mrf.mxu0 }
 0x173   :  { %v1576_v7 = vsel %vm1568_vm5, %v1460_v15, %v1572_v32  ;;  %2338 = vmatpush.bf16.msra.mxu0 %v3822_v22  ;;  %v3906_v22 = vor.u32 %v4481_v18, %v3905_v13  ;;  %v1525_v59 = vadd.f32 %v6380_v33, %v714_v51  ;;  %v3978_v33 = vor.u32 %v4499_v0, %v3977_v62  ;;  %v4121_v13 = vld [vmem:[%s6722_s5 + $0x2c0] sm:$0xf]  ;;  %v4532_v18 = vld [vmem:[%s6722_s5 + $0x2b0] sm:$0xf0]  ;;  %v4551_v0 = vld [vmem:[%s6724_s7 + $0x48] sm:$0xff] }
 0x174   :  { %v6391_v38 = vpack.c.bf16 %v1576_v7, %v1576_v7  ;;  %v4038_v7 = vor.u32 %v4514_v31, %v4037_v30  ;;  %v4542_v51 = vld [vmem:[%s6724_s7] sm:$0xff] }
 0x176   :  { %v1461_v45 = vpop.f32.mrf.mxu3  ;;  %2252 = vmatmul.bf16.vlgmr.msra.gmra.mxu1 %v6391_v38  ;;  %2291 = vmatmul.bf16.vlgmr.msrb.gmra.mxu0 %v6320_v60 }
 0x177   :  { %2339 = vmatpush.bf16.msra.mxu0 %v3810_v34  ;;  %2348 = vmatpush.bf16.msra.mxu1 %v3954_v54  ;;  %v3881_v34 = vld [vmem:[%s6722_s5 + $0xe0] sm:$0xf]  ;;  %v4475_v54 = vld [vmem:[%s6722_s5 + $0xe8] sm:$0xf0]  ;;  %v4014_v45 = vor.u32 %v4508_v42, %v4013_v41  ;;  %v4544_v41 = vld [vmem:[%s6724_s7 + $0x10] sm:$0xff] }
 0x178   :  { %v6414_v55 = vpop.f32.mrf.mxu1  ;;  %v3882_v36 = vor.u32 %v4475_v54, %v3881_v34  ;;  %v4556_v42 = vld [vmem:[%s6724_s7 + $0x70] sm:$0xff] }
 0x179   :  { %v1498_v57 = vpop.f32.mrf.mxu2  ;;  %v1538_v63 = vadd.f32 %v6414_v55, %v1525_v59  ;;  %v4553_v59 = vld [vmem:[%s6724_s7 + $0x58] sm:$0xff] }
 0x17a   :  { %v1526_v1 = vpop.f32.mrf.mxu0  ;;  %v1499_v10 = vadd.f32 %v1498_v57, %v1486_v6  ;;  %v3989_v57 = vld [vmem:[%s6722_s5 + $0x1b8] sm:$0xf] }
 0x17b   :  { %2340 = vmatpush.bf16.msra.mxu0 %v3798_v46  ;;  %2349 = vmatpush.bf16.msra.mxu1 %v3942_v47  ;;  %v4001_v46 = vld [vmem:[%s6722_s5 + $0x1d0] sm:$0xf]  ;;  %v4505_v47 = vld [vmem:[%s6722_s5 + $0x1d8] sm:$0xf0]  ;;  %v3990_v61 = vor.u32 %v4502_v58, %v3989_v57 }
 0x17c   :  { %v4002_v52 = vor.u32 %v4505_v47, %v4001_v46  ;;  %v4543_v46 = vld [vmem:[%s6724_s7 + $0x8] sm:$0xff] }
 0x17d   :  { %v4555_v47 = vld [vmem:[%s6724_s7 + $0x68] sm:$0xff] }
 0x17e   :  { %v1511_v44 = vpop.f32.mrf.mxu3 }
 0x17f   :  { %2341 = vmatpush.bf16.msra.mxu0 %v3786_v2  ;;  %2350 = vmatpush.bf16.msra.mxu1 %v3930_v3  ;;  %v1512_v14 = vadd.f32 %v1511_v44, %v1499_v10  ;;  %v4133_v10 = vld [vmem:[%s6722_s5 + $0x2d8] sm:$0xf]  ;;  %v4538_v44 = vld [vmem:[%s6722_s5 + $0x2e0] sm:$0xf0] }
 0x180   :  { %v1539_v16 = vpop.f32.mrf.mxu1 }
 0x181   :  { %v1500_v17 = vpop.f32.mrf.mxu2  ;;  %vm1569_vm6 = vcmp.gt.f32.partialorder %v1512_v14, 0.0  ;;  %v1573_v15 = vmul.f32 0.01, %v1512_v14 }
 0x182   :  { %v4109_v17 = vld [vmem:[%s6722_s5 + $0x2a8] sm:$0xf] }
 0x183   :  { %2342 = vmatpush.bf16.msra.mxu0 %v3774_v12  ;;  %2351 = vmatpush.bf16.msra.mxu1 %v3918_v28  ;;  %v1577_v23 = vsel %vm1569_vm6, %v1512_v14, %v1573_v15  ;;  %v4134_v28 = vor.u32 %v4538_v44, %v4133_v10  ;;  %v4535_v14 = vld [vmem:[%s6722_s5 + $0x2c8] sm:$0xf0]  ;;  %v4110_v19 = vor.u32 %v4532_v18, %v4109_v17  ;;  %v4526_v15 = vld [vmem:[%s6722_s5 + $0x280] sm:$0xf0] }
 0x184   :  { %v6469_v27 = vpack.c.bf16 %v1577_v23, %v1577_v23  ;;  %v4122_v16 = vor.u32 %v4535_v14, %v4121_v13  ;;  %v4073_v23 = vld [vmem:[%s6722_s5 + $0x260] sm:$0xf] }
 0x186   :  { %2304 = vmatmul.bf16.vlgmr.msrb.gmra.mxu1 %v6391_v38  ;;  %2343 = vmatmul.bf16.vlgmr.msra.gmra.mxu0 %v6320_v60  ;;  %v1513_v32 = vpop.f32.mrf.mxu3  ;;  %v4511_v60 = vld [vmem:[%s6722_s5 + $0x208] sm:$0xf0] }
 0x187   :  { %2265 = vmatmul.bf16.vlgmr.msra.gmra.mxu2 %v6469_v27  ;;  %2352 = vmatpush.bf16.msra.mxu1 %v3906_v22  ;;  %v4026_v37 = vor.u32 %v4511_v60, %v4025_v35  ;;  %v4086_v22 = vor.u32 %v4526_v15, %v4085_v21  ;;  %v4547_v35 = vld [vmem:[%s6724_s7 + $0x28] sm:$0xff]  ;;  %v4546_v60 = vld [vmem:[%s6724_s7 + $0x20] sm:$0xff] }
 0x188   :  { %2361 = vmatpush.bf16.msra.mxu2 %v4050_v24  ;;  %v4523_v24 = vld [vmem:[%s6722_s5 + $0x268] sm:$0xf0] }
 0x189   :  { %v4074_v49 = vor.u32 %v4523_v24, %v4073_v23 }
 0x18b   :  { %2353 = vmatpush.bf16.msra.mxu1 %v3894_v50  ;;  %v4549_v50 = vld [vmem:[%s6724_s7 + $0x38] sm:$0xff] }
 0x18c   :  { %2362 = vmatpush.bf16.msra.mxu2 %v4038_v7  ;;  %2551 = vmatpush.bf16.msrb.mxu0 %v4549_v50  ;;  %v4548_v7 = vld [vmem:[%s6724_s7 + $0x30] sm:$0xff] }
 0x18f   :  { %2354 = vmatpush.bf16.msra.mxu1 %v3882_v36 }
 0x190   :  { %2363 = vmatpush.bf16.msra.mxu2 %v4026_v37  ;;  %2552 = vmatpush.bf16.msrb.mxu0 %v4548_v7  ;;  %v4561_v7 = vld [vmem:[%s6726_s9 + $0x8] sm:$0xff] }
 0x193   :  { %2355 = vmatpush.bf16.msra.mxu1 %v3870_v43 }
 0x194   :  { %2364 = vmatpush.bf16.msra.mxu2 %v4014_v45  ;;  %2553 = vmatpush.bf16.msrb.mxu0 %v4547_v35 }
 0x196   :  { %2356 = vmatmul.bf16.vlgmr.msra.gmra.mxu1 %v6391_v38  ;;  %v3965_v38 = vld [vmem:[%s6722_s5 + $0x188] sm:$0xf] }
 0x197   :  { %v1550_v53 = vpop.f32.mrf.mxu2  ;;  %2317 = vmatmul.bf16.vlgmr.msrb.gmra.mxu2 %v6469_v27  ;;  %v3966_v8 = vor.u32 %v4496_v25, %v3965_v38  ;;  %2564 = vmatpush.bf16.msrb.mxu1 %v4557_v40 }
 0x198   :  { %2365 = vmatpush.bf16.msra.mxu2 %v4002_v52  ;;  %v1551_v1 = vadd.f32 %v1550_v53, %v1538_v63  ;;  %2554 = vmatpush.bf16.msrb.mxu0 %v4546_v60  ;;  %v4554_v52 = vld [vmem:[%s6724_s7 + $0x60] sm:$0xff]  ;;  %v4552_v63 = vld [vmem:[%s6724_s7 + $0x50] sm:$0xff] }
 0x199   :  { %v2634_v60 = vld [vmem:[%s6729_s12] sm:$0x3] }
 0x19b   :  { %2565 = vmatpush.bf16.msrb.mxu1 %v4556_v42  ;;  %v4571_v42 = vld [vmem:[%s6725_s8] ss:$0 sm:$0xff]  ;;  %s4658_s8 = smov 64  }
 0x19c   :  { %2366 = vmatpush.bf16.msra.mxu2 %v3990_v61  ;;  %2555 = vmatpush.bf16.msrb.mxu0 %v4545_v39  ;;  %v4560_v39 = vld [vmem:[%s6726_s9] sm:$0xff] }
 0x19e   :  { %v1563_v2 = vpop.f32.mrf.mxu3 }
 0x19f   :  { %v1564_v3 = vadd.f32 %v1563_v2, %v1551_v1  ;;  %v1552_v55 = vpop.f32.mrf.mxu2  ;;  %2566 = vmatpush.bf16.msrb.mxu1 %v4555_v47  ;;  %v4550_v1 = vld [vmem:[%s6724_s7 + $0x40] sm:$0xff] }
 0x1a0   :  { %2367 = vmatpush.bf16.msra.mxu2 %v3978_v33  ;;  %2556 = vmatpush.bf16.msrb.mxu0 %v4544_v41  ;;  %v1711_v2 = vld [vmem:[%s6723_s6] sm:$0x7]  ;;  %v4559_v55 = vld [vmem:[%s6724_s7 + $0x88] sm:$0xff] }
 0x1a1   :  { %vm1570_vm7 = vcmp.gt.f32.partialorder %v1564_v3, 0.0  ;;  %v1574_v6 = vmul.f32 0.01, %v1564_v3  ;;  %v1713_v38 = vperm.slane %v1711_v2, 0  ;;  %v1715_v15 = vperm.slane %v1711_v2, 2 }
 0x1a3   :  { %v1578_v11 = vsel %vm1570_vm7, %v1564_v3, %v1574_v6  ;;  %2567 = vmatpush.bf16.msrb.mxu1 %v4554_v52 }
 0x1a4   :  { %v1582_v9 = vpack.c.bf16 %v1578_v11, %v1578_v11  ;;  %2368 = vmatpush.bf16.msra.mxu2 %v3966_v8  ;;  %2557 = vmatpush.bf16.msrb.mxu0 %v4543_v46 }
 0x1a6   :  { %v1565_v12 = vpop.f32.mrf.mxu3  ;;  %2278 = vmatmul.bf16.vlgmr.msra.gmra.mxu3 %v1582_v9 }
 0x1a7   :  { %2374 = vmatpush.bf16.msra.mxu3 %v4146_v56  ;;  %2369 = vmatmul.bf16.vlgmr.msra.gmra.mxu2 %v6469_v27  ;;  %v4520_v27 = vld [vmem:[%s6722_s5 + $0x250] sm:$0xf0] }
 0x1a8   :  { %v4062_v30 = vor.u32 %v4520_v27, %v4061_v26  ;;  %2558 = vmatpush.bf16.msrb.mxu0 %v4542_v51  ;;  %2568 = vmatpush.bf16.msrb.mxu1 %v4553_v59 }
 0x1a9   :  { %2583 = vmatpush.bf16.msrb.mxu2 %v4559_v55 }
 0x1ab   :  { %2375 = vmatpush.bf16.msra.mxu3 %v4134_v28  ;;  %v1714_v28 = vperm.slane %v1711_v2, 1 }
 0x1ac   :  { %2569 = vmatpush.bf16.msrb.mxu1 %v4552_v63  ;;  %v4572_v63 = vld [vmem:[%s6727_s10] ss:$0 sm:$0xff]  ;;  %s4660_s10 = smov 96  }
 0x1af   :  { %2376 = vmatpush.bf16.msra.mxu3 %v4122_v16 }
 0x1b0   :  { %2570 = vmatpush.bf16.msrb.mxu1 %v4551_v0 }
 0x1b3   :  { %2377 = vmatpush.bf16.msra.mxu3 %v4110_v19 }
 0x1b4   :  { %2571 = vmatpush.bf16.msrb.mxu1 %v4550_v1 }
 0x1b6   :  { %2330 = vmatmul.bf16.vlgmr.msrb.gmra.mxu3 %v1582_v9 }
 0x1b7   :  { %2378 = vmatpush.bf16.msra.mxu3 %v4098_v20 }
 0x1bb   :  { %2379 = vmatpush.bf16.msra.mxu3 %v4086_v22 }
 0x1bf   :  { %2380 = vmatpush.bf16.msra.mxu3 %v4074_v49 }
 0x1c3   :  { %2381 = vmatpush.bf16.msra.mxu3 %v4062_v30 }
 0x1c6   :  { %2382 = vmatmul.bf16.vlgmr.msra.gmra.mxu3 %v1582_v9  ;;  %v4558_v9 = vld [vmem:[%s6724_s7 + $0x80] sm:$0xff]  ;;  %s2968_s7 = sshll.u32 %s6734_s17, 4  ;;  %s2969_s7 = int_to_ptr.hbm [resolvable:$true] %s2968_s7 }
 0x1c7   :  { %2584 = vmatpush.bf16.msrb.mxu2 %v4558_v9  ;;  %2623 = vmatpush.bf16.msrb.mxu3 %v4561_v7 }
 0x1cb   :  { %2624 = vmatpush.bf16.msrb.mxu3 %v4560_v39 }
 0x1e3   :  { %v2240_v31 = vpop.f32.mrf.mxu0 }
 0x1e4   :  { %v2241_v25 = vadd.f32 %v2240_v31, %v1713_v38 }
 0x1eb   :  { %v2242_v32 = vpop.f32.mrf.mxu0 }
 0x1f3   :  { %v2253_v34 = vpop.f32.mrf.mxu1  ;;  %v2292_v54 = vpop.f32.mrf.mxu0 }
 0x1f4   :  { %v2254_v5 = vadd.f32 %v2253_v34, %v2241_v25  ;;  %v2293_v14 = vadd.f32 %v2292_v54, %v1714_v28  ;;  %v4563_v34 = vld [vmem:[%s6728_s11 + $0x8] sm:$0xff]  ;;  %v4562_v54 = vld [vmem:[%s6728_s11] sm:$0xff] }
 0x1f5   :  { %2658 = vmatpush.bf16.msra.mxu2 %v4563_v34  ;;  %2785 = vmatpush.bf16.msra.mxu0 %v4563_v34 }
 0x1f6   :  { %2850 = vmatpush.bf16.msra.mxu1 %v4563_v34  ;;  %2720 = vmatpush.bf16.msra.mxu3 %v4563_v34 }
 0x1f9   :  { %2659 = vmatpush.bf16.msra.mxu2 %v4562_v54  ;;  %2786 = vmatpush.bf16.msra.mxu0 %v4562_v54 }
 0x1fa   :  { %2851 = vmatpush.bf16.msra.mxu1 %v4562_v54  ;;  %2721 = vmatpush.bf16.msra.mxu3 %v4562_v54 }
 0x1fb   :  { %v2255_v36 = vpop.f32.mrf.mxu1  ;;  %v2294_v37 = vpop.f32.mrf.mxu0 }
 0x1fc   :  { %v2636_v36 = vpack.c.bf16 %v2634_v60, %v2634_v60 }
 0x203   :  { %v2305_v43 = vpop.f32.mrf.mxu1  ;;  %v2344_v45 = vpop.f32.mrf.mxu0 }
 0x204   :  { %v2306_v17 = vadd.f32 %v2305_v43, %v2293_v14  ;;  %v2345_v23 = vadd.f32 %v2344_v45, %v1715_v15 }
 0x20a   :  { %v2266_v53 = vpop.f32.mrf.mxu2 }
 0x20b   :  { %v2307_v57 = vpop.f32.mrf.mxu1  ;;  %v2346_v58 = vpop.f32.mrf.mxu0  ;;  %v2267_v6 = vadd.f32 %v2266_v53, %v2254_v5 }
 0x212   :  { %v2268_v61 = vpop.f32.mrf.mxu2 }
 0x213   :  { %v2357_v62 = vpop.f32.mrf.mxu1 }
 0x214   :  { %v2358_v24 = vadd.f32 %v2357_v62, %v2345_v23 }
 0x21a   :  { %v2318_v3 = vpop.f32.mrf.mxu2 }
 0x21b   :  { %v2359_v33 = vpop.f32.mrf.mxu1  ;;  %v2319_v18 = vadd.f32 %v2318_v3, %v2306_v17  ;;  %v2635_v3 = vld [vmem:[%s6730_s13] sm:$0x3] }
 0x222   :  { %v2320_v4 = vpop.f32.mrf.mxu2 }
 0x229   :  { %v2279_v11 = vpop.f32.mrf.mxu3 }
 0x22a   :  { %v2280_v8 = vadd.f32 %v2279_v11, %v2267_v6  ;;  %v2370_v10 = vpop.f32.mrf.mxu2 }
 0x22b   :  { %v2371_v49 = vadd.f32 %v2370_v10, %v2358_v24 }
 0x22c   :  { %vm2387_vm8 = vcmp.gt.f32.partialorder %v2280_v8, 0.0  ;;  %v2390_v56 = vmul.f32 0.01, %v2280_v8 }
 0x22e   :  { %v2393_v44 = vsel %vm2387_vm8, %v2280_v8, %v2390_v56 }
 0x22f   :  { %v2433_v12 = vpack.c.bf16 %v2393_v44, %v2393_v44 }
 0x231   :  { %v2281_v13 = vpop.f32.mrf.mxu3  ;;  %2559 = vmatmul.bf16.vlgmr.msrb.gmra.mxu0 %v2433_v12 }
 0x232   :  { %v2372_v16 = vpop.f32.mrf.mxu2 }
 0x239   :  { %v2331_v19 = vpop.f32.mrf.mxu3 }
 0x23a   :  { %v2332_v29 = vadd.f32 %v2331_v19, %v2319_v18 }
 0x23c   :  { %vm2388_vm9 = vcmp.gt.f32.partialorder %v2332_v29, 0.0  ;;  %v2391_v48 = vmul.f32 0.01, %v2332_v29 }
 0x23e   :  { %v2394_v20 = vsel %vm2388_vm9, %v2332_v29, %v2391_v48  ;;  %vm2912_vm9 = vcmask 1041408  }
 0x23f   :  { %v2434_v21 = vpack.c.bf16 %v2394_v20, %v2394_v20 }
 0x241   :  { %v2333_v22 = vpop.f32.mrf.mxu3  ;;  %2572 = vmatmul.bf16.vlgmr.msrb.gmra.mxu1 %v2434_v21 }
 0x249   :  { %v2383_v26 = vpop.f32.mrf.mxu3 }
 0x24a   :  { %v2384_v27 = vadd.f32 %v2383_v26, %v2371_v49 }
 0x24c   :  { %vm2389_vm10 = vcmp.gt.f32.partialorder %v2384_v27, 0.0  ;;  %v2392_v30 = vmul.f32 0.01, %v2384_v27 }
 0x24e   :  { %v2395_v31 = vsel %vm2389_vm10, %v2384_v27, %v2392_v30  ;;  %vm2914_vm10 = vcmask 1043456  }
 0x24f   :  { %v2435_v32 = vpack.c.bf16 %v2395_v31, %v2395_v31 }
 0x251   :  { %v2385_v50 = vpop.f32.mrf.mxu3  ;;  %4219 = vmatmul.msk.bf16.vlgmr.msrb.gmra.mxu2 %vm2547_vm11, %v2435_v32 }
 0x261   :  { %4237 = vmatmul.msk.bf16.vlgmr.msra.gmra.mxu2 %vm2547_vm11, %v2636_v36 }
 0x2ae   :  { %v2560_v35 = vpop.f32.mrf.mxu0 }
 0x2af   :  { %v2561_v43 = vadd.f32 %v4571_v42, %v2560_v35 }
 0x2b6   :  { %v2562_v37 = vpop.f32.mrf.mxu0 }
 0x2be   :  { %v2573_v40 = vpop.f32.mrf.mxu1 }
 0x2bf   :  { %v2574_v45 = vadd.f32 %v2573_v40, %v2561_v43 }
 0x2c6   :  { %v2575_v41 = vpop.f32.mrf.mxu1 }
 0x2d4   :  { %v2586_v46 = vpop.f32.mrf.mxu2 }
 0x2d5   :  { %v2587_v47 = vadd.f32 %v2586_v46, %v2574_v45 }
 0x2d7   :  { %vm2590_vm12 = vcmp.gt.f32.partialorder %v2587_v47, 0.0  ;;  %v2591_v51 = vmul.f32 0.01, %v2587_v47 }
 0x2d9   :  { %v2592_v52 = vsel %vm2590_vm12, %v2587_v47, %v2591_v51 }
 0x2da   :  { %v2593_v53 = vpack.c.bf16 %v2592_v52, %v2592_v52 }
 0x2dc   :  { %v2588_v57 = vpop.f32.mrf.mxu2  ;;  %4228 = vmatmul.msk.bf16.vlgmr.msrb.gmra.mxu3 %vm2547_vm11, %v2593_v53 }
 0x2e4   :  { %v2661_v58 = vpop.f32.mrf.mxu2 }
 0x2ec   :  { %v2663_v59 = vpop.f32.mrf.mxu2 }
 0x35f   :  { %v2626_v61 = vpop.f32.mrf.mxu3 }
 0x360   :  { %v6663_v62 = vadd.f32 %v4572_v63, %v2626_v61 }
 0x362   :  { %v2665_v0 = vadd.f32 %v2661_v58, %v6663_v62 }
 0x364   :  { %4574 = vtanh.f32 %v2665_v0  ;;  %v4238_v33 = vmul.f32 -1.442695, %v2665_v0 }
 0x366   :  { %4576 = vpow2.f32 %v4238_v33 }
 0x367   :  { %v2628_v1 = vpop.f32.mrf.mxu3 }
 0x36a   :  { %v4575_v2 = vpop.eup %4574 }
 0x36b   :  { %2692 = vrot.lane.b32.xlu0 %v4575_v2, %s4658_s8 }
 0x36c   :  { %v4577_v38 = vpop.eup %4576 }
 0x36d   :  { %v2669_v55 = vadd.f32 1.0, %v4577_v38 }
 0x36f   :  { %4578 = vrcp.f32 %v2669_v55  ;;  %v2681_v8 = vand.u32 2147483648, %v2669_v55  ;;  %vm2675_vm14 = vweird.f32 %v2669_v55  ;;  %v2679_v56 = vand.u32 2147483647, %v2669_v55 }
 0x371   :  { %v2682_v10 = vor.u32 1.1754944e-38, %v2681_v8  ;;  %vm2680_vm0 = vcmp.eq.f32.partialorder %v2679_v56, 8.507059e+37 }
 0x373   :  { %2687 = vrot.lane.b32.xlu0 %v2635_v3, %s4659_s26 }
 0x375   :  { %v4579_v25 = vpop.eup %4578 }
 0x376   :  { %v2671_v4 = vmul.f32 %v4579_v25, %v2669_v55  ;;  %vm2676_vm13 = vweird.f32 %v4579_v25 }
 0x377   :  { %vm2677_vm15 = vmor %vm2675_vm14, %vm2676_vm13 }
 0x378   :  { %v2672_v5 = vsub.f32 1.0, %v2671_v4 }
 0x37a   :  { %v2673_v6 = vmul.f32 %v4579_v25, %v2672_v5 }
 0x37c   :  { %v2674_v11 = vadd.f32 %v4579_v25, %v2673_v6 }
 0x37e   :  { %v2678_v9 = vsel %vm2677_vm15, %v4579_v25, %v2674_v11 }
 0x37f   :  { %v2683_v12 = vsel %vm2680_vm0, %v2682_v10, %v2678_v9  ;;  %vm2916_vm0 = vcmask 1045504  }
 0x3dd   :  { %v2693_v44 = vpop.permute.xlu0 %2692 }
 0x3de   :  { %v2695_v28 = vmul.f32 %v2693_v44, %v2683_v12 }
 0x3e0   :  { %2697 = vrot.lane.b32.xlu1 %v2695_v28, %s4659_s26 }
 0x3e5   :  { %v2688_v13 = vpop.permute.xlu0 %2687 }
 0x3e6   :  { %v2690_v14 = vmul.f32 %v2688_v13, %v2683_v12 }
 0x452   :  { %v2698_v16 = vpop.permute.xlu1 %2697 }
 0x453   :  { %v2700_v17 = vadd.f32 %v2698_v16, %v2690_v14 }
 0x455   :  { %4580 = vtanh.f32 %v2700_v17  ;;  %v2752_v40 = vrot.slane %v2700_v17, 6 }
 0x45b   :  { %v4581_v18 = vpop.eup %4580 }
 0x45c   :  { %2703 = vrot.lane.b32.xlu1 %v4581_v18, %s4658_s8 }
 0x4ce   :  { %v2704_v19 = vpop.permute.xlu1 %2703 }
 0x4cf   :  { %v6673_v29 = vmul.f32 %v2704_v19, %v2683_v12 }
 0x4d1   :  { %v2707_v48 = vpack.c.bf16 %v6673_v29, %v6673_v29 }
 0x4d3   :  { %2709 = vrot.lane.b32.xlu2 %v2707_v48, %s4659_s26 }
 0x52d   :  { %v2710_v20 = vpop.permute.xlu2 %2709 }
 0x52e   :  { %4239 = vmatmul.msk.bf16.vlgmr.msra.gmra.mxu3 %vm2547_vm11, %v2710_v20 }
 0x5b1   :  { %v2723_v21 = vpop.f32.mrf.mxu3 }
 0x5b2   :  { %v2728_v15 = vrot.slane %v2723_v21, 6 }
 0x5b4   :  { %v2730_v22 = vadd.f32 %v2728_v15, %v6663_v62 }
 0x5b6   :  { %4582 = vtanh.f32 %v2730_v22  ;;  %v4240_v49 = vmul.f32 -1.442695, %v2730_v22 }
 0x5b8   :  { %4584 = vpow2.f32 %v4240_v49 }
 0x5b9   :  { %v2725_v23 = vpop.f32.mrf.mxu3 }
 0x5bc   :  { %v4583_v24 = vpop.eup %4582 }
 0x5bd   :  { %2756 = vrot.lane.b32.xlu2 %v4583_v24, %s4658_s8 }
 0x5be   :  { %v4585_v26 = vpop.eup %4584 }
 0x5bf   :  { %v2734_v27 = vadd.f32 1.0, %v4585_v26 }
 0x5c1   :  { %4586 = vrcp.f32 %v2734_v27  ;;  %v2746_v34 = vand.u32 2147483648, %v2734_v27  ;;  %vm2740_vm2 = vweird.f32 %v2734_v27  ;;  %v2744_v54 = vand.u32 2147483647, %v2734_v27 }
 0x5c3   :  { %v2747_v60 = vor.u32 1.1754944e-38, %v2746_v34  ;;  %vm2745_vm4 = vcmp.eq.f32.partialorder %v2744_v54, 8.507059e+37 }
 0x5c7   :  { %v4587_v30 = vpop.eup %4586 }
 0x5c8   :  { %v2736_v31 = vmul.f32 %v4587_v30, %v2734_v27  ;;  %vm2741_vm1 = vweird.f32 %v4587_v30 }
 0x5c9   :  { %vm2742_vm3 = vmor %vm2740_vm2, %vm2741_vm1  ;;  %vm2905_vm1 = vcmask 261126  }
 0x5ca   :  { %v2737_v32 = vsub.f32 1.0, %v2736_v31 }
 0x5cc   :  { %v2738_v50 = vmul.f32 %v4587_v30, %v2737_v32 }
 0x5ce   :  { %v2739_v7 = vadd.f32 %v4587_v30, %v2738_v50 }
 0x5d0   :  { %v2743_v35 = vsel %vm2742_vm3, %v4587_v30, %v2739_v7 }
 0x5d1   :  { %v2748_v37 = vsel %vm2745_vm4, %v2747_v60, %v2743_v35 }
 0x5d2   :  { %v2754_v41 = vmul.f32 %v2752_v40, %v2748_v37 }
 0x617   :  { %v2757_v36 = vpop.permute.xlu2 %2756 }
 0x618   :  { %v2759_v39 = vmul.f32 %v2757_v36, %v2748_v37 }
 0x61a   :  { %2761 = vrot.lane.b32.xlu0 %v2759_v39, %s4659_s26 }
 0x68c   :  { %v2762_v42 = vpop.permute.xlu0 %2761 }
 0x68d   :  { %v2764_v43 = vadd.f32 %v2762_v42, %v2754_v41 }
 0x68f   :  { %4588 = vtanh.f32 %v2764_v43  ;;  %v2817_v10 = vrot.slane %v2764_v43, 6 }
 0x695   :  { %v4589_v45 = vpop.eup %4588 }
 0x696   :  { %2767 = vrot.lane.b32.xlu1 %v4589_v45, %s4658_s8 }
 0x708   :  { %v2768_v46 = vpop.permute.xlu1 %2767 }
 0x709   :  { %v2770_v47 = vmul.f32 %v2768_v46, %v2748_v37 }
 0x70b   :  { %v2771_v51 = vpack.c.bf16 %v2770_v47, %v2770_v47  ;;  %v2913_v17 = vsel %vm2912_vm9, %v6673_v29, %v2770_v47 }
 0x70d   :  { %v2773_v52 = vrot.slane %v2771_v51, 1 }
 0x70f   :  { %2774 = vrot.lane.b32.xlu2 %v2773_v52, %s4659_s26  ;;  %v4565_v52 = vld [vmem:[%s6731_s14 + $0x8] sm:$0xff] }
 0x710   :  { %2951 = vmatpush.bf16.msrb.mxu2 %v4565_v52 }
 0x769   :  { %v2775_v53 = vpop.permute.xlu2 %2774 }
 0x76a   :  { %4241 = vmatmul.msk.bf16.vlgmr.msra.gmra.mxu0 %vm2547_vm11, %v2775_v53  ;;  %v4564_v53 = vld [vmem:[%s6731_s14] sm:$0xff]  ;;  %s2979_s14 = sshll.u32 %s6735_s18, 4  ;;  %s2980_s14 = int_to_ptr.hbm [resolvable:$true] %s2979_s14 }
 0x76b   :  { %2952 = vmatpush.bf16.msrb.mxu2 %v4564_v53 }
 0x7e7   :  { %v2788_v57 = vpop.f32.mrf.mxu0 }
 0x7e8   :  { %v2793_v58 = vrot.slane %v2788_v57, 4 }
 0x7ea   :  { %v2795_v59 = vadd.f32 %v2793_v58, %v6663_v62 }
 0x7ec   :  { %4590 = vtanh.f32 %v2795_v59  ;;  %v4242_v0 = vmul.f32 -1.442695, %v2795_v59  ;;  %v4573_v59 = vld [vmem:[%s6732_s15] ss:$0 sm:$0xff] }
 0x7ee   :  { %4592 = vpow2.f32 %v4242_v0 }
 0x7ef   :  { %v2790_v63 = vpop.f32.mrf.mxu0 }
 0x7f2   :  { %v4591_v61 = vpop.eup %4590 }
 0x7f3   :  { %2821 = vrot.lane.b32.xlu0 %v4591_v61, %s4658_s8 }
 0x7f4   :  { %v4593_v1 = vpop.eup %4592 }
 0x7f5   :  { %v2799_v2 = vadd.f32 1.0, %v4593_v1 }
 0x7f7   :  { %4594 = vrcp.f32 %v2799_v2  ;;  %v2811_v4 = vand.u32 2147483648, %v2799_v2  ;;  %vm2805_vm6 = vweird.f32 %v2799_v2  ;;  %v2809_v5 = vand.u32 2147483647, %v2799_v2 }
 0x7f9   :  { %v2812_v11 = vor.u32 1.1754944e-38, %v2811_v4  ;;  %vm2810_vm8 = vcmp.eq.f32.partialorder %v2809_v5, 8.507059e+37 }
 0x7fd   :  { %v4595_v3 = vpop.eup %4594 }
 0x7fe   :  { %v2801_v33 = vmul.f32 %v4595_v3, %v2799_v2  ;;  %vm2806_vm5 = vweird.f32 %v4595_v3 }
 0x7ff   :  { %vm2807_vm7 = vmor %vm2805_vm6, %vm2806_vm5 }
 0x800   :  { %v2802_v38 = vsub.f32 1.0, %v2801_v33 }
 0x802   :  { %v2803_v55 = vmul.f32 %v4595_v3, %v2802_v38 }
 0x804   :  { %v2804_v25 = vadd.f32 %v4595_v3, %v2803_v55 }
 0x806   :  { %v2808_v6 = vsel %vm2807_vm7, %v4595_v3, %v2804_v25 }
 0x807   :  { %v2813_v56 = vsel %vm2810_vm8, %v2812_v11, %v2808_v6 }
 0x808   :  { %v2819_v44 = vmul.f32 %v2817_v10, %v2813_v56 }
 0x865   :  { %v2822_v8 = vpop.permute.xlu0 %2821 }
 0x866   :  { %v2824_v9 = vmul.f32 %v2822_v8, %v2813_v56 }
 0x868   :  { %2826 = vrot.lane.b32.xlu1 %v2824_v9, %s4659_s26 }
 0x8da   :  { %v2827_v12 = vpop.permute.xlu1 %2826 }
 0x8db   :  { %v2829_v28 = vadd.f32 %v2827_v12, %v2819_v44 }
 0x8dd   :  { %4596 = vtanh.f32 %v2829_v28  ;;  %v2882_v37 = vrot.slane %v2829_v28, 6 }
 0x8e3   :  { %v4597_v13 = vpop.eup %4596 }
 0x8e4   :  { %2832 = vrot.lane.b32.xlu2 %v4597_v13, %s4658_s8 }
 0x93e   :  { %v2833_v14 = vpop.permute.xlu2 %2832 }
 0x93f   :  { %v2835_v16 = vmul.f32 %v2833_v14, %v2813_v56 }
 0x941   :  { %v2836_v18 = vpack.c.bf16 %v2835_v16, %v2835_v16  ;;  %v2915_v19 = vsel %vm2914_vm10, %v2913_v17, %v2835_v16 }
 0x943   :  { %v2838_v48 = vrot.slane %v2836_v18, 2 }
 0x945   :  { %2839 = vrot.lane.b32.xlu0 %v2838_v48, %s4659_s26 }
 0x9b7   :  { %v2840_v20 = vpop.permute.xlu0 %2839 }
 0x9b8   :  { %4243 = vmatmul.msk.bf16.vlgmr.msra.gmra.mxu1 %vm2547_vm11, %v2840_v20 }
 0xa35   :  { %v2853_v21 = vpop.f32.mrf.mxu1 }
 0xa36   :  { %v2858_v15 = vrot.slane %v2853_v21, 2 }
 0xa38   :  { %v2860_v22 = vadd.f32 %v2858_v15, %v6663_v62 }
 0xa3a   :  { %4598 = vtanh.f32 %v2860_v22  ;;  %v4244_v49 = vmul.f32 -1.442695, %v2860_v22 }
 0xa3c   :  { %4600 = vpow2.f32 %v4244_v49 }
 0xa3d   :  { %v2855_v23 = vpop.f32.mrf.mxu1 }
 0xa40   :  { %v4599_v24 = vpop.eup %4598 }
 0xa41   :  { %2886 = vrot.lane.b32.xlu1 %v4599_v24, %s4658_s8 }
 0xa42   :  { %v4601_v29 = vpop.eup %4600 }
 0xa43   :  { %v2864_v26 = vadd.f32 1.0, %v4601_v29 }
 0xa45   :  { %4602 = vrcp.f32 %v2864_v26  ;;  %v2876_v7 = vand.u32 2147483648, %v2864_v26  ;;  %vm2870_vm13 = vweird.f32 %v2864_v26  ;;  %v2874_v34 = vand.u32 2147483647, %v2864_v26 }
 0xa47   :  { %v2877_v54 = vor.u32 1.1754944e-38, %v2876_v7  ;;  %vm2875_vm15 = vcmp.eq.f32.partialorder %v2874_v34, 8.507059e+37 }
 0xa4b   :  { %v4603_v27 = vpop.eup %4602 }
 0xa4c   :  { %v2866_v30 = vmul.f32 %v4603_v27, %v2864_v26  ;;  %vm2871_vm12 = vweird.f32 %v4603_v27 }
 0xa4d   :  { %vm2872_vm14 = vmor %vm2870_vm13, %vm2871_vm12 }
 0xa4e   :  { %v2867_v31 = vsub.f32 1.0, %v2866_v30 }
 0xa50   :  { %v2868_v32 = vmul.f32 %v4603_v27, %v2867_v31 }
 0xa52   :  { %v2869_v50 = vadd.f32 %v4603_v27, %v2868_v32 }
 0xa54   :  { %v2873_v62 = vsel %vm2872_vm14, %v4603_v27, %v2869_v50 }
 0xa55   :  { %v2878_v60 = vsel %vm2875_vm15, %v2877_v54, %v2873_v62 }
 0xa56   :  { %v2884_v39 = vmul.f32 %v2882_v37, %v2878_v60 }
 0xab3   :  { %v2887_v35 = vpop.permute.xlu1 %2886 }
 0xab4   :  { %v2889_v36 = vmul.f32 %v2887_v35, %v2878_v60 }
 0xab6   :  { %2891 = vrot.lane.b32.xlu2 %v2889_v36, %s4659_s26 }
 0xb10   :  { %v2892_v40 = vpop.permute.xlu2 %2891 }
 0xb11   :  { %v2894_v41 = vadd.f32 %v2892_v40, %v2884_v39 }
 0xb13   :  { %4604 = vtanh.f32 %v2894_v41 }
 0xb19   :  { %v4605_v42 = vpop.eup %4604 }
 0xb1a   :  { %2897 = vrot.lane.b32.xlu0 %v4605_v42, %s4658_s8 }
 0xb22   :  { %2908 = vrot.lane.b32.xlu0 %v2894_v41, %s4660_s10 }
 0xb8c   :  { %v2898_v43 = vpop.permute.xlu0 %2897 }
 0xb8d   :  { %v2900_v45 = vmul.f32 %v2898_v43, %v2878_v60 }
 0xb8f   :  { %2902 = vrot.lane.b32.xlu2 %v2900_v45, %s4659_s26  ;;  %v2917_v46 = vsel %vm2916_vm0, %v2915_v19, %v2900_v45 }
 0xb90   :  { %v2918_v47 = vpack.c.bf16 %v2917_v46, %v2917_v46 }
 0xb92   :  { %2928 = vrot.lane.b32.xlu1 %v2918_v47, %s4659_s26 }
 0xb94   :  { %v2909_v51 = vpop.permute.xlu0 %2908 }
 0xb95   :  { %2911 = vst.msk [vmem:[#allocation4 - $0x6] sm:$0xc0] %vm2905_vm1, %v2909_v51 }
 0xb96   :  { %2982 = dma.vmem_to_hbm [thread:$0]  %s2978_s1, 32, %s2980_s14, [#allocation5]  }
 0xbe9   :  { %v2903_v57 = vpop.permute.xlu2 %2902 }
 0xbea   :  { %2906 = vst.msk [vmem:[#allocation2 - $0x6] sm:$0xc0] %vm2905_vm1, %v2903_v57 }
 0xbeb   :  { %2971 = dma.vmem_to_hbm [thread:$0]  %s2967_s30, 32, %s2969_s7, [#allocation3]  }
 0xc04   :  { %v2929_v58 = vpop.permute.xlu1 %2928 }
 0xc05   :  { %4253 = vmatmul.msk.bf16.vlgmr.msrb.gmra.mxu2 %vm2547_vm11, %v2929_v58 }
 0xc88   :  { %v2954_v63 = vpop.f32.mrf.mxu2 }
 0xc89   :  { %v2955_v61 = vadd.f32 %v4573_v59, %v2954_v63 }
 0xc8b   :  { %2958 = vst [vmem:[%s6733_s16] sm:$0xff] %v2955_v61 }
 0xc90   :  { %v2956_v0 = vpop.f32.mrf.mxu2 }
 0xc91   :  { %4654 = dma.done.wait [#allocation3], 32  }
 0xc92   :  { %4655 = vsyncadd [#allocation3], 4294967264 }
 0xc93   :  { %4656 = dma.done.wait [#allocation5], 32  }
 0xc94   :  { %4657 = vsyncadd [#allocation5], 4294967264 }
 0xc95   :  { %2993 = vsyncpa [#allocation3], 1 }
 0xc96   :  { %2994 = vsyncpa [#allocation5], 1 }

</bundles_post_ra>
